<compile_context>
chip_gen: v7x
topology: tpu7x:2x2x1
jax: 0.10.0
libtpu: 0.0.40
codegen_flags: <defaults>
</compile_context>

<pallas_src>
import math

import jax
import jax.numpy as jnp
from jax import lax
from jax.experimental import pallas as pl
from jax.experimental.pallas import tpu as pltpu

# Logical sizes (match the PyTorch module).
HIDDEN = 120            # nn.GRU hidden_size
N_LAYERS = 2

# TPU-friendly padded hidden: each GRU gate occupies one lane-aligned 128 slab.
HP = 128


def _round_up(n, m):
    return (n + m - 1) // m * m


# ---------------------------------------------------------------------------
# Kernel
# ---------------------------------------------------------------------------
def _make_kernel(t_chunk, n_t, t_rem, unroll):
    """Build the (batch-block, time-chunk) 2-layer GRU recurrence kernel.

    t_rem = number of valid steps in the LAST time chunk (1..t_chunk); all
    sizes are static Python ints (jit specialises on shapes), so no scalar
    prefetch and no per-step masking is needed.
    """

    def kernel(gi0_ref,                         # (t_chunk, b_block, 3*HP) bf16  (x@Wih0+b, precomputed)
               whh0_ref, bhh0_ref,              # (HP, 3*HP) bf16 / (1, 3*HP) f32
               wih1_ref, whh1_ref, bih1_ref, bhh1_ref,
               wout_ref, bout_ref,              # (1, 2*HP) f32 / (1, 1) f32
               out_ref,                         # (b_block, 1) f32
               h0_ref, h1_ref):                 # VMEM scratch (b_block, HP) f32
        tc = pl.program_id(1)                   # time-chunk index (serial axis)

        @pl.when(tc == 0)
        def _init():
            h0_ref[...] = jnp.zeros_like(h0_ref)
            h1_ref[...] = jnp.zeros_like(h1_ref)

        def gru_update(gi, gh, h):
            # PyTorch gate order [r, z, n]; every slice is a lane-aligned 128 slab.
            r = jax.nn.sigmoid(gi[:, 0 * HP:1 * HP] + gh[:, 0 * HP:1 * HP])
            z = jax.nn.sigmoid(gi[:, 1 * HP:2 * HP] + gh[:, 1 * HP:2 * HP])
            n = jnp.tanh(gi[:, 2 * HP:3 * HP] + r * gh[:, 2 * HP:3 * HP])
            return (1.0 - z) * n + z * h

        def step(i, carry):
            h0, h1 = carry
            # Weight refs re-read each step: cheap VMEM-local loads, keeps vreg
            # pressure bounded under the partial unroll (no spill traffic).
            gi0 = gi0_ref[i].astype(jnp.float32)                       # (b_block, 3*HP)
            gh0 = jnp.dot(h0.astype(jnp.bfloat16), whh0_ref[...],
                          preferred_element_type=jnp.float32) + bhh0_ref[...]
            h0n = gru_update(gi0, gh0, h0)                             # layer 0
            gi1 = jnp.dot(h0n.astype(jnp.bfloat16), wih1_ref[...],
                          preferred_element_type=jnp.float32) + bih1_ref[...]
            gh1 = jnp.dot(h1.astype(jnp.bfloat16), whh1_ref[...],
                          preferred_element_type=jnp.float32) + bhh1_ref[...]
            h1n = gru_update(gi1, gh1, h1)                             # layer 1
            return h0n, h1n

        def run_chunk(n_steps):
            h0, h1 = lax.fori_loop(0, n_steps, step,
                                   (h0_ref[...], h1_ref[...]),
                                   unroll=min(unroll, n_steps))
            h0_ref[...] = h0
            h1_ref[...] = h1

        # Full chunks run unmasked; the last chunk runs its true trip count.
        if n_t == 1:
            run_chunk(t_rem)
        elif t_rem == t_chunk:
            run_chunk(t_chunk)
        else:
            @pl.when(tc < n_t - 1)
            def _full():
                run_chunk(t_chunk)

            @pl.when(tc == n_t - 1)
            def _last():
                run_chunk(t_rem)

        @pl.when(tc == n_t - 1)
        def _finalize():
            h0 = h0_ref[...]
            h1 = h1_ref[...]
            # flatten(h_n.permute(1,0,2), 1) @ W_out.T + b, computed per layer
            # to avoid a (b_block, 2*HP) concat copy; the N=1 Linear is a VPU
            # mul + lane reduce (padded hidden columns are exactly zero).
            logits = (jnp.sum(h0 * wout_ref[:, 0 * HP:1 * HP], axis=-1, keepdims=True)
                      + jnp.sum(h1 * wout_ref[:, 1 * HP:2 * HP], axis=-1, keepdims=True)
                      + bout_ref[...])
            out_ref[...] = jax.nn.sigmoid(logits)

    return kernel


# ---------------------------------------------------------------------------
# Parameters (synthetic init matching nn.GRU / nn.Linear + init_weights)
# ---------------------------------------------------------------------------
def _pad_gate_cols(w, hidden):
    """(..., 3*hidden) -> (..., 3*HP): each gate zero-padded to a 128 slab."""
    r, z, n = jnp.split(w, 3, axis=-1)
    pad = [(0, 0)] * (w.ndim - 1) + [(0, HP - hidden)]
    return jnp.concatenate([jnp.pad(g, pad) for g in (r, z, n)], axis=-1)


def _pad_rows(w, rows):
    return jnp.pad(w, ((0, rows - w.shape[0]), (0, 0)))


def init_params(key, n_channels, hidden=HIDDEN):
    """GRU weights/biases: U(-1/sqrt(H), 1/sqrt(H)); Linear weight xavier_uniform.

    Matrices are stored transposed for row-vector matmuls and zero-padded so
    each GRU gate occupies a lane-aligned 128-wide slab (120 -> 128); the zero
    padding + zero h-init keep the padded hidden columns identically zero, so
    the forward semantics of the original H=120 module are preserved (up to
    bf16-matmul / f32-accumulate precision).
    """
    ks = jax.random.split(key, 10)
    k = 1.0 / math.sqrt(hidden)

    def u(kk, shape, scale):
        return jax.random.uniform(kk, shape, jnp.float32, -scale, scale)

    wih0 = u(ks[0], (n_channels, 3 * hidden), k)       # == W_ih_l0.T
    whh0 = u(ks[1], (hidden, 3 * hidden), k)           # == W_hh_l0.T
    bih0 = u(ks[2], (1, 3 * hidden), k)
    bhh0 = u(ks[3], (1, 3 * hidden), k)
    wih1 = u(ks[4], (hidden, 3 * hidden), k)           # == W_ih_l1.T
    whh1 = u(ks[5], (hidden, 3 * hidden), k)
    bih1 = u(ks[6], (1, 3 * hidden), k)
    bhh1 = u(ks[7], (1, 3 * hidden), k)

    fan_in, fan_out = N_LAYERS * hidden, 1
    xav = math.sqrt(6.0 / (fan_in + fan_out))          # xavier_uniform, gain=1
    wout = u(ks[8], (fan_in, fan_out), xav)            # == Linear.weight.T
    bout = u(ks[9], (1, 1), 1.0 / math.sqrt(fan_in))

    params = {
        # layer-0 input projection (consumed by the hoisted XLA matmul)
        "wih0": _pad_gate_cols(wih0, hidden).astype(jnp.bfloat16),            # (C, 3*HP)
        "bih0": _pad_gate_cols(bih0, hidden),                                 # (1, 3*HP) f32
        # recurrent weights in bf16 for the MXU; biases stay f32
        "whh0": _pad_rows(_pad_gate_cols(whh0, hidden), HP).astype(jnp.bfloat16),
        "bhh0": _pad_gate_cols(bhh0, hidden),
        "wih1": _pad_rows(_pad_gate_cols(wih1, hidden), HP).astype(jnp.bfloat16),
        "whh1": _pad_rows(_pad_gate_cols(whh1, hidden), HP).astype(jnp.bfloat16),
        "bih1": _pad_gate_cols(bih1, hidden),
        "bhh1": _pad_gate_cols(bhh1, hidden),
        # output head as a (1, 2*HP) row: [w_layer0 | w_layer1], zero-padded
        "wout": jnp.concatenate(
            [jnp.pad(wout[:hidden, 0], (0, HP - hidden)),
             jnp.pad(wout[hidden:, 0], (0, HP - hidden))]).reshape(1, 2 * HP),
        "bout": bout,                                                         # (1, 1)
    }
    return params


# ---------------------------------------------------------------------------
# Wrapper
# ---------------------------------------------------------------------------
def _pick_b_block(b8):
    """Adaptive batch tile: fill MXU rows, keep >=2 blocks for megacore when
    the batch is big enough, never pad a tiny batch just for the second core."""
    if b8 <= 8:
        return 8
    if b8 <= 256:
        return min(128, _round_up((b8 + 1) // 2, 16))   # two bf16-friendly blocks
    return 128


@jax.jit
def discriminator_forward(x, params):
    """x: (batch, seq, channels), matching PyTorch batch_first=True."""
    B, T, C = x.shape

    b8 = _round_up(B, 8)
    b_block = _pick_b_block(b8)
    BP = _round_up(b8, b_block)
    n_b = BP // b_block

    t_chunk = min(32, _round_up(T, 8))
    TP = _round_up(T, t_chunk)
    n_t = TP // t_chunk
    t_rem = T - (n_t - 1) * t_chunk                    # valid steps in last chunk

    # Hoisted layer-0 input projection: one batched MXU matmul over all (t, b)
    # instead of T tiny per-step matmuls. Transpose the tiny x (C floats/elem)
    # so the result is written time-major directly, and store it in bf16 to
    # halve the dominant HBM stream (the producing matmul is bf16 x bf16 with
    # f32 accumulate anyway).
    xt = jnp.swapaxes(x, 0, 1).astype(jnp.bfloat16)                       # (T, B, C)
    gi0 = jnp.einsum("tbc,ch->tbh", xt, params["wih0"],
                     preferred_element_type=jnp.float32) + params["bih0"]
    gi0 = gi0.astype(jnp.bfloat16)
    gi0 = jnp.pad(gi0, ((0, TP - T), (0, BP - B), (0, 0)))                # (TP, BP, 3*HP)

    kernel = _make_kernel(t_chunk, n_t, t_rem, unroll=8)

    out = pl.pallas_call(
        kernel,
        out_shape=jax.ShapeDtypeStruct((BP, 1), jnp.float32),
        grid=(n_b, n_t),
        in_specs=[
            pl.BlockSpec((t_chunk, b_block, 3 * HP), lambda b, t: (t, b, 0)),  # gi0
            pl.BlockSpec((HP, 3 * HP), lambda b, t: (0, 0)),                   # whh0
            pl.BlockSpec((1, 3 * HP), lambda b, t: (0, 0)),                    # bhh0
            pl.BlockSpec((HP, 3 * HP), lambda b, t: (0, 0)),                   # wih1
            pl.BlockSpec((HP, 3 * HP), lambda b, t: (0, 0)),                   # whh1
            pl.BlockSpec((1, 3 * HP), lambda b, t: (0, 0)),                    # bih1
            pl.BlockSpec((1, 3 * HP), lambda b, t: (0, 0)),                    # bhh1
            pl.BlockSpec((1, 2 * HP), lambda b, t: (0, 0)),                    # wout
            pl.BlockSpec((1, 1), lambda b, t: (0, 0)),                         # bout
        ],
        out_specs=pl.BlockSpec((b_block, 1), lambda b, t: (b, 0)),
        scratch_shapes=[pltpu.VMEM((b_block, HP), jnp.float32),                # h0 carry
                        pltpu.VMEM((b_block, HP), jnp.float32)],               # h1 carry
        compiler_params=pltpu.CompilerParams(
            dimension_semantics=("parallel", "arbitrary"),
            vmem_limit_bytes=32 * 1024 * 1024),
    )(gi0, params["whh0"], params["bhh0"],
      params["wih1"], params["whh1"], params["bih1"], params["bhh1"],
      params["wout"], params["bout"])

    return jnp.squeeze(out[:B])      # matches x.squeeze() in the PyTorch module


if __name__ == "__main__":
    key = jax.random.PRNGKey(0)
    kx, kp = jax.random.split(key)

    B, T, C = 2, 8, 4                # batch=2, seq=8, N_channels=4
    x = jax.random.normal(kx, (B, T, C), dtype=jnp.float32)
    params = init_params(kp, C)

    y = discriminator_forward(x, params)
    jax.block_until_ready(y)

    assert y.shape == (B,), y.shape
    assert bool(jnp.all((y > 0.0) & (y < 1.0)))   # sigmoid output range
    print("KERNEL_OK")
</pallas_src>

<mosaic_0001>
module attributes {stable_mosaic.version = 11 : i64} {
  func.func @kernel(%arg0: i32, %arg1: i32, %arg2: memref<8x8x384xbf16, #tpu.memory_space<vmem>>, %arg3: memref<128x384xbf16, #tpu.memory_space<vmem>>, %arg4: memref<1x384xf32, #tpu.memory_space<vmem>>, %arg5: memref<128x384xbf16, #tpu.memory_space<vmem>>, %arg6: memref<128x384xbf16, #tpu.memory_space<vmem>>, %arg7: memref<1x384xf32, #tpu.memory_space<vmem>>, %arg8: memref<1x384xf32, #tpu.memory_space<vmem>>, %arg9: memref<1x256xf32, #tpu.memory_space<vmem>>, %arg10: memref<1x1xf32, #tpu.memory_space<vmem>>, %arg11: memref<8x1xf32, #tpu.memory_space<vmem>>, %arg12: memref<8x128xf32, #tpu.memory_space<vmem>>, %arg13: memref<8x128xf32, #tpu.memory_space<vmem>>) attributes {dimension_semantics = [#tpu.dimension_semantics<parallel>, #tpu.dimension_semantics<arbitrary>], iteration_bounds = array<i64: 1, 1>, scalar_prefetch = 0 : i64, scratch_operands = 2 : i64, tpu.core_type = #tpu.core_type<tc>, window_params = [{transform_indices = @transform_0, window_bounds = array<i64: 8, 8, 384>}, {pipeline_mode = #tpu.pipeline_mode<synchronous>, transform_indices = @transform_1, window_bounds = array<i64: 128, 384>}, {pipeline_mode = #tpu.pipeline_mode<synchronous>, transform_indices = @transform_2, window_bounds = array<i64: 1, 384>}, {pipeline_mode = #tpu.pipeline_mode<synchronous>, transform_indices = @transform_3, window_bounds = array<i64: 128, 384>}, {pipeline_mode = #tpu.pipeline_mode<synchronous>, transform_indices = @transform_4, window_bounds = array<i64: 128, 384>}, {pipeline_mode = #tpu.pipeline_mode<synchronous>, transform_indices = @transform_5, window_bounds = array<i64: 1, 384>}, {pipeline_mode = #tpu.pipeline_mode<synchronous>, transform_indices = @transform_6, window_bounds = array<i64: 1, 384>}, {pipeline_mode = #tpu.pipeline_mode<synchronous>, transform_indices = @transform_7, window_bounds = array<i64: 1, 256>}, {pipeline_mode = #tpu.pipeline_mode<synchronous>, transform_indices = @transform_8, window_bounds = array<i64: 1, 1>}, {transform_indices = @transform_9, window_bounds = array<i64: 8, 1>}]} {
    %c0_i32 = arith.constant 0 : i32
    %0 = arith.cmpi eq, %arg1, %c0_i32 : i32
    %1 = arith.extui %0 : i1 to i32
    %c0_i32_0 = arith.constant 0 : i32
    %2 = arith.cmpi ne, %1, %c0_i32_0 : i32
    scf.if %2 {
      %cst_194 = arith.constant 0.000000e+00 : f32
      %602 = vector.broadcast %cst_194 : f32 to vector<8x128xf32>
      %c0_195 = arith.constant 0 : index
      %c0_196 = arith.constant 0 : index
      %603 = vector.load %arg12[%c0_195, %c0_196] : memref<8x128xf32, #tpu.memory_space<vmem>>, vector<8x128xf32>
      tpu.vector_store %arg12[%c0_195, %c0_196], %602 {strides = array<i32>} : memref<8x128xf32, #tpu.memory_space<vmem>>, vector<8x128xf32>,
      %cst_197 = arith.constant 0.000000e+00 : f32
      %604 = vector.broadcast %cst_197 : f32 to vector<8x128xf32>
      %c0_198 = arith.constant 0 : index
      %c0_199 = arith.constant 0 : index
      %605 = vector.load %arg13[%c0_198, %c0_199] : memref<8x128xf32, #tpu.memory_space<vmem>>, vector<8x128xf32>
      tpu.vector_store %arg13[%c0_198, %c0_199], %604 {strides = array<i32>} : memref<8x128xf32, #tpu.memory_space<vmem>>, vector<8x128xf32>,
    } else {
    }
    %c0 = arith.constant 0 : index
    %c0_1 = arith.constant 0 : index
    %3 = vector.load %arg12[%c0, %c0_1] : memref<8x128xf32, #tpu.memory_space<vmem>>, vector<8x128xf32>
    %c0_2 = arith.constant 0 : index
    %c0_3 = arith.constant 0 : index
    %4 = vector.load %arg13[%c0_2, %c0_3] : memref<8x128xf32, #tpu.memory_space<vmem>>, vector<8x128xf32>
    %c0_i32_4 = arith.constant 0 : i32
    %5 = arith.index_cast %c0_i32_4 : i32 to index
    %c0_5 = arith.constant 0 : index
    %c0_6 = arith.constant 0 : index
    %6 = vector.load %arg2[%5, %c0_5, %c0_6] : memref<8x8x384xbf16, #tpu.memory_space<vmem>>, vector<1x8x384xbf16>
    %7 = vector.shape_cast %6 : vector<1x8x384xbf16> to vector<8x384xbf16>
    %8 = arith.extf %7 : vector<8x384xbf16> to vector<8x384xf32>
    %9 = arith.truncf %3 : vector<8x128xf32> to vector<8x128xbf16>
    %c0_7 = arith.constant 0 : index
    %c0_8 = arith.constant 0 : index
    %10 = vector.load %arg3[%c0_7, %c0_8] : memref<128x384xbf16, #tpu.memory_space<vmem>>, vector<128x384xbf16>
    %cst = arith.constant dense<0.000000e+00> : vector<8x384xf32>
    %11 = tpu.matmul %9, %10, %cst {dimension_numbers = #tpu.dot_dimension_numbers<[1], [0], [0], [1], [0, 0, 1, 1], [], []>} : vector<8x128xbf16>, vector<128x384xbf16>, vector<8x384xf32> -> vector<8x384xf32>
    %c0_9 = arith.constant 0 : index
    %c0_10 = arith.constant 0 : index
    %12 = vector.load %arg4[%c0_9, %c0_10] : memref<1x384xf32, #tpu.memory_space<vmem>>, vector<1x384xf32>
    %13 = vector.broadcast %12 : vector<1x384xf32> to vector<8x384xf32>
    %14 = arith.addf %11, %13 : vector<8x384xf32>
    %15 = vector.extract_strided_slice %8 {offsets = [0, 0], sizes = [8, 128], strides = [1, 1]} : vector<8x384xf32> to vector<8x128xf32>
    %16 = vector.extract_strided_slice %14 {offsets = [0, 0], sizes = [8, 128], strides = [1, 1]} : vector<8x384xf32> to vector<8x128xf32>
    %17 = arith.addf %15, %16 : vector<8x128xf32>
    %18 = arith.negf %17 : vector<8x128xf32>
    %19 = math.exp %18 : vector<8x128xf32>
    %cst_11 = arith.constant 1.000000e+00 : f32
    %20 = vector.broadcast %cst_11 : f32 to vector<8x128xf32>
    %21 = arith.addf %20, %19 : vector<8x128xf32>
    %22 = arith.divf %20, %21 : vector<8x128xf32>
    %23 = vector.extract_strided_slice %8 {offsets = [0, 128], sizes = [8, 128], strides = [1, 1]} : vector<8x384xf32> to vector<8x128xf32>
    %24 = vector.extract_strided_slice %14 {offsets = [0, 128], sizes = [8, 128], strides = [1, 1]} : vector<8x384xf32> to vector<8x128xf32>
    %25 = arith.addf %23, %24 : vector<8x128xf32>
    %26 = arith.negf %25 : vector<8x128xf32>
    %27 = math.exp %26 : vector<8x128xf32>
    %cst_12 = arith.constant 1.000000e+00 : f32
    %28 = vector.broadcast %cst_12 : f32 to vector<8x128xf32>
    %29 = arith.addf %28, %27 : vector<8x128xf32>
    %30 = arith.divf %28, %29 : vector<8x128xf32>
    %31 = vector.extract_strided_slice %8 {offsets = [0, 256], sizes = [8, 128], strides = [1, 1]} : vector<8x384xf32> to vector<8x128xf32>
    %32 = vector.extract_strided_slice %14 {offsets = [0, 256], sizes = [8, 128], strides = [1, 1]} : vector<8x384xf32> to vector<8x128xf32>
    %33 = arith.mulf %22, %32 : vector<8x128xf32>
    %34 = arith.addf %31, %33 : vector<8x128xf32>
    %35 = math.tanh %34 : vector<8x128xf32>
    %cst_13 = arith.constant 1.000000e+00 : f32
    %36 = vector.broadcast %cst_13 : f32 to vector<8x128xf32>
    %37 = arith.subf %36, %30 : vector<8x128xf32>
    %38 = arith.mulf %37, %35 : vector<8x128xf32>
    %39 = arith.mulf %30, %3 : vector<8x128xf32>
    %40 = arith.addf %38, %39 : vector<8x128xf32>
    %41 = arith.truncf %40 : vector<8x128xf32> to vector<8x128xbf16>
    %c0_14 = arith.constant 0 : index
    %c0_15 = arith.constant 0 : index
    %42 = vector.load %arg5[%c0_14, %c0_15] : memref<128x384xbf16, #tpu.memory_space<vmem>>, vector<128x384xbf16>
    %cst_16 = arith.constant dense<0.000000e+00> : vector<8x384xf32>
    %43 = tpu.matmul %41, %42, %cst_16 {dimension_numbers = #tpu.dot_dimension_numbers<[1], [0], [0], [1], [0, 0, 1, 1], [], []>} : vector<8x128xbf16>, vector<128x384xbf16>, vector<8x384xf32> -> vector<8x384xf32>
    %c0_17 = arith.constant 0 : index
    %c0_18 = arith.constant 0 : index
    %44 = vector.load %arg7[%c0_17, %c0_18] : memref<1x384xf32, #tpu.memory_space<vmem>>, vector<1x384xf32>
    %45 = vector.broadcast %44 : vector<1x384xf32> to vector<8x384xf32>
    %46 = arith.addf %43, %45 : vector<8x384xf32>
    %47 = arith.truncf %4 : vector<8x128xf32> to vector<8x128xbf16>
    %c0_19 = arith.constant 0 : index
    %c0_20 = arith.constant 0 : index
    %48 = vector.load %arg6[%c0_19, %c0_20] : memref<128x384xbf16, #tpu.memory_space<vmem>>, vector<128x384xbf16>
    %cst_21 = arith.constant dense<0.000000e+00> : vector<8x384xf32>
    %49 = tpu.matmul %47, %48, %cst_21 {dimension_numbers = #tpu.dot_dimension_numbers<[1], [0], [0], [1], [0, 0, 1, 1], [], []>} : vector<8x128xbf16>, vector<128x384xbf16>, vector<8x384xf32> -> vector<8x384xf32>
    %c0_22 = arith.constant 0 : index
    %c0_23 = arith.constant 0 : index
    %50 = vector.load %arg8[%c0_22, %c0_23] : memref<1x384xf32, #tpu.memory_space<vmem>>, vector<1x384xf32>
    %51 = vector.broadcast %50 : vector<1x384xf32> to vector<8x384xf32>
    %52 = arith.addf %49, %51 : vector<8x384xf32>
    %53 = vector.extract_strided_slice %46 {offsets = [0, 0], sizes = [8, 128], strides = [1, 1]} : vector<8x384xf32> to vector<8x128xf32>
    %54 = vector.extract_strided_slice %52 {offsets = [0, 0], sizes = [8, 128], strides = [1, 1]} : vector<8x384xf32> to vector<8x128xf32>
    %55 = arith.addf %53, %54 : vector<8x128xf32>
    %56 = arith.negf %55 : vector<8x128xf32>
    %57 = math.exp %56 : vector<8x128xf32>
    %cst_24 = arith.constant 1.000000e+00 : f32
    %58 = vector.broadcast %cst_24 : f32 to vector<8x128xf32>
    %59 = arith.addf %58, %57 : vector<8x128xf32>
    %60 = arith.divf %58, %59 : vector<8x128xf32>
    %61 = vector.extract_strided_slice %46 {offsets = [0, 128], sizes = [8, 128], strides = [1, 1]} : vector<8x384xf32> to vector<8x128xf32>
    %62 = vector.extract_strided_slice %52 {offsets = [0, 128], sizes = [8, 128], strides = [1, 1]} : vector<8x384xf32> to vector<8x128xf32>
    %63 = arith.addf %61, %62 : vector<8x128xf32>
    %64 = arith.negf %63 : vector<8x128xf32>
    %65 = math.exp %64 : vector<8x128xf32>
    %cst_25 = arith.constant 1.000000e+00 : f32
    %66 = vector.broadcast %cst_25 : f32 to vector<8x128xf32>
    %67 = arith.addf %66, %65 : vector<8x128xf32>
    %68 = arith.divf %66, %67 : vector<8x128xf32>
    %69 = vector.extract_strided_slice %46 {offsets = [0, 256], sizes = [8, 128], strides = [1, 1]} : vector<8x384xf32> to vector<8x128xf32>
    %70 = vector.extract_strided_slice %52 {offsets = [0, 256], sizes = [8, 128], strides = [1, 1]} : vector<8x384xf32> to vector<8x128xf32>
    %71 = arith.mulf %60, %70 : vector<8x128xf32>
    %72 = arith.addf %69, %71 : vector<8x128xf32>
    %73 = math.tanh %72 : vector<8x128xf32>
    %cst_26 = arith.constant 1.000000e+00 : f32
    %74 = vector.broadcast %cst_26 : f32 to vector<8x128xf32>
    %75 = arith.subf %74, %68 : vector<8x128xf32>
    %76 = arith.mulf %75, %73 : vector<8x128xf32>
    %77 = arith.mulf %68, %4 : vector<8x128xf32>
    %78 = arith.addf %76, %77 : vector<8x128xf32>
    %c1_i32 = arith.constant 1 : i32
    %79 = arith.index_cast %c1_i32 : i32 to index
    %c0_27 = arith.constant 0 : index
    %c0_28 = arith.constant 0 : index
    %80 = vector.load %arg2[%79, %c0_27, %c0_28] : memref<8x8x384xbf16, #tpu.memory_space<vmem>>, vector<1x8x384xbf16>
    %81 = vector.shape_cast %80 : vector<1x8x384xbf16> to vector<8x384xbf16>
    %82 = arith.extf %81 : vector<8x384xbf16> to vector<8x384xf32>
    %83 = arith.truncf %40 : vector<8x128xf32> to vector<8x128xbf16>
    %c0_29 = arith.constant 0 : index
    %c0_30 = arith.constant 0 : index
    %84 = vector.load %arg3[%c0_29, %c0_30] : memref<128x384xbf16, #tpu.memory_space<vmem>>, vector<128x384xbf16>
    %cst_31 = arith.constant dense<0.000000e+00> : vector<8x384xf32>
    %85 = tpu.matmul %83, %84, %cst_31 {dimension_numbers = #tpu.dot_dimension_numbers<[1], [0], [0], [1], [0, 0, 1, 1], [], []>} : vector<8x128xbf16>, vector<128x384xbf16>, vector<8x384xf32> -> vector<8x384xf32>
    %c0_32 = arith.constant 0 : index
    %c0_33 = arith.constant 0 : index
    %86 = vector.load %arg4[%c0_32, %c0_33] : memref<1x384xf32, #tpu.memory_space<vmem>>, vector<1x384xf32>
    %87 = vector.broadcast %86 : vector<1x384xf32> to vector<8x384xf32>
    %88 = arith.addf %85, %87 : vector<8x384xf32>
    %89 = vector.extract_strided_slice %82 {offsets = [0, 0], sizes = [8, 128], strides = [1, 1]} : vector<8x384xf32> to vector<8x128xf32>
    %90 = vector.extract_strided_slice %88 {offsets = [0, 0], sizes = [8, 128], strides = [1, 1]} : vector<8x384xf32> to vector<8x128xf32>
    %91 = arith.addf %89, %90 : vector<8x128xf32>
    %92 = arith.negf %91 : vector<8x128xf32>
    %93 = math.exp %92 : vector<8x128xf32>
    %cst_34 = arith.constant 1.000000e+00 : f32
    %94 = vector.broadcast %cst_34 : f32 to vector<8x128xf32>
    %95 = arith.addf %94, %93 : vector<8x128xf32>
    %96 = arith.divf %94, %95 : vector<8x128xf32>
    %97 = vector.extract_strided_slice %82 {offsets = [0, 128], sizes = [8, 128], strides = [1, 1]} : vector<8x384xf32> to vector<8x128xf32>
    %98 = vector.extract_strided_slice %88 {offsets = [0, 128], sizes = [8, 128], strides = [1, 1]} : vector<8x384xf32> to vector<8x128xf32>
    %99 = arith.addf %97, %98 : vector<8x128xf32>
    %100 = arith.negf %99 : vector<8x128xf32>
    %101 = math.exp %100 : vector<8x128xf32>
    %cst_35 = arith.constant 1.000000e+00 : f32
    %102 = vector.broadcast %cst_35 : f32 to vector<8x128xf32>
    %103 = arith.addf %102, %101 : vector<8x128xf32>
    %104 = arith.divf %102, %103 : vector<8x128xf32>
    %105 = vector.extract_strided_slice %82 {offsets = [0, 256], sizes = [8, 128], strides = [1, 1]} : vector<8x384xf32> to vector<8x128xf32>
    %106 = vector.extract_strided_slice %88 {offsets = [0, 256], sizes = [8, 128], strides = [1, 1]} : vector<8x384xf32> to vector<8x128xf32>
    %107 = arith.mulf %96, %106 : vector<8x128xf32>
    %108 = arith.addf %105, %107 : vector<8x128xf32>
    %109 = math.tanh %108 : vector<8x128xf32>
    %cst_36 = arith.constant 1.000000e+00 : f32
    %110 = vector.broadcast %cst_36 : f32 to vector<8x128xf32>
    %111 = arith.subf %110, %104 : vector<8x128xf32>
    %112 = arith.mulf %111, %109 : vector<8x128xf32>
    %113 = arith.mulf %104, %40 : vector<8x128xf32>
    %114 = arith.addf %112, %113 : vector<8x128xf32>
    %115 = arith.truncf %114 : vector<8x128xf32> to vector<8x128xbf16>
    %c0_37 = arith.constant 0 : index
    %c0_38 = arith.constant 0 : index
    %116 = vector.load %arg5[%c0_37, %c0_38] : memref<128x384xbf16, #tpu.memory_space<vmem>>, vector<128x384xbf16>
    %cst_39 = arith.constant dense<0.000000e+00> : vector<8x384xf32>
    %117 = tpu.matmul %115, %116, %cst_39 {dimension_numbers = #tpu.dot_dimension_numbers<[1], [0], [0], [1], [0, 0, 1, 1], [], []>} : vector<8x128xbf16>, vector<128x384xbf16>, vector<8x384xf32> -> vector<8x384xf32>
    %c0_40 = arith.constant 0 : index
    %c0_41 = arith.constant 0 : index
    %118 = vector.load %arg7[%c0_40, %c0_41] : memref<1x384xf32, #tpu.memory_space<vmem>>, vector<1x384xf32>
    %119 = vector.broadcast %118 : vector<1x384xf32> to vector<8x384xf32>
    %120 = arith.addf %117, %119 : vector<8x384xf32>
    %121 = arith.truncf %78 : vector<8x128xf32> to vector<8x128xbf16>
    %c0_42 = arith.constant 0 : index
    %c0_43 = arith.constant 0 : index
    %122 = vector.load %arg6[%c0_42, %c0_43] : memref<128x384xbf16, #tpu.memory_space<vmem>>, vector<128x384xbf16>
    %cst_44 = arith.constant dense<0.000000e+00> : vector<8x384xf32>
    %123 = tpu.matmul %121, %122, %cst_44 {dimension_numbers = #tpu.dot_dimension_numbers<[1], [0], [0], [1], [0, 0, 1, 1], [], []>} : vector<8x128xbf16>, vector<128x384xbf16>, vector<8x384xf32> -> vector<8x384xf32>
    %c0_45 = arith.constant 0 : index
    %c0_46 = arith.constant 0 : index
    %124 = vector.load %arg8[%c0_45, %c0_46] : memref<1x384xf32, #tpu.memory_space<vmem>>, vector<1x384xf32>
    %125 = vector.broadcast %124 : vector<1x384xf32> to vector<8x384xf32>
    %126 = arith.addf %123, %125 : vector<8x384xf32>
    %127 = vector.extract_strided_slice %120 {offsets = [0, 0], sizes = [8, 128], strides = [1, 1]} : vector<8x384xf32> to vector<8x128xf32>
    %128 = vector.extract_strided_slice %126 {offsets = [0, 0], sizes = [8, 128], strides = [1, 1]} : vector<8x384xf32> to vector<8x128xf32>
    %129 = arith.addf %127, %128 : vector<8x128xf32>
    %130 = arith.negf %129 : vector<8x128xf32>
    %131 = math.exp %130 : vector<8x128xf32>
    %cst_47 = arith.constant 1.000000e+00 : f32
    %132 = vector.broadcast %cst_47 : f32 to vector<8x128xf32>
    %133 = arith.addf %132, %131 : vector<8x128xf32>
    %134 = arith.divf %132, %133 : vector<8x128xf32>
    %135 = vector.extract_strided_slice %120 {offsets = [0, 128], sizes = [8, 128], strides = [1, 1]} : vector<8x384xf32> to vector<8x128xf32>
    %136 = vector.extract_strided_slice %126 {offsets = [0, 128], sizes = [8, 128], strides = [1, 1]} : vector<8x384xf32> to vector<8x128xf32>
    %137 = arith.addf %135, %136 : vector<8x128xf32>
    %138 = arith.negf %137 : vector<8x128xf32>
    %139 = math.exp %138 : vector<8x128xf32>
    %cst_48 = arith.constant 1.000000e+00 : f32
    %140 = vector.broadcast %cst_48 : f32 to vector<8x128xf32>
    %141 = arith.addf %140, %139 : vector<8x128xf32>
    %142 = arith.divf %140, %141 : vector<8x128xf32>
    %143 = vector.extract_strided_slice %120 {offsets = [0, 256], sizes = [8, 128], strides = [1, 1]} : vector<8x384xf32> to vector<8x128xf32>
    %144 = vector.extract_strided_slice %126 {offsets = [0, 256], sizes = [8, 128], strides = [1, 1]} : vector<8x384xf32> to vector<8x128xf32>
    %145 = arith.mulf %134, %144 : vector<8x128xf32>
    %146 = arith.addf %143, %145 : vector<8x128xf32>
    %147 = math.tanh %146 : vector<8x128xf32>
    %cst_49 = arith.constant 1.000000e+00 : f32
    %148 = vector.broadcast %cst_49 : f32 to vector<8x128xf32>
    %149 = arith.subf %148, %142 : vector<8x128xf32>
    %150 = arith.mulf %149, %147 : vector<8x128xf32>
    %151 = arith.mulf %142, %78 : vector<8x128xf32>
    %152 = arith.addf %150, %151 : vector<8x128xf32>
    %c2_i32 = arith.constant 2 : i32
    %153 = arith.index_cast %c2_i32 : i32 to index
    %c0_50 = arith.constant 0 : index
    %c0_51 = arith.constant 0 : index
    %154 = vector.load %arg2[%153, %c0_50, %c0_51] : memref<8x8x384xbf16, #tpu.memory_space<vmem>>, vector<1x8x384xbf16>
    %155 = vector.shape_cast %154 : vector<1x8x384xbf16> to vector<8x384xbf16>
    %156 = arith.extf %155 : vector<8x384xbf16> to vector<8x384xf32>
    %157 = arith.truncf %114 : vector<8x128xf32> to vector<8x128xbf16>
    %c0_52 = arith.constant 0 : index
    %c0_53 = arith.constant 0 : index
    %158 = vector.load %arg3[%c0_52, %c0_53] : memref<128x384xbf16, #tpu.memory_space<vmem>>, vector<128x384xbf16>
    %cst_54 = arith.constant dense<0.000000e+00> : vector<8x384xf32>
    %159 = tpu.matmul %157, %158, %cst_54 {dimension_numbers = #tpu.dot_dimension_numbers<[1], [0], [0], [1], [0, 0, 1, 1], [], []>} : vector<8x128xbf16>, vector<128x384xbf16>, vector<8x384xf32> -> vector<8x384xf32>
    %c0_55 = arith.constant 0 : index
    %c0_56 = arith.constant 0 : index
    %160 = vector.load %arg4[%c0_55, %c0_56] : memref<1x384xf32, #tpu.memory_space<vmem>>, vector<1x384xf32>
    %161 = vector.broadcast %160 : vector<1x384xf32> to vector<8x384xf32>
    %162 = arith.addf %159, %161 : vector<8x384xf32>
    %163 = vector.extract_strided_slice %156 {offsets = [0, 0], sizes = [8, 128], strides = [1, 1]} : vector<8x384xf32> to vector<8x128xf32>
    %164 = vector.extract_strided_slice %162 {offsets = [0, 0], sizes = [8, 128], strides = [1, 1]} : vector<8x384xf32> to vector<8x128xf32>
    %165 = arith.addf %163, %164 : vector<8x128xf32>
    %166 = arith.negf %165 : vector<8x128xf32>
    %167 = math.exp %166 : vector<8x128xf32>
    %cst_57 = arith.constant 1.000000e+00 : f32
    %168 = vector.broadcast %cst_57 : f32 to vector<8x128xf32>
    %169 = arith.addf %168, %167 : vector<8x128xf32>
    %170 = arith.divf %168, %169 : vector<8x128xf32>
    %171 = vector.extract_strided_slice %156 {offsets = [0, 128], sizes = [8, 128], strides = [1, 1]} : vector<8x384xf32> to vector<8x128xf32>
    %172 = vector.extract_strided_slice %162 {offsets = [0, 128], sizes = [8, 128], strides = [1, 1]} : vector<8x384xf32> to vector<8x128xf32>
    %173 = arith.addf %171, %172 : vector<8x128xf32>
    %174 = arith.negf %173 : vector<8x128xf32>
    %175 = math.exp %174 : vector<8x128xf32>
    %cst_58 = arith.constant 1.000000e+00 : f32
    %176 = vector.broadcast %cst_58 : f32 to vector<8x128xf32>
    %177 = arith.addf %176, %175 : vector<8x128xf32>
    %178 = arith.divf %176, %177 : vector<8x128xf32>
    %179 = vector.extract_strided_slice %156 {offsets = [0, 256], sizes = [8, 128], strides = [1, 1]} : vector<8x384xf32> to vector<8x128xf32>
    %180 = vector.extract_strided_slice %162 {offsets = [0, 256], sizes = [8, 128], strides = [1, 1]} : vector<8x384xf32> to vector<8x128xf32>
    %181 = arith.mulf %170, %180 : vector<8x128xf32>
    %182 = arith.addf %179, %181 : vector<8x128xf32>
    %183 = math.tanh %182 : vector<8x128xf32>
    %cst_59 = arith.constant 1.000000e+00 : f32
    %184 = vector.broadcast %cst_59 : f32 to vector<8x128xf32>
    %185 = arith.subf %184, %178 : vector<8x128xf32>
    %186 = arith.mulf %185, %183 : vector<8x128xf32>
    %187 = arith.mulf %178, %114 : vector<8x128xf32>
    %188 = arith.addf %186, %187 : vector<8x128xf32>
    %189 = arith.truncf %188 : vector<8x128xf32> to vector<8x128xbf16>
    %c0_60 = arith.constant 0 : index
    %c0_61 = arith.constant 0 : index
    %190 = vector.load %arg5[%c0_60, %c0_61] : memref<128x384xbf16, #tpu.memory_space<vmem>>, vector<128x384xbf16>
    %cst_62 = arith.constant dense<0.000000e+00> : vector<8x384xf32>
    %191 = tpu.matmul %189, %190, %cst_62 {dimension_numbers = #tpu.dot_dimension_numbers<[1], [0], [0], [1], [0, 0, 1, 1], [], []>} : vector<8x128xbf16>, vector<128x384xbf16>, vector<8x384xf32> -> vector<8x384xf32>
    %c0_63 = arith.constant 0 : index
    %c0_64 = arith.constant 0 : index
    %192 = vector.load %arg7[%c0_63, %c0_64] : memref<1x384xf32, #tpu.memory_space<vmem>>, vector<1x384xf32>
    %193 = vector.broadcast %192 : vector<1x384xf32> to vector<8x384xf32>
    %194 = arith.addf %191, %193 : vector<8x384xf32>
    %195 = arith.truncf %152 : vector<8x128xf32> to vector<8x128xbf16>
    %c0_65 = arith.constant 0 : index
    %c0_66 = arith.constant 0 : index
    %196 = vector.load %arg6[%c0_65, %c0_66] : memref<128x384xbf16, #tpu.memory_space<vmem>>, vector<128x384xbf16>
    %cst_67 = arith.constant dense<0.000000e+00> : vector<8x384xf32>
    %197 = tpu.matmul %195, %196, %cst_67 {dimension_numbers = #tpu.dot_dimension_numbers<[1], [0], [0], [1], [0, 0, 1, 1], [], []>} : vector<8x128xbf16>, vector<128x384xbf16>, vector<8x384xf32> -> vector<8x384xf32>
    %c0_68 = arith.constant 0 : index
    %c0_69 = arith.constant 0 : index
    %198 = vector.load %arg8[%c0_68, %c0_69] : memref<1x384xf32, #tpu.memory_space<vmem>>, vector<1x384xf32>
    %199 = vector.broadcast %198 : vector<1x384xf32> to vector<8x384xf32>
    %200 = arith.addf %197, %199 : vector<8x384xf32>
    %201 = vector.extract_strided_slice %194 {offsets = [0, 0], sizes = [8, 128], strides = [1, 1]} : vector<8x384xf32> to vector<8x128xf32>
    %202 = vector.extract_strided_slice %200 {offsets = [0, 0], sizes = [8, 128], strides = [1, 1]} : vector<8x384xf32> to vector<8x128xf32>
    %203 = arith.addf %201, %202 : vector<8x128xf32>
    %204 = arith.negf %203 : vector<8x128xf32>
    %205 = math.exp %204 : vector<8x128xf32>
    %cst_70 = arith.constant 1.000000e+00 : f32
    %206 = vector.broadcast %cst_70 : f32 to vector<8x128xf32>
    %207 = arith.addf %206, %205 : vector<8x128xf32>
    %208 = arith.divf %206, %207 : vector<8x128xf32>
    %209 = vector.extract_strided_slice %194 {offsets = [0, 128], sizes = [8, 128], strides = [1, 1]} : vector<8x384xf32> to vector<8x128xf32>
    %210 = vector.extract_strided_slice %200 {offsets = [0, 128], sizes = [8, 128], strides = [1, 1]} : vector<8x384xf32> to vector<8x128xf32>
    %211 = arith.addf %209, %210 : vector<8x128xf32>
    %212 = arith.negf %211 : vector<8x128xf32>
    %213 = math.exp %212 : vector<8x128xf32>
    %cst_71 = arith.constant 1.000000e+00 : f32
    %214 = vector.broadcast %cst_71 : f32 to vector<8x128xf32>
    %215 = arith.addf %214, %213 : vector<8x128xf32>
    %216 = arith.divf %214, %215 : vector<8x128xf32>
    %217 = vector.extract_strided_slice %194 {offsets = [0, 256], sizes = [8, 128], strides = [1, 1]} : vector<8x384xf32> to vector<8x128xf32>
    %218 = vector.extract_strided_slice %200 {offsets = [0, 256], sizes = [8, 128], strides = [1, 1]} : vector<8x384xf32> to vector<8x128xf32>
    %219 = arith.mulf %208, %218 : vector<8x128xf32>
    %220 = arith.addf %217, %219 : vector<8x128xf32>
    %221 = math.tanh %220 : vector<8x128xf32>
    %cst_72 = arith.constant 1.000000e+00 : f32
    %222 = vector.broadcast %cst_72 : f32 to vector<8x128xf32>
    %223 = arith.subf %222, %216 : vector<8x128xf32>
    %224 = arith.mulf %223, %221 : vector<8x128xf32>
    %225 = arith.mulf %216, %152 : vector<8x128xf32>
    %226 = arith.addf %224, %225 : vector<8x128xf32>
    %c3_i32 = arith.constant 3 : i32
    %227 = arith.index_cast %c3_i32 : i32 to index
    %c0_73 = arith.constant 0 : index
    %c0_74 = arith.constant 0 : index
    %228 = vector.load %arg2[%227, %c0_73, %c0_74] : memref<8x8x384xbf16, #tpu.memory_space<vmem>>, vector<1x8x384xbf16>
    %229 = vector.shape_cast %228 : vector<1x8x384xbf16> to vector<8x384xbf16>
    %230 = arith.extf %229 : vector<8x384xbf16> to vector<8x384xf32>
    %231 = arith.truncf %188 : vector<8x128xf32> to vector<8x128xbf16>
    %c0_75 = arith.constant 0 : index
    %c0_76 = arith.constant 0 : index
    %232 = vector.load %arg3[%c0_75, %c0_76] : memref<128x384xbf16, #tpu.memory_space<vmem>>, vector<128x384xbf16>
    %cst_77 = arith.constant dense<0.000000e+00> : vector<8x384xf32>
    %233 = tpu.matmul %231, %232, %cst_77 {dimension_numbers = #tpu.dot_dimension_numbers<[1], [0], [0], [1], [0, 0, 1, 1], [], []>} : vector<8x128xbf16>, vector<128x384xbf16>, vector<8x384xf32> -> vector<8x384xf32>
    %c0_78 = arith.constant 0 : index
    %c0_79 = arith.constant 0 : index
    %234 = vector.load %arg4[%c0_78, %c0_79] : memref<1x384xf32, #tpu.memory_space<vmem>>, vector<1x384xf32>
    %235 = vector.broadcast %234 : vector<1x384xf32> to vector<8x384xf32>
    %236 = arith.addf %233, %235 : vector<8x384xf32>
    %237 = vector.extract_strided_slice %230 {offsets = [0, 0], sizes = [8, 128], strides = [1, 1]} : vector<8x384xf32> to vector<8x128xf32>
    %238 = vector.extract_strided_slice %236 {offsets = [0, 0], sizes = [8, 128], strides = [1, 1]} : vector<8x384xf32> to vector<8x128xf32>
    %239 = arith.addf %237, %238 : vector<8x128xf32>
    %240 = arith.negf %239 : vector<8x128xf32>
    %241 = math.exp %240 : vector<8x128xf32>
    %cst_80 = arith.constant 1.000000e+00 : f32
    %242 = vector.broadcast %cst_80 : f32 to vector<8x128xf32>
    %243 = arith.addf %242, %241 : vector<8x128xf32>
    %244 = arith.divf %242, %243 : vector<8x128xf32>
    %245 = vector.extract_strided_slice %230 {offsets = [0, 128], sizes = [8, 128], strides = [1, 1]} : vector<8x384xf32> to vector<8x128xf32>
    %246 = vector.extract_strided_slice %236 {offsets = [0, 128], sizes = [8, 128], strides = [1, 1]} : vector<8x384xf32> to vector<8x128xf32>
    %247 = arith.addf %245, %246 : vector<8x128xf32>
    %248 = arith.negf %247 : vector<8x128xf32>
    %249 = math.exp %248 : vector<8x128xf32>
    %cst_81 = arith.constant 1.000000e+00 : f32
    %250 = vector.broadcast %cst_81 : f32 to vector<8x128xf32>
    %251 = arith.addf %250, %249 : vector<8x128xf32>
    %252 = arith.divf %250, %251 : vector<8x128xf32>
    %253 = vector.extract_strided_slice %230 {offsets = [0, 256], sizes = [8, 128], strides = [1, 1]} : vector<8x384xf32> to vector<8x128xf32>
    %254 = vector.extract_strided_slice %236 {offsets = [0, 256], sizes = [8, 128], strides = [1, 1]} : vector<8x384xf32> to vector<8x128xf32>
    %255 = arith.mulf %244, %254 : vector<8x128xf32>
    %256 = arith.addf %253, %255 : vector<8x128xf32>
    %257 = math.tanh %256 : vector<8x128xf32>
    %cst_82 = arith.constant 1.000000e+00 : f32
    %258 = vector.broadcast %cst_82 : f32 to vector<8x128xf32>
    %259 = arith.subf %258, %252 : vector<8x128xf32>
    %260 = arith.mulf %259, %257 : vector<8x128xf32>
    %261 = arith.mulf %252, %188 : vector<8x128xf32>
    %262 = arith.addf %260, %261 : vector<8x128xf32>
    %263 = arith.truncf %262 : vector<8x128xf32> to vector<8x128xbf16>
    %c0_83 = arith.constant 0 : index
    %c0_84 = arith.constant 0 : index
    %264 = vector.load %arg5[%c0_83, %c0_84] : memref<128x384xbf16, #tpu.memory_space<vmem>>, vector<128x384xbf16>
    %cst_85 = arith.constant dense<0.000000e+00> : vector<8x384xf32>
    %265 = tpu.matmul %263, %264, %cst_85 {dimension_numbers = #tpu.dot_dimension_numbers<[1], [0], [0], [1], [0, 0, 1, 1], [], []>} : vector<8x128xbf16>, vector<128x384xbf16>, vector<8x384xf32> -> vector<8x384xf32>
    %c0_86 = arith.constant 0 : index
    %c0_87 = arith.constant 0 : index
    %266 = vector.load %arg7[%c0_86, %c0_87] : memref<1x384xf32, #tpu.memory_space<vmem>>, vector<1x384xf32>
    %267 = vector.broadcast %266 : vector<1x384xf32> to vector<8x384xf32>
    %268 = arith.addf %265, %267 : vector<8x384xf32>
    %269 = arith.truncf %226 : vector<8x128xf32> to vector<8x128xbf16>
    %c0_88 = arith.constant 0 : index
    %c0_89 = arith.constant 0 : index
    %270 = vector.load %arg6[%c0_88, %c0_89] : memref<128x384xbf16, #tpu.memory_space<vmem>>, vector<128x384xbf16>
    %cst_90 = arith.constant dense<0.000000e+00> : vector<8x384xf32>
    %271 = tpu.matmul %269, %270, %cst_90 {dimension_numbers = #tpu.dot_dimension_numbers<[1], [0], [0], [1], [0, 0, 1, 1], [], []>} : vector<8x128xbf16>, vector<128x384xbf16>, vector<8x384xf32> -> vector<8x384xf32>
    %c0_91 = arith.constant 0 : index
    %c0_92 = arith.constant 0 : index
    %272 = vector.load %arg8[%c0_91, %c0_92] : memref<1x384xf32, #tpu.memory_space<vmem>>, vector<1x384xf32>
    %273 = vector.broadcast %272 : vector<1x384xf32> to vector<8x384xf32>
    %274 = arith.addf %271, %273 : vector<8x384xf32>
    %275 = vector.extract_strided_slice %268 {offsets = [0, 0], sizes = [8, 128], strides = [1, 1]} : vector<8x384xf32> to vector<8x128xf32>
    %276 = vector.extract_strided_slice %274 {offsets = [0, 0], sizes = [8, 128], strides = [1, 1]} : vector<8x384xf32> to vector<8x128xf32>
    %277 = arith.addf %275, %276 : vector<8x128xf32>
    %278 = arith.negf %277 : vector<8x128xf32>
    %279 = math.exp %278 : vector<8x128xf32>
    %cst_93 = arith.constant 1.000000e+00 : f32
    %280 = vector.broadcast %cst_93 : f32 to vector<8x128xf32>
    %281 = arith.addf %280, %279 : vector<8x128xf32>
    %282 = arith.divf %280, %281 : vector<8x128xf32>
    %283 = vector.extract_strided_slice %268 {offsets = [0, 128], sizes = [8, 128], strides = [1, 1]} : vector<8x384xf32> to vector<8x128xf32>
    %284 = vector.extract_strided_slice %274 {offsets = [0, 128], sizes = [8, 128], strides = [1, 1]} : vector<8x384xf32> to vector<8x128xf32>
    %285 = arith.addf %283, %284 : vector<8x128xf32>
    %286 = arith.negf %285 : vector<8x128xf32>
    %287 = math.exp %286 : vector<8x128xf32>
    %cst_94 = arith.constant 1.000000e+00 : f32
    %288 = vector.broadcast %cst_94 : f32 to vector<8x128xf32>
    %289 = arith.addf %288, %287 : vector<8x128xf32>
    %290 = arith.divf %288, %289 : vector<8x128xf32>
    %291 = vector.extract_strided_slice %268 {offsets = [0, 256], sizes = [8, 128], strides = [1, 1]} : vector<8x384xf32> to vector<8x128xf32>
    %292 = vector.extract_strided_slice %274 {offsets = [0, 256], sizes = [8, 128], strides = [1, 1]} : vector<8x384xf32> to vector<8x128xf32>
    %293 = arith.mulf %282, %292 : vector<8x128xf32>
    %294 = arith.addf %291, %293 : vector<8x128xf32>
    %295 = math.tanh %294 : vector<8x128xf32>
    %cst_95 = arith.constant 1.000000e+00 : f32
    %296 = vector.broadcast %cst_95 : f32 to vector<8x128xf32>
    %297 = arith.subf %296, %290 : vector<8x128xf32>
    %298 = arith.mulf %297, %295 : vector<8x128xf32>
    %299 = arith.mulf %290, %226 : vector<8x128xf32>
    %300 = arith.addf %298, %299 : vector<8x128xf32>
    %c4_i32 = arith.constant 4 : i32
    %301 = arith.index_cast %c4_i32 : i32 to index
    %c0_96 = arith.constant 0 : index
    %c0_97 = arith.constant 0 : index
    %302 = vector.load %arg2[%301, %c0_96, %c0_97] : memref<8x8x384xbf16, #tpu.memory_space<vmem>>, vector<1x8x384xbf16>
    %303 = vector.shape_cast %302 : vector<1x8x384xbf16> to vector<8x384xbf16>
    %304 = arith.extf %303 : vector<8x384xbf16> to vector<8x384xf32>
    %305 = arith.truncf %262 : vector<8x128xf32> to vector<8x128xbf16>
    %c0_98 = arith.constant 0 : index
    %c0_99 = arith.constant 0 : index
    %306 = vector.load %arg3[%c0_98, %c0_99] : memref<128x384xbf16, #tpu.memory_space<vmem>>, vector<128x384xbf16>
    %cst_100 = arith.constant dense<0.000000e+00> : vector<8x384xf32>
    %307 = tpu.matmul %305, %306, %cst_100 {dimension_numbers = #tpu.dot_dimension_numbers<[1], [0], [0], [1], [0, 0, 1, 1], [], []>} : vector<8x128xbf16>, vector<128x384xbf16>, vector<8x384xf32> -> vector<8x384xf32>
    %c0_101 = arith.constant 0 : index
    %c0_102 = arith.constant 0 : index
    %308 = vector.load %arg4[%c0_101, %c0_102] : memref<1x384xf32, #tpu.memory_space<vmem>>, vector<1x384xf32>
    %309 = vector.broadcast %308 : vector<1x384xf32> to vector<8x384xf32>
    %310 = arith.addf %307, %309 : vector<8x384xf32>
    %311 = vector.extract_strided_slice %304 {offsets = [0, 0], sizes = [8, 128], strides = [1, 1]} : vector<8x384xf32> to vector<8x128xf32>
    %312 = vector.extract_strided_slice %310 {offsets = [0, 0], sizes = [8, 128], strides = [1, 1]} : vector<8x384xf32> to vector<8x128xf32>
    %313 = arith.addf %311, %312 : vector<8x128xf32>
    %314 = arith.negf %313 : vector<8x128xf32>
    %315 = math.exp %314 : vector<8x128xf32>
    %cst_103 = arith.constant 1.000000e+00 : f32
    %316 = vector.broadcast %cst_103 : f32 to vector<8x128xf32>
    %317 = arith.addf %316, %315 : vector<8x128xf32>
    %318 = arith.divf %316, %317 : vector<8x128xf32>
    %319 = vector.extract_strided_slice %304 {offsets = [0, 128], sizes = [8, 128], strides = [1, 1]} : vector<8x384xf32> to vector<8x128xf32>
    %320 = vector.extract_strided_slice %310 {offsets = [0, 128], sizes = [8, 128], strides = [1, 1]} : vector<8x384xf32> to vector<8x128xf32>
    %321 = arith.addf %319, %320 : vector<8x128xf32>
    %322 = arith.negf %321 : vector<8x128xf32>
    %323 = math.exp %322 : vector<8x128xf32>
    %cst_104 = arith.constant 1.000000e+00 : f32
    %324 = vector.broadcast %cst_104 : f32 to vector<8x128xf32>
    %325 = arith.addf %324, %323 : vector<8x128xf32>
    %326 = arith.divf %324, %325 : vector<8x128xf32>
    %327 = vector.extract_strided_slice %304 {offsets = [0, 256], sizes = [8, 128], strides = [1, 1]} : vector<8x384xf32> to vector<8x128xf32>
    %328 = vector.extract_strided_slice %310 {offsets = [0, 256], sizes = [8, 128], strides = [1, 1]} : vector<8x384xf32> to vector<8x128xf32>
    %329 = arith.mulf %318, %328 : vector<8x128xf32>
    %330 = arith.addf %327, %329 : vector<8x128xf32>
    %331 = math.tanh %330 : vector<8x128xf32>
    %cst_105 = arith.constant 1.000000e+00 : f32
    %332 = vector.broadcast %cst_105 : f32 to vector<8x128xf32>
    %333 = arith.subf %332, %326 : vector<8x128xf32>
    %334 = arith.mulf %333, %331 : vector<8x128xf32>
    %335 = arith.mulf %326, %262 : vector<8x128xf32>
    %336 = arith.addf %334, %335 : vector<8x128xf32>
    %337 = arith.truncf %336 : vector<8x128xf32> to vector<8x128xbf16>
    %c0_106 = arith.constant 0 : index
    %c0_107 = arith.constant 0 : index
    %338 = vector.load %arg5[%c0_106, %c0_107] : memref<128x384xbf16, #tpu.memory_space<vmem>>, vector<128x384xbf16>
    %cst_108 = arith.constant dense<0.000000e+00> : vector<8x384xf32>
    %339 = tpu.matmul %337, %338, %cst_108 {dimension_numbers = #tpu.dot_dimension_numbers<[1], [0], [0], [1], [0, 0, 1, 1], [], []>} : vector<8x128xbf16>, vector<128x384xbf16>, vector<8x384xf32> -> vector<8x384xf32>
    %c0_109 = arith.constant 0 : index
    %c0_110 = arith.constant 0 : index
    %340 = vector.load %arg7[%c0_109, %c0_110] : memref<1x384xf32, #tpu.memory_space<vmem>>, vector<1x384xf32>
    %341 = vector.broadcast %340 : vector<1x384xf32> to vector<8x384xf32>
    %342 = arith.addf %339, %341 : vector<8x384xf32>
    %343 = arith.truncf %300 : vector<8x128xf32> to vector<8x128xbf16>
    %c0_111 = arith.constant 0 : index
    %c0_112 = arith.constant 0 : index
    %344 = vector.load %arg6[%c0_111, %c0_112] : memref<128x384xbf16, #tpu.memory_space<vmem>>, vector<128x384xbf16>
    %cst_113 = arith.constant dense<0.000000e+00> : vector<8x384xf32>
    %345 = tpu.matmul %343, %344, %cst_113 {dimension_numbers = #tpu.dot_dimension_numbers<[1], [0], [0], [1], [0, 0, 1, 1], [], []>} : vector<8x128xbf16>, vector<128x384xbf16>, vector<8x384xf32> -> vector<8x384xf32>
    %c0_114 = arith.constant 0 : index
    %c0_115 = arith.constant 0 : index
    %346 = vector.load %arg8[%c0_114, %c0_115] : memref<1x384xf32, #tpu.memory_space<vmem>>, vector<1x384xf32>
    %347 = vector.broadcast %346 : vector<1x384xf32> to vector<8x384xf32>
    %348 = arith.addf %345, %347 : vector<8x384xf32>
    %349 = vector.extract_strided_slice %342 {offsets = [0, 0], sizes = [8, 128], strides = [1, 1]} : vector<8x384xf32> to vector<8x128xf32>
    %350 = vector.extract_strided_slice %348 {offsets = [0, 0], sizes = [8, 128], strides = [1, 1]} : vector<8x384xf32> to vector<8x128xf32>
    %351 = arith.addf %349, %350 : vector<8x128xf32>
    %352 = arith.negf %351 : vector<8x128xf32>
    %353 = math.exp %352 : vector<8x128xf32>
    %cst_116 = arith.constant 1.000000e+00 : f32
    %354 = vector.broadcast %cst_116 : f32 to vector<8x128xf32>
    %355 = arith.addf %354, %353 : vector<8x128xf32>
    %356 = arith.divf %354, %355 : vector<8x128xf32>
    %357 = vector.extract_strided_slice %342 {offsets = [0, 128], sizes = [8, 128], strides = [1, 1]} : vector<8x384xf32> to vector<8x128xf32>
    %358 = vector.extract_strided_slice %348 {offsets = [0, 128], sizes = [8, 128], strides = [1, 1]} : vector<8x384xf32> to vector<8x128xf32>
    %359 = arith.addf %357, %358 : vector<8x128xf32>
    %360 = arith.negf %359 : vector<8x128xf32>
    %361 = math.exp %360 : vector<8x128xf32>
    %cst_117 = arith.constant 1.000000e+00 : f32
    %362 = vector.broadcast %cst_117 : f32 to vector<8x128xf32>
    %363 = arith.addf %362, %361 : vector<8x128xf32>
    %364 = arith.divf %362, %363 : vector<8x128xf32>
    %365 = vector.extract_strided_slice %342 {offsets = [0, 256], sizes = [8, 128], strides = [1, 1]} : vector<8x384xf32> to vector<8x128xf32>
    %366 = vector.extract_strided_slice %348 {offsets = [0, 256], sizes = [8, 128], strides = [1, 1]} : vector<8x384xf32> to vector<8x128xf32>
    %367 = arith.mulf %356, %366 : vector<8x128xf32>
    %368 = arith.addf %365, %367 : vector<8x128xf32>
    %369 = math.tanh %368 : vector<8x128xf32>
    %cst_118 = arith.constant 1.000000e+00 : f32
    %370 = vector.broadcast %cst_118 : f32 to vector<8x128xf32>
    %371 = arith.subf %370, %364 : vector<8x128xf32>
    %372 = arith.mulf %371, %369 : vector<8x128xf32>
    %373 = arith.mulf %364, %300 : vector<8x128xf32>
    %374 = arith.addf %372, %373 : vector<8x128xf32>
    %c5_i32 = arith.constant 5 : i32
    %375 = arith.index_cast %c5_i32 : i32 to index
    %c0_119 = arith.constant 0 : index
    %c0_120 = arith.constant 0 : index
    %376 = vector.load %arg2[%375, %c0_119, %c0_120] : memref<8x8x384xbf16, #tpu.memory_space<vmem>>, vector<1x8x384xbf16>
    %377 = vector.shape_cast %376 : vector<1x8x384xbf16> to vector<8x384xbf16>
    %378 = arith.extf %377 : vector<8x384xbf16> to vector<8x384xf32>
    %379 = arith.truncf %336 : vector<8x128xf32> to vector<8x128xbf16>
    %c0_121 = arith.constant 0 : index
    %c0_122 = arith.constant 0 : index
    %380 = vector.load %arg3[%c0_121, %c0_122] : memref<128x384xbf16, #tpu.memory_space<vmem>>, vector<128x384xbf16>
    %cst_123 = arith.constant dense<0.000000e+00> : vector<8x384xf32>
    %381 = tpu.matmul %379, %380, %cst_123 {dimension_numbers = #tpu.dot_dimension_numbers<[1], [0], [0], [1], [0, 0, 1, 1], [], []>} : vector<8x128xbf16>, vector<128x384xbf16>, vector<8x384xf32> -> vector<8x384xf32>
    %c0_124 = arith.constant 0 : index
    %c0_125 = arith.constant 0 : index
    %382 = vector.load %arg4[%c0_124, %c0_125] : memref<1x384xf32, #tpu.memory_space<vmem>>, vector<1x384xf32>
    %383 = vector.broadcast %382 : vector<1x384xf32> to vector<8x384xf32>
    %384 = arith.addf %381, %383 : vector<8x384xf32>
    %385 = vector.extract_strided_slice %378 {offsets = [0, 0], sizes = [8, 128], strides = [1, 1]} : vector<8x384xf32> to vector<8x128xf32>
    %386 = vector.extract_strided_slice %384 {offsets = [0, 0], sizes = [8, 128], strides = [1, 1]} : vector<8x384xf32> to vector<8x128xf32>
    %387 = arith.addf %385, %386 : vector<8x128xf32>
    %388 = arith.negf %387 : vector<8x128xf32>
    %389 = math.exp %388 : vector<8x128xf32>
    %cst_126 = arith.constant 1.000000e+00 : f32
    %390 = vector.broadcast %cst_126 : f32 to vector<8x128xf32>
    %391 = arith.addf %390, %389 : vector<8x128xf32>
    %392 = arith.divf %390, %391 : vector<8x128xf32>
    %393 = vector.extract_strided_slice %378 {offsets = [0, 128], sizes = [8, 128], strides = [1, 1]} : vector<8x384xf32> to vector<8x128xf32>
    %394 = vector.extract_strided_slice %384 {offsets = [0, 128], sizes = [8, 128], strides = [1, 1]} : vector<8x384xf32> to vector<8x128xf32>
    %395 = arith.addf %393, %394 : vector<8x128xf32>
    %396 = arith.negf %395 : vector<8x128xf32>
    %397 = math.exp %396 : vector<8x128xf32>
    %cst_127 = arith.constant 1.000000e+00 : f32
    %398 = vector.broadcast %cst_127 : f32 to vector<8x128xf32>
    %399 = arith.addf %398, %397 : vector<8x128xf32>
    %400 = arith.divf %398, %399 : vector<8x128xf32>
    %401 = vector.extract_strided_slice %378 {offsets = [0, 256], sizes = [8, 128], strides = [1, 1]} : vector<8x384xf32> to vector<8x128xf32>
    %402 = vector.extract_strided_slice %384 {offsets = [0, 256], sizes = [8, 128], strides = [1, 1]} : vector<8x384xf32> to vector<8x128xf32>
    %403 = arith.mulf %392, %402 : vector<8x128xf32>
    %404 = arith.addf %401, %403 : vector<8x128xf32>
    %405 = math.tanh %404 : vector<8x128xf32>
    %cst_128 = arith.constant 1.000000e+00 : f32
    %406 = vector.broadcast %cst_128 : f32 to vector<8x128xf32>
    %407 = arith.subf %406, %400 : vector<8x128xf32>
    %408 = arith.mulf %407, %405 : vector<8x128xf32>
    %409 = arith.mulf %400, %336 : vector<8x128xf32>
    %410 = arith.addf %408, %409 : vector<8x128xf32>
    %411 = arith.truncf %410 : vector<8x128xf32> to vector<8x128xbf16>
    %c0_129 = arith.constant 0 : index
    %c0_130 = arith.constant 0 : index
    %412 = vector.load %arg5[%c0_129, %c0_130] : memref<128x384xbf16, #tpu.memory_space<vmem>>, vector<128x384xbf16>
    %cst_131 = arith.constant dense<0.000000e+00> : vector<8x384xf32>
    %413 = tpu.matmul %411, %412, %cst_131 {dimension_numbers = #tpu.dot_dimension_numbers<[1], [0], [0], [1], [0, 0, 1, 1], [], []>} : vector<8x128xbf16>, vector<128x384xbf16>, vector<8x384xf32> -> vector<8x384xf32>
    %c0_132 = arith.constant 0 : index
    %c0_133 = arith.constant 0 : index
    %414 = vector.load %arg7[%c0_132, %c0_133] : memref<1x384xf32, #tpu.memory_space<vmem>>, vector<1x384xf32>
    %415 = vector.broadcast %414 : vector<1x384xf32> to vector<8x384xf32>
    %416 = arith.addf %413, %415 : vector<8x384xf32>
    %417 = arith.truncf %374 : vector<8x128xf32> to vector<8x128xbf16>
    %c0_134 = arith.constant 0 : index
    %c0_135 = arith.constant 0 : index
    %418 = vector.load %arg6[%c0_134, %c0_135] : memref<128x384xbf16, #tpu.memory_space<vmem>>, vector<128x384xbf16>
    %cst_136 = arith.constant dense<0.000000e+00> : vector<8x384xf32>
    %419 = tpu.matmul %417, %418, %cst_136 {dimension_numbers = #tpu.dot_dimension_numbers<[1], [0], [0], [1], [0, 0, 1, 1], [], []>} : vector<8x128xbf16>, vector<128x384xbf16>, vector<8x384xf32> -> vector<8x384xf32>
    %c0_137 = arith.constant 0 : index
    %c0_138 = arith.constant 0 : index
    %420 = vector.load %arg8[%c0_137, %c0_138] : memref<1x384xf32, #tpu.memory_space<vmem>>, vector<1x384xf32>
    %421 = vector.broadcast %420 : vector<1x384xf32> to vector<8x384xf32>
    %422 = arith.addf %419, %421 : vector<8x384xf32>
    %423 = vector.extract_strided_slice %416 {offsets = [0, 0], sizes = [8, 128], strides = [1, 1]} : vector<8x384xf32> to vector<8x128xf32>
    %424 = vector.extract_strided_slice %422 {offsets = [0, 0], sizes = [8, 128], strides = [1, 1]} : vector<8x384xf32> to vector<8x128xf32>
    %425 = arith.addf %423, %424 : vector<8x128xf32>
    %426 = arith.negf %425 : vector<8x128xf32>
    %427 = math.exp %426 : vector<8x128xf32>
    %cst_139 = arith.constant 1.000000e+00 : f32
    %428 = vector.broadcast %cst_139 : f32 to vector<8x128xf32>
    %429 = arith.addf %428, %427 : vector<8x128xf32>
    %430 = arith.divf %428, %429 : vector<8x128xf32>
    %431 = vector.extract_strided_slice %416 {offsets = [0, 128], sizes = [8, 128], strides = [1, 1]} : vector<8x384xf32> to vector<8x128xf32>
    %432 = vector.extract_strided_slice %422 {offsets = [0, 128], sizes = [8, 128], strides = [1, 1]} : vector<8x384xf32> to vector<8x128xf32>
    %433 = arith.addf %431, %432 : vector<8x128xf32>
    %434 = arith.negf %433 : vector<8x128xf32>
    %435 = math.exp %434 : vector<8x128xf32>
    %cst_140 = arith.constant 1.000000e+00 : f32
    %436 = vector.broadcast %cst_140 : f32 to vector<8x128xf32>
    %437 = arith.addf %436, %435 : vector<8x128xf32>
    %438 = arith.divf %436, %437 : vector<8x128xf32>
    %439 = vector.extract_strided_slice %416 {offsets = [0, 256], sizes = [8, 128], strides = [1, 1]} : vector<8x384xf32> to vector<8x128xf32>
    %440 = vector.extract_strided_slice %422 {offsets = [0, 256], sizes = [8, 128], strides = [1, 1]} : vector<8x384xf32> to vector<8x128xf32>
    %441 = arith.mulf %430, %440 : vector<8x128xf32>
    %442 = arith.addf %439, %441 : vector<8x128xf32>
    %443 = math.tanh %442 : vector<8x128xf32>
    %cst_141 = arith.constant 1.000000e+00 : f32
    %444 = vector.broadcast %cst_141 : f32 to vector<8x128xf32>
    %445 = arith.subf %444, %438 : vector<8x128xf32>
    %446 = arith.mulf %445, %443 : vector<8x128xf32>
    %447 = arith.mulf %438, %374 : vector<8x128xf32>
    %448 = arith.addf %446, %447 : vector<8x128xf32>
    %c6_i32 = arith.constant 6 : i32
    %449 = arith.index_cast %c6_i32 : i32 to index
    %c0_142 = arith.constant 0 : index
    %c0_143 = arith.constant 0 : index
    %450 = vector.load %arg2[%449, %c0_142, %c0_143] : memref<8x8x384xbf16, #tpu.memory_space<vmem>>, vector<1x8x384xbf16>
    %451 = vector.shape_cast %450 : vector<1x8x384xbf16> to vector<8x384xbf16>
    %452 = arith.extf %451 : vector<8x384xbf16> to vector<8x384xf32>
    %453 = arith.truncf %410 : vector<8x128xf32> to vector<8x128xbf16>
    %c0_144 = arith.constant 0 : index
    %c0_145 = arith.constant 0 : index
    %454 = vector.load %arg3[%c0_144, %c0_145] : memref<128x384xbf16, #tpu.memory_space<vmem>>, vector<128x384xbf16>
    %cst_146 = arith.constant dense<0.000000e+00> : vector<8x384xf32>
    %455 = tpu.matmul %453, %454, %cst_146 {dimension_numbers = #tpu.dot_dimension_numbers<[1], [0], [0], [1], [0, 0, 1, 1], [], []>} : vector<8x128xbf16>, vector<128x384xbf16>, vector<8x384xf32> -> vector<8x384xf32>
    %c0_147 = arith.constant 0 : index
    %c0_148 = arith.constant 0 : index
    %456 = vector.load %arg4[%c0_147, %c0_148] : memref<1x384xf32, #tpu.memory_space<vmem>>, vector<1x384xf32>
    %457 = vector.broadcast %456 : vector<1x384xf32> to vector<8x384xf32>
    %458 = arith.addf %455, %457 : vector<8x384xf32>
    %459 = vector.extract_strided_slice %452 {offsets = [0, 0], sizes = [8, 128], strides = [1, 1]} : vector<8x384xf32> to vector<8x128xf32>
    %460 = vector.extract_strided_slice %458 {offsets = [0, 0], sizes = [8, 128], strides = [1, 1]} : vector<8x384xf32> to vector<8x128xf32>
    %461 = arith.addf %459, %460 : vector<8x128xf32>
    %462 = arith.negf %461 : vector<8x128xf32>
    %463 = math.exp %462 : vector<8x128xf32>
    %cst_149 = arith.constant 1.000000e+00 : f32
    %464 = vector.broadcast %cst_149 : f32 to vector<8x128xf32>
    %465 = arith.addf %464, %463 : vector<8x128xf32>
    %466 = arith.divf %464, %465 : vector<8x128xf32>
    %467 = vector.extract_strided_slice %452 {offsets = [0, 128], sizes = [8, 128], strides = [1, 1]} : vector<8x384xf32> to vector<8x128xf32>
    %468 = vector.extract_strided_slice %458 {offsets = [0, 128], sizes = [8, 128], strides = [1, 1]} : vector<8x384xf32> to vector<8x128xf32>
    %469 = arith.addf %467, %468 : vector<8x128xf32>
    %470 = arith.negf %469 : vector<8x128xf32>
    %471 = math.exp %470 : vector<8x128xf32>
    %cst_150 = arith.constant 1.000000e+00 : f32
    %472 = vector.broadcast %cst_150 : f32 to vector<8x128xf32>
    %473 = arith.addf %472, %471 : vector<8x128xf32>
    %474 = arith.divf %472, %473 : vector<8x128xf32>
    %475 = vector.extract_strided_slice %452 {offsets = [0, 256], sizes = [8, 128], strides = [1, 1]} : vector<8x384xf32> to vector<8x128xf32>
    %476 = vector.extract_strided_slice %458 {offsets = [0, 256], sizes = [8, 128], strides = [1, 1]} : vector<8x384xf32> to vector<8x128xf32>
    %477 = arith.mulf %466, %476 : vector<8x128xf32>
    %478 = arith.addf %475, %477 : vector<8x128xf32>
    %479 = math.tanh %478 : vector<8x128xf32>
    %cst_151 = arith.constant 1.000000e+00 : f32
    %480 = vector.broadcast %cst_151 : f32 to vector<8x128xf32>
    %481 = arith.subf %480, %474 : vector<8x128xf32>
    %482 = arith.mulf %481, %479 : vector<8x128xf32>
    %483 = arith.mulf %474, %410 : vector<8x128xf32>
    %484 = arith.addf %482, %483 : vector<8x128xf32>
    %485 = arith.truncf %484 : vector<8x128xf32> to vector<8x128xbf16>
    %c0_152 = arith.constant 0 : index
    %c0_153 = arith.constant 0 : index
    %486 = vector.load %arg5[%c0_152, %c0_153] : memref<128x384xbf16, #tpu.memory_space<vmem>>, vector<128x384xbf16>
    %cst_154 = arith.constant dense<0.000000e+00> : vector<8x384xf32>
    %487 = tpu.matmul %485, %486, %cst_154 {dimension_numbers = #tpu.dot_dimension_numbers<[1], [0], [0], [1], [0, 0, 1, 1], [], []>} : vector<8x128xbf16>, vector<128x384xbf16>, vector<8x384xf32> -> vector<8x384xf32>
    %c0_155 = arith.constant 0 : index
    %c0_156 = arith.constant 0 : index
    %488 = vector.load %arg7[%c0_155, %c0_156] : memref<1x384xf32, #tpu.memory_space<vmem>>, vector<1x384xf32>
    %489 = vector.broadcast %488 : vector<1x384xf32> to vector<8x384xf32>
    %490 = arith.addf %487, %489 : vector<8x384xf32>
    %491 = arith.truncf %448 : vector<8x128xf32> to vector<8x128xbf16>
    %c0_157 = arith.constant 0 : index
    %c0_158 = arith.constant 0 : index
    %492 = vector.load %arg6[%c0_157, %c0_158] : memref<128x384xbf16, #tpu.memory_space<vmem>>, vector<128x384xbf16>
    %cst_159 = arith.constant dense<0.000000e+00> : vector<8x384xf32>
    %493 = tpu.matmul %491, %492, %cst_159 {dimension_numbers = #tpu.dot_dimension_numbers<[1], [0], [0], [1], [0, 0, 1, 1], [], []>} : vector<8x128xbf16>, vector<128x384xbf16>, vector<8x384xf32> -> vector<8x384xf32>
    %c0_160 = arith.constant 0 : index
    %c0_161 = arith.constant 0 : index
    %494 = vector.load %arg8[%c0_160, %c0_161] : memref<1x384xf32, #tpu.memory_space<vmem>>, vector<1x384xf32>
    %495 = vector.broadcast %494 : vector<1x384xf32> to vector<8x384xf32>
    %496 = arith.addf %493, %495 : vector<8x384xf32>
    %497 = vector.extract_strided_slice %490 {offsets = [0, 0], sizes = [8, 128], strides = [1, 1]} : vector<8x384xf32> to vector<8x128xf32>
    %498 = vector.extract_strided_slice %496 {offsets = [0, 0], sizes = [8, 128], strides = [1, 1]} : vector<8x384xf32> to vector<8x128xf32>
    %499 = arith.addf %497, %498 : vector<8x128xf32>
    %500 = arith.negf %499 : vector<8x128xf32>
    %501 = math.exp %500 : vector<8x128xf32>
    %cst_162 = arith.constant 1.000000e+00 : f32
    %502 = vector.broadcast %cst_162 : f32 to vector<8x128xf32>
    %503 = arith.addf %502, %501 : vector<8x128xf32>
    %504 = arith.divf %502, %503 : vector<8x128xf32>
    %505 = vector.extract_strided_slice %490 {offsets = [0, 128], sizes = [8, 128], strides = [1, 1]} : vector<8x384xf32> to vector<8x128xf32>
    %506 = vector.extract_strided_slice %496 {offsets = [0, 128], sizes = [8, 128], strides = [1, 1]} : vector<8x384xf32> to vector<8x128xf32>
    %507 = arith.addf %505, %506 : vector<8x128xf32>
    %508 = arith.negf %507 : vector<8x128xf32>
    %509 = math.exp %508 : vector<8x128xf32>
    %cst_163 = arith.constant 1.000000e+00 : f32
    %510 = vector.broadcast %cst_163 : f32 to vector<8x128xf32>
    %511 = arith.addf %510, %509 : vector<8x128xf32>
    %512 = arith.divf %510, %511 : vector<8x128xf32>
    %513 = vector.extract_strided_slice %490 {offsets = [0, 256], sizes = [8, 128], strides = [1, 1]} : vector<8x384xf32> to vector<8x128xf32>
    %514 = vector.extract_strided_slice %496 {offsets = [0, 256], sizes = [8, 128], strides = [1, 1]} : vector<8x384xf32> to vector<8x128xf32>
    %515 = arith.mulf %504, %514 : vector<8x128xf32>
    %516 = arith.addf %513, %515 : vector<8x128xf32>
    %517 = math.tanh %516 : vector<8x128xf32>
    %cst_164 = arith.constant 1.000000e+00 : f32
    %518 = vector.broadcast %cst_164 : f32 to vector<8x128xf32>
    %519 = arith.subf %518, %512 : vector<8x128xf32>
    %520 = arith.mulf %519, %517 : vector<8x128xf32>
    %521 = arith.mulf %512, %448 : vector<8x128xf32>
    %522 = arith.addf %520, %521 : vector<8x128xf32>
    %c7_i32 = arith.constant 7 : i32
    %523 = arith.index_cast %c7_i32 : i32 to index
    %c0_165 = arith.constant 0 : index
    %c0_166 = arith.constant 0 : index
    %524 = vector.load %arg2[%523, %c0_165, %c0_166] : memref<8x8x384xbf16, #tpu.memory_space<vmem>>, vector<1x8x384xbf16>
    %525 = vector.shape_cast %524 : vector<1x8x384xbf16> to vector<8x384xbf16>
    %526 = arith.extf %525 : vector<8x384xbf16> to vector<8x384xf32>
    %527 = arith.truncf %484 : vector<8x128xf32> to vector<8x128xbf16>
    %c0_167 = arith.constant 0 : index
    %c0_168 = arith.constant 0 : index
    %528 = vector.load %arg3[%c0_167, %c0_168] : memref<128x384xbf16, #tpu.memory_space<vmem>>, vector<128x384xbf16>
    %cst_169 = arith.constant dense<0.000000e+00> : vector<8x384xf32>
    %529 = tpu.matmul %527, %528, %cst_169 {dimension_numbers = #tpu.dot_dimension_numbers<[1], [0], [0], [1], [0, 0, 1, 1], [], []>} : vector<8x128xbf16>, vector<128x384xbf16>, vector<8x384xf32> -> vector<8x384xf32>
    %c0_170 = arith.constant 0 : index
    %c0_171 = arith.constant 0 : index
    %530 = vector.load %arg4[%c0_170, %c0_171] : memref<1x384xf32, #tpu.memory_space<vmem>>, vector<1x384xf32>
    %531 = vector.broadcast %530 : vector<1x384xf32> to vector<8x384xf32>
    %532 = arith.addf %529, %531 : vector<8x384xf32>
    %533 = vector.extract_strided_slice %526 {offsets = [0, 0], sizes = [8, 128], strides = [1, 1]} : vector<8x384xf32> to vector<8x128xf32>
    %534 = vector.extract_strided_slice %532 {offsets = [0, 0], sizes = [8, 128], strides = [1, 1]} : vector<8x384xf32> to vector<8x128xf32>
    %535 = arith.addf %533, %534 : vector<8x128xf32>
    %536 = arith.negf %535 : vector<8x128xf32>
    %537 = math.exp %536 : vector<8x128xf32>
    %cst_172 = arith.constant 1.000000e+00 : f32
    %538 = vector.broadcast %cst_172 : f32 to vector<8x128xf32>
    %539 = arith.addf %538, %537 : vector<8x128xf32>
    %540 = arith.divf %538, %539 : vector<8x128xf32>
    %541 = vector.extract_strided_slice %526 {offsets = [0, 128], sizes = [8, 128], strides = [1, 1]} : vector<8x384xf32> to vector<8x128xf32>
    %542 = vector.extract_strided_slice %532 {offsets = [0, 128], sizes = [8, 128], strides = [1, 1]} : vector<8x384xf32> to vector<8x128xf32>
    %543 = arith.addf %541, %542 : vector<8x128xf32>
    %544 = arith.negf %543 : vector<8x128xf32>
    %545 = math.exp %544 : vector<8x128xf32>
    %cst_173 = arith.constant 1.000000e+00 : f32
    %546 = vector.broadcast %cst_173 : f32 to vector<8x128xf32>
    %547 = arith.addf %546, %545 : vector<8x128xf32>
    %548 = arith.divf %546, %547 : vector<8x128xf32>
    %549 = vector.extract_strided_slice %526 {offsets = [0, 256], sizes = [8, 128], strides = [1, 1]} : vector<8x384xf32> to vector<8x128xf32>
    %550 = vector.extract_strided_slice %532 {offsets = [0, 256], sizes = [8, 128], strides = [1, 1]} : vector<8x384xf32> to vector<8x128xf32>
    %551 = arith.mulf %540, %550 : vector<8x128xf32>
    %552 = arith.addf %549, %551 : vector<8x128xf32>
    %553 = math.tanh %552 : vector<8x128xf32>
    %cst_174 = arith.constant 1.000000e+00 : f32
    %554 = vector.broadcast %cst_174 : f32 to vector<8x128xf32>
    %555 = arith.subf %554, %548 : vector<8x128xf32>
    %556 = arith.mulf %555, %553 : vector<8x128xf32>
    %557 = arith.mulf %548, %484 : vector<8x128xf32>
    %558 = arith.addf %556, %557 : vector<8x128xf32>
    %559 = arith.truncf %558 : vector<8x128xf32> to vector<8x128xbf16>
    %c0_175 = arith.constant 0 : index
    %c0_176 = arith.constant 0 : index
    %560 = vector.load %arg5[%c0_175, %c0_176] : memref<128x384xbf16, #tpu.memory_space<vmem>>, vector<128x384xbf16>
    %cst_177 = arith.constant dense<0.000000e+00> : vector<8x384xf32>
    %561 = tpu.matmul %559, %560, %cst_177 {dimension_numbers = #tpu.dot_dimension_numbers<[1], [0], [0], [1], [0, 0, 1, 1], [], []>} : vector<8x128xbf16>, vector<128x384xbf16>, vector<8x384xf32> -> vector<8x384xf32>
    %c0_178 = arith.constant 0 : index
    %c0_179 = arith.constant 0 : index
    %562 = vector.load %arg7[%c0_178, %c0_179] : memref<1x384xf32, #tpu.memory_space<vmem>>, vector<1x384xf32>
    %563 = vector.broadcast %562 : vector<1x384xf32> to vector<8x384xf32>
    %564 = arith.addf %561, %563 : vector<8x384xf32>
    %565 = arith.truncf %522 : vector<8x128xf32> to vector<8x128xbf16>
    %c0_180 = arith.constant 0 : index
    %c0_181 = arith.constant 0 : index
    %566 = vector.load %arg6[%c0_180, %c0_181] : memref<128x384xbf16, #tpu.memory_space<vmem>>, vector<128x384xbf16>
    %cst_182 = arith.constant dense<0.000000e+00> : vector<8x384xf32>
    %567 = tpu.matmul %565, %566, %cst_182 {dimension_numbers = #tpu.dot_dimension_numbers<[1], [0], [0], [1], [0, 0, 1, 1], [], []>} : vector<8x128xbf16>, vector<128x384xbf16>, vector<8x384xf32> -> vector<8x384xf32>
    %c0_183 = arith.constant 0 : index
    %c0_184 = arith.constant 0 : index
    %568 = vector.load %arg8[%c0_183, %c0_184] : memref<1x384xf32, #tpu.memory_space<vmem>>, vector<1x384xf32>
    %569 = vector.broadcast %568 : vector<1x384xf32> to vector<8x384xf32>
    %570 = arith.addf %567, %569 : vector<8x384xf32>
    %571 = vector.extract_strided_slice %564 {offsets = [0, 0], sizes = [8, 128], strides = [1, 1]} : vector<8x384xf32> to vector<8x128xf32>
    %572 = vector.extract_strided_slice %570 {offsets = [0, 0], sizes = [8, 128], strides = [1, 1]} : vector<8x384xf32> to vector<8x128xf32>
    %573 = arith.addf %571, %572 : vector<8x128xf32>
    %574 = arith.negf %573 : vector<8x128xf32>
    %575 = math.exp %574 : vector<8x128xf32>
    %cst_185 = arith.constant 1.000000e+00 : f32
    %576 = vector.broadcast %cst_185 : f32 to vector<8x128xf32>
    %577 = arith.addf %576, %575 : vector<8x128xf32>
    %578 = arith.divf %576, %577 : vector<8x128xf32>
    %579 = vector.extract_strided_slice %564 {offsets = [0, 128], sizes = [8, 128], strides = [1, 1]} : vector<8x384xf32> to vector<8x128xf32>
    %580 = vector.extract_strided_slice %570 {offsets = [0, 128], sizes = [8, 128], strides = [1, 1]} : vector<8x384xf32> to vector<8x128xf32>
    %581 = arith.addf %579, %580 : vector<8x128xf32>
    %582 = arith.negf %581 : vector<8x128xf32>
    %583 = math.exp %582 : vector<8x128xf32>
    %cst_186 = arith.constant 1.000000e+00 : f32
    %584 = vector.broadcast %cst_186 : f32 to vector<8x128xf32>
    %585 = arith.addf %584, %583 : vector<8x128xf32>
    %586 = arith.divf %584, %585 : vector<8x128xf32>
    %587 = vector.extract_strided_slice %564 {offsets = [0, 256], sizes = [8, 128], strides = [1, 1]} : vector<8x384xf32> to vector<8x128xf32>
    %588 = vector.extract_strided_slice %570 {offsets = [0, 256], sizes = [8, 128], strides = [1, 1]} : vector<8x384xf32> to vector<8x128xf32>
    %589 = arith.mulf %578, %588 : vector<8x128xf32>
    %590 = arith.addf %587, %589 : vector<8x128xf32>
    %591 = math.tanh %590 : vector<8x128xf32>
    %cst_187 = arith.constant 1.000000e+00 : f32
    %592 = vector.broadcast %cst_187 : f32 to vector<8x128xf32>
    %593 = arith.subf %592, %586 : vector<8x128xf32>
    %594 = arith.mulf %593, %591 : vector<8x128xf32>
    %595 = arith.mulf %586, %522 : vector<8x128xf32>
    %596 = arith.addf %594, %595 : vector<8x128xf32>
    %c8_i32 = arith.constant 8 : i32
    %c0_188 = arith.constant 0 : index
    %c0_189 = arith.constant 0 : index
    %597 = vector.load %arg12[%c0_188, %c0_189] : memref<8x128xf32, #tpu.memory_space<vmem>>, vector<8x128xf32>
    tpu.vector_store %arg12[%c0_188, %c0_189], %558 {strides = array<i32>} : memref<8x128xf32, #tpu.memory_space<vmem>>, vector<8x128xf32>,
    %c0_190 = arith.constant 0 : index
    %c0_191 = arith.constant 0 : index
    %598 = vector.load %arg13[%c0_190, %c0_191] : memref<8x128xf32, #tpu.memory_space<vmem>>, vector<8x128xf32>
    tpu.vector_store %arg13[%c0_190, %c0_191], %596 {strides = array<i32>} : memref<8x128xf32, #tpu.memory_space<vmem>>, vector<8x128xf32>,
    %c0_i32_192 = arith.constant 0 : i32
    %599 = arith.cmpi eq, %arg1, %c0_i32_192 : i32
    %600 = arith.extui %599 : i1 to i32
    %c0_i32_193 = arith.constant 0 : i32
    %601 = arith.cmpi ne, %600, %c0_i32_193 : i32
    scf.if %601 {
      %c0_194 = arith.constant 0 : index
      %c0_195 = arith.constant 0 : index
      %602 = vector.load %arg12[%c0_194, %c0_195] : memref<8x128xf32, #tpu.memory_space<vmem>>, vector<8x128xf32>
      %c0_196 = arith.constant 0 : index
      %c0_197 = arith.constant 0 : index
      %603 = vector.load %arg13[%c0_196, %c0_197] : memref<8x128xf32, #tpu.memory_space<vmem>>, vector<8x128xf32>
      %c0_198 = arith.constant 0 : index
      %c0_199 = arith.constant 0 : index
      %604 = vector.load %arg9[%c0_198, %c0_199] : memref<1x256xf32, #tpu.memory_space<vmem>>, vector<1x128xf32>
      %605 = vector.broadcast %604 : vector<1x128xf32> to vector<8x128xf32>
      %606 = arith.mulf %602, %605 : vector<8x128xf32>
      %cst_200 = arith.constant dense<0.000000e+00> : vector<8xf32>
      %607 = vector.multi_reduction <add>, %606, %cst_200 [1] : vector<8x128xf32> to vector<8xf32>
      %608 = vector.shape_cast %607 : vector<8xf32> to vector<8x1xf32>
      %c0_201 = arith.constant 0 : index
      %c128 = arith.constant 128 : index
      %609 = vector.load %arg9[%c0_201, %c128] : memref<1x256xf32, #tpu.memory_space<vmem>>, vector<1x128xf32>
      %610 = vector.broadcast %609 : vector<1x128xf32> to vector<8x128xf32>
      %611 = arith.mulf %603, %610 : vector<8x128xf32>
      %cst_202 = arith.constant dense<0.000000e+00> : vector<8xf32>
      %612 = vector.multi_reduction <add>, %611, %cst_202 [1] : vector<8x128xf32> to vector<8xf32>
      %613 = vector.shape_cast %612 : vector<8xf32> to vector<8x1xf32>
      %614 = arith.addf %608, %613 : vector<8x1xf32>
      %c0_203 = arith.constant 0 : index
      %c0_204 = arith.constant 0 : index
      %615 = vector.load %arg10[%c0_203, %c0_204] : memref<1x1xf32, #tpu.memory_space<vmem>>, vector<1x1xf32>
      %616 = vector.broadcast %615 : vector<1x1xf32> to vector<8x1xf32>
      %617 = arith.addf %614, %616 : vector<8x1xf32>
      %618 = arith.negf %617 : vector<8x1xf32>
      %619 = math.exp %618 : vector<8x1xf32>
      %cst_205 = arith.constant 1.000000e+00 : f32
      %620 = vector.broadcast %cst_205 : f32 to vector<8x1xf32>
      %621 = arith.addf %620, %619 : vector<8x1xf32>
      %622 = arith.divf %620, %621 : vector<8x1xf32>
      %c0_206 = arith.constant 0 : index
      %c0_207 = arith.constant 0 : index
      %623 = vector.load %arg11[%c0_206, %c0_207] : memref<8x1xf32, #tpu.memory_space<vmem>>, vector<8x1xf32>
      tpu.vector_store %arg11[%c0_206, %c0_207], %622 {strides = array<i32>} : memref<8x1xf32, #tpu.memory_space<vmem>>, vector<8x1xf32>,
    } else {
    }
    return
  }
  func.func @transform_0(%arg0: i32, %arg1: i32) -> (i32, i32, i32) {
    %c0_i32 = arith.constant 0 : i32
    %c0_i32_0 = arith.constant 0 : i32
    return %arg1, %arg0, %c0_i32 : i32, i32, i32
  }
  func.func @transform_1(%arg0: i32, %arg1: i32) -> (i32, i32) {
    %c0_i32 = arith.constant 0 : i32
    %c0_i32_0 = arith.constant 0 : i32
    %c0_i32_1 = arith.constant 0 : i32
    return %c0_i32, %c0_i32_0 : i32, i32
  }
  func.func @transform_2(%arg0: i32, %arg1: i32) -> (i32, i32) {
    %c0_i32 = arith.constant 0 : i32
    %c0_i32_0 = arith.constant 0 : i32
    %c0_i32_1 = arith.constant 0 : i32
    return %c0_i32, %c0_i32_0 : i32, i32
  }
  func.func @transform_3(%arg0: i32, %arg1: i32) -> (i32, i32) {
    %c0_i32 = arith.constant 0 : i32
    %c0_i32_0 = arith.constant 0 : i32
    %c0_i32_1 = arith.constant 0 : i32
    return %c0_i32, %c0_i32_0 : i32, i32
  }
  func.func @transform_4(%arg0: i32, %arg1: i32) -> (i32, i32) {
    %c0_i32 = arith.constant 0 : i32
    %c0_i32_0 = arith.constant 0 : i32
    %c0_i32_1 = arith.constant 0 : i32
    return %c0_i32, %c0_i32_0 : i32, i32
  }
  func.func @transform_5(%arg0: i32, %arg1: i32) -> (i32, i32) {
    %c0_i32 = arith.constant 0 : i32
    %c0_i32_0 = arith.constant 0 : i32
    %c0_i32_1 = arith.constant 0 : i32
    return %c0_i32, %c0_i32_0 : i32, i32
  }
  func.func @transform_6(%arg0: i32, %arg1: i32) -> (i32, i32) {
    %c0_i32 = arith.constant 0 : i32
    %c0_i32_0 = arith.constant 0 : i32
    %c0_i32_1 = arith.constant 0 : i32
    return %c0_i32, %c0_i32_0 : i32, i32
  }
  func.func @transform_7(%arg0: i32, %arg1: i32) -> (i32, i32) {
    %c0_i32 = arith.constant 0 : i32
    %c0_i32_0 = arith.constant 0 : i32
    %c0_i32_1 = arith.constant 0 : i32
    return %c0_i32, %c0_i32_0 : i32, i32
  }
  func.func @transform_8(%arg0: i32, %arg1: i32) -> (i32, i32) {
    %c0_i32 = arith.constant 0 : i32
    %c0_i32_0 = arith.constant 0 : i32
    %c0_i32_1 = arith.constant 0 : i32
    return %c0_i32, %c0_i32_0 : i32, i32
  }
  func.func @transform_9(%arg0: i32, %arg1: i32) -> (i32, i32) {
    %c0_i32 = arith.constant 0 : i32
    %c0_i32_0 = arith.constant 0 : i32
    return %arg0, %c0_i32 : i32, i32
  }
}

</mosaic_0001>

<bundles_post_ra>
// kernel: discriminator_forward.1
= control target key start
LH: loop header
LB: loop body
LE: loop exit
PB: predicated region body
PF: predicated region fallthrough
CT: control target
= control target key end

     0   :  { %s6181_s0 = inlined_call_operand.vmem [shape: bf16[8,8,384], index: 0, kind: input, shape index: {}]   ;;  %s6182_s1 = inlined_call_operand.vmem [shape: bf16[128,384], index: 1, kind: input, shape index: {}]   ;;  %s6183_s2 = inlined_call_operand.vmem [shape: f32[1,384], index: 2, kind: input, shape index: {}]   ;;  %s6184_s3 = inlined_call_operand.hbm [shape: bf16[128,384], index: 3, kind: input, shape index: {}]   ;;  %s6185_s4 = inlined_call_operand.hbm [shape: bf16[128,384], index: 4, kind: input, shape index: {}]   ;;  %s6186_s5 = inlined_call_operand.vmem [shape: f32[1,384], index: 5, kind: input, shape index: {}]   ;;  %s6187_s6 = inlined_call_operand.vmem [shape: f32[1,384], index: 6, kind: input, shape index: {}]   ;;  %s6188_s7 = inlined_call_operand.vmem [shape: f32[1,256], index: 7, kind: input, shape index: {}]   ;;  %s6189_s8 = inlined_call_operand.<no memory space> [shape: f32[1,1], index: 8, kind: input, shape index: {}]   ;;  %s6190_s9 = inlined_call_operand.vmem [shape: f32[8,1], index: 9, kind: output, shape index: {}]  }
   0x1   :  { %v14_v0 = vstv %s6189_s8 }
   0x2   :  { %15 = vst [vmem:[#allocation4] sm:$0x1] %v14_v0 }
   0x3   :  { %16 = vsyncpa [#allocation6], 0 }
   0x4   :  { %17 = vsyncpa [#allocation8], 0  ;;  %s4338_s11 = smov [#allocation5]   ;;  %s4290_s15 = scalar_lea.hbm %s6184_s3, 3072 }
   0x5   :  { %s29_s12 = sshll.u32 %s4338_s11, 4  ;;  %p4291_p0 = scmp.ne.s32.totalorder %s6184_s3, %s4290_s15  ;;  %s30_s12 = int_to_ptr.vmem [resolvable:$true] %s29_s12 }
   0x6   :  { %p4294_p1 = scmp.lt.u32.totalorder %s4290_s15, %s6184_s3 }
   0x8   :  { %p4296_p2 = pnand %p4294_p1, %p4291_p0 }
   0xa   :  { %4299 = shalt.err (!%p4296_p2)
}
   0xb   :  { %s4300_s8 = scalar_lea.vmem %s30_s12, 3072  ;;  %p4305_p4 = scmp.lt.s32.totalorder %s30_s12, %s30_s12 }
   0xc   :  { %p4301_p3 = scmp.ne.s32.totalorder %s30_s12, %s4300_s8  ;;  %p4306_p5 = scmp.lt.s32.totalorder %s4300_s8, %s4300_s8 }
   0xe   :  { %p4307_p6 = por %p4306_p5, %p4305_p4 }
  0x10   :  { %p4308_p7 = pnand %p4307_p6, %p4301_p3 }
  0x12   :  { %4311 = shalt.err (!%p4308_p7)
}
  0x13   :  { %s4339_s20 = smov 192   ;;  %s4340_s21 = smov 12  }
  0x14   :  { %35 = dma.hbm_to_vmem [thread:$0]  %s6184_s3, 3072, %s30_s12, [#allocation6], %s4339_s20, %s4339_s20, %s4340_s21  }
  0x15   :  { %s4341_s24 = smov [#allocation7]   ;;  %s4312_s28 = scalar_lea.hbm %s6185_s4, 3072 }
  0x16   :  { %s41_s25 = sshll.u32 %s4341_s24, 4  ;;  %p4313_p8 = scmp.ne.s32.totalorder %s6185_s4, %s4312_s28  ;;  %s42_s25 = int_to_ptr.vmem [resolvable:$true] %s41_s25 }
  0x17   :  { %p4316_p9 = scmp.lt.u32.totalorder %s4312_s28, %s6185_s4 }
  0x19   :  { %p4318_p10 = pnand %p4316_p9, %p4313_p8 }
  0x1b   :  { %4321 = shalt.err (!%p4318_p10)
}
  0x1c   :  { %s4322_s13 = scalar_lea.vmem %s42_s25, 3072  ;;  %p4327_p12 = scmp.lt.s32.totalorder %s42_s25, %s42_s25 }
  0x1d   :  { %p4323_p11 = scmp.ne.s32.totalorder %s42_s25, %s4322_s13  ;;  %p4328_p13 = scmp.lt.s32.totalorder %s4322_s13, %s4322_s13 }
  0x1f   :  { %p4329_p0 = por %p4328_p13, %p4327_p12 }
  0x21   :  { %p4330_p1 = pnand %p4329_p0, %p4323_p11 }
  0x23   :  { %4333 = shalt.err (!%p4330_p1)
}
  0x24   :  { %47 = dma.hbm_to_vmem [thread:$0]  %s6185_s4, 3072, %s42_s25, [#allocation8], %s4339_s20, %s4339_s20, %s4340_s21  }
  0x25   :  { %4334 = dma.done.wait [#allocation6], 3072  }
  0x26   :  { %4335 = vsyncadd [#allocation6], 4294964224 }
  0x27   :  { %4336 = dma.done.wait [#allocation8], 3072  }
  0x28   :  { %4337 = vsyncadd [#allocation8], 4294964224  ;;  %v6195_v1 = vmov 0.0   ;;  %v6193_v2 = vmov 0   ;;  %vm4344_vm0 = vmmov 0   ;;  %v6191_v26 = vmov 0.0|0.0  }
  0x29   :  { %3334 = vmatprep.subr.bf16.mxu1 %v6195_v1  ;;  %286 = vmatprep.mubr.bf16.mxu0 %v6193_v2  ;;  %v4430_v3 = vld [vmem:[%s6182_s1 + $0x4] ss:$12 sps:$4 sm:$0xff]   ;;  %v4435_v4 = vld [vmem:[%s6182_s1] ss:$12 sps:$4 sm:$0xff]   ;;  %v4441_v5 = vld [vmem:[%s6182_s1 + $0x1c] ss:$12 sps:$4 sm:$0xff]   ;;  %v111_v53 = vlaneseq }
  0x2a   :  { %3350 = vmatprep.mubr.msk.bf16.mxu1 %vm4344_vm0, %v6195_v1  ;;  %254 = vmatprep.subr.bf16.mxu0 %v4430_v3  ;;  %v4447_v6 = vld [vmem:[%s6182_s1 + $0x18] ss:$12 sps:$4 sm:$0xff]   ;;  %v4453_v7 = vld [vmem:[%s6182_s1 + $0x34] ss:$12 sps:$4 sm:$0xff]   ;;  %v4459_v8 = vld [vmem:[%s6182_s1 + $0x30] ss:$12 sps:$4 sm:$0xff]  }
  0x2b   :  { %255 = vmatpush1.bf16.msra.mxu0 %v4435_v4  ;;  %v4465_v9 = vld [vmem:[%s6182_s1 + $0x4c] ss:$12 sps:$4 sm:$0xff]   ;;  %v4470_v10 = vld [vmem:[%s6182_s1 + $0x8] ss:$12 sps:$4 sm:$0xff]   ;;  %v4481_v12 = vld [vmem:[%s6182_s1 + $0x64] ss:$12 sps:$4 sm:$0xff]  }
  0x2c   :  { %256 = vmatprep.subr.bf16.mxu0 %v4441_v5  ;;  %v4476_v11 = vld [vmem:[%s6182_s1 + $0x48] ss:$12 sps:$4 sm:$0xff]   ;;  %3335 = vmatpush3.bf16.msra.mxu1 %v4470_v10  ;;  %v4488_v13 = vld [vmem:[%s6182_s1 + $0x20] ss:$12 sps:$4 sm:$0xff]   ;;  %v4507_v16 = vld [vmem:[%s6182_s1 + $0x38] ss:$12 sps:$4 sm:$0xff]  }
  0x2d   :  { %3336 = vmatprep.subr.bf16.mxu1 %v6195_v1  ;;  %v4494_v14 = vld [vmem:[%s6182_s1 + $0x60] ss:$12 sps:$4 sm:$0xff]   ;;  %v4500_v15 = vld [vmem:[%s6182_s1 + $0x7c] ss:$12 sps:$4 sm:$0xff]   ;;  %v4513_v17 = vld [vmem:[%s6182_s1 + $0x78] ss:$12 sps:$4 sm:$0xff]  }
  0x2e   :  { %v4518_v18 = vld [vmem:[%s6182_s1 + $0x94] ss:$12 sps:$4 sm:$0xff]   ;;  %v4524_v19 = vld [vmem:[%s6182_s1 + $0x50] ss:$12 sps:$4 sm:$0xff]   ;;  %v4537_v21 = vld [vmem:[%s6182_s1 + $0xac] ss:$12 sps:$4 sm:$0xff]  }
  0x2f   :  { %257 = vmatpush1.bf16.msra.mxu0 %v4447_v6  ;;  %v4531_v20 = vld [vmem:[%s6182_s1 + $0x90] ss:$12 sps:$4 sm:$0xff]   ;;  %v4542_v22 = vld [vmem:[%s6182_s1 + $0x68] ss:$12 sps:$4 sm:$0xff]   ;;  %v4556_v24 = vld [vmem:[%s6182_s1 + $0x80] ss:$12 sps:$4 sm:$0xff]  }
  0x30   :  { %258 = vmatprep.subr.bf16.mxu0 %v4453_v7  ;;  %3337 = vmatpush3.bf16.msra.mxu1 %v4488_v13  ;;  %v4550_v23 = vld [vmem:[%s6182_s1 + $0xa8] ss:$12 sps:$4 sm:$0xff]   ;;  %v4565_v25 = vld [vmem:[%s6182_s1 + $0x98] ss:$12 sps:$4 sm:$0xff]   ;;  %v4574_v27 = vld [vmem:[%s6182_s1 + $0xb0] ss:$12 sps:$4 sm:$0xff]  }
  0x31   :  { %3338 = vmatprep.subr.bf16.mxu1 %v6195_v1  ;;  %v4584_v28 = vld [vmem:[#allocation5 + $0x4] ss:$12 sps:$4 sm:$0xff]   ;;  %v4586_v29 = vld [vmem:[#allocation5] ss:$12 sps:$4 sm:$0xff]   ;;  %v4588_v30 = vld [vmem:[#allocation5 + $0x8] ss:$12 sps:$4 sm:$0xff]  }
  0x32   :  { %6333 = vst [vmem:[#allocation11_spill] sm:$0xff] %v4586_v29  ;;  %6334 = vst [vmem:[#allocation12_spill] sm:$0xff] %v4588_v30  ;;  %v4593_v31 = vld [vmem:[#allocation5 + $0x1c] ss:$12 sps:$4 sm:$0xff]   ;;  %v4596_v32 = vld [vmem:[#allocation5 + $0x18] ss:$12 sps:$4 sm:$0xff]  }
  0x33   :  { %259 = vmatpush1.bf16.msra.mxu0 %v4459_v8  ;;  %6335 = vst [vmem:[#allocation13_spill] sm:$0xff] %v4593_v31  ;;  %6336 = vst [vmem:[#allocation14_spill] sm:$0xff] %v4596_v32  ;;  %v4598_v33 = vld [vmem:[#allocation5 + $0x20] ss:$12 sps:$4 sm:$0xff]   ;;  %v4606_v35 = vld [vmem:[#allocation5 + $0x30] ss:$12 sps:$4 sm:$0xff]  }
  0x34   :  { %260 = vmatprep.subr.bf16.mxu0 %v4465_v9  ;;  %3339 = vmatpush3.bf16.msra.mxu1 %v4507_v16  ;;  %6337 = vst [vmem:[#allocation15_spill] sm:$0xff] %v4598_v33  ;;  %v4603_v34 = vld [vmem:[#allocation5 + $0x34] ss:$12 sps:$4 sm:$0xff]   ;;  %6339 = vst [vmem:[#allocation17_spill] sm:$0xff] %v4606_v35  ;;  %v4608_v36 = vld [vmem:[#allocation5 + $0x38] ss:$12 sps:$4 sm:$0xff]  }
  0x35   :  { %3340 = vmatprep.subr.bf16.mxu1 %v6195_v1  ;;  %6338 = vst [vmem:[#allocation16_spill] sm:$0xff] %v4603_v34  ;;  %6340 = vst [vmem:[#allocation18_spill] sm:$0xff] %v4608_v36  ;;  %v4613_v37 = vld [vmem:[#allocation5 + $0x4c] ss:$12 sps:$4 sm:$0xff]   ;;  %v4616_v38 = vld [vmem:[#allocation5 + $0x48] ss:$12 sps:$4 sm:$0xff]  }
  0x36   :  { %6341 = vst [vmem:[#allocation19_spill] sm:$0xff] %v4613_v37  ;;  %6342 = vst [vmem:[#allocation20_spill] sm:$0xff] %v4616_v38  ;;  %v4618_v39 = vld [vmem:[#allocation5 + $0x50] ss:$12 sps:$4 sm:$0xff]   ;;  %v4626_v41 = vld [vmem:[#allocation5 + $0x60] ss:$12 sps:$4 sm:$0xff]  }
  0x37   :  { %261 = vmatpush1.bf16.msra.mxu0 %v4476_v11  ;;  %6343 = vst [vmem:[#allocation21_spill] sm:$0xff] %v4618_v39  ;;  %v4623_v40 = vld [vmem:[#allocation5 + $0x64] ss:$12 sps:$4 sm:$0xff]   ;;  %6345 = vst [vmem:[#allocation23_spill] sm:$0xff] %v4626_v41  ;;  %v4628_v42 = vld [vmem:[#allocation5 + $0x68] ss:$12 sps:$4 sm:$0xff]  }
  0x38   :  { %262 = vmatprep.subr.bf16.mxu0 %v4481_v12  ;;  %3341 = vmatpush3.bf16.msra.mxu1 %v4524_v19  ;;  %6344 = vst [vmem:[#allocation22_spill] sm:$0xff] %v4623_v40  ;;  %6346 = vst [vmem:[#allocation24_spill] sm:$0xff] %v4628_v42  ;;  %v4631_v43 = vld [vmem:[#allocation5 + $0x7c] ss:$12 sps:$4 sm:$0xff]   ;;  %v4635_v44 = vld [vmem:[#allocation5 + $0x78] ss:$12 sps:$4 sm:$0xff]  }
  0x39   :  { %3342 = vmatprep.subr.bf16.mxu1 %v6195_v1  ;;  %6347 = vst [vmem:[#allocation25_spill] sm:$0xff] %v4631_v43  ;;  %6348 = vst [vmem:[#allocation26_spill] sm:$0xff] %v4635_v44  ;;  %v4637_v45 = vld [vmem:[#allocation5 + $0x80] ss:$12 sps:$4 sm:$0xff]   ;;  %v4645_v47 = vld [vmem:[#allocation5 + $0x90] ss:$12 sps:$4 sm:$0xff]  }
  0x3a   :  { %6349 = vst [vmem:[#allocation27_spill] sm:$0xff] %v4637_v45  ;;  %v4641_v46 = vld [vmem:[#allocation5 + $0x94] ss:$12 sps:$4 sm:$0xff]   ;;  %6351 = vst [vmem:[#allocation29_spill] sm:$0xff] %v4645_v47  ;;  %v4647_v48 = vld [vmem:[#allocation5 + $0x98] ss:$12 sps:$4 sm:$0xff]  }
  0x3b   :  { %263 = vmatpush1.bf16.msra.mxu0 %v4494_v14  ;;  %6350 = vst [vmem:[#allocation28_spill] sm:$0xff] %v4641_v46  ;;  %6352 = vst [vmem:[#allocation30_spill] sm:$0xff] %v4647_v48  ;;  %v4651_v49 = vld [vmem:[#allocation5 + $0xac] ss:$12 sps:$4 sm:$0xff]   ;;  %v4655_v50 = vld [vmem:[#allocation5 + $0xa8] ss:$12 sps:$4 sm:$0xff]  }
  0x3c   :  { %264 = vmatprep.subr.bf16.mxu0 %v4500_v15  ;;  %3343 = vmatpush3.bf16.msra.mxu1 %v4542_v22  ;;  %6353 = vst [vmem:[#allocation31_spill] sm:$0xff] %v4651_v49  ;;  %6354 = vst [vmem:[#allocation32_spill] sm:$0xff] %v4655_v50  ;;  %v4657_v51 = vld [vmem:[#allocation5 + $0xb0] ss:$12 sps:$4 sm:$0xff]   ;;  %v112_v54 = vshrl.u32 %v111_v53, 7  ;;  %vm2988_vm1 = vcmask 7168  }
  0x3d   :  { %3344 = vmatprep.subr.bf16.mxu1 %v6195_v1  ;;  %6355 = vst [vmem:[#allocation33_spill] sm:$0xff] %v4657_v51  ;;  %v4661_v52 = vld [vmem:[#allocation7 + $0x4] ss:$12 sps:$4 sm:$0xff]   ;;  %v109_v56 = vld [vmem:[%s6183_s2] sm:$0x7] }
  0x3e   :  { %6356 = vst [vmem:[#allocation34_spill] sm:$0xff] %v4661_v52  ;;  %v4667_v55 = vsub.s32 0, %v112_v54  ;;  %v4672_v57 = vsub.s32 1, %v112_v54  ;;  %v71_v58 = vld [vmem:[%s6181_s0] sm:$0xff] }
  0x3f   :  { %265 = vmatpush1.bf16.msra.mxu0 %v4513_v17  ;;  %v73_v61 = vunpack.c.l.bf16 %v71_v58  ;;  %v74_v53 = vunpack.c.h.bf16 %v71_v58 }
  0x40   :  { %266 = vmatprep.subr.bf16.mxu0 %v4518_v18  ;;  %3345 = vmatpush3.bf16.msra.mxu1 %v4556_v24  ;;  %6357 = vst [vmem:[#allocation35_spill] sm:$0xff] %v4667_v55  ;;  %6358 = vst [vmem:[#allocation36_spill] sm:$0xff] %v4672_v57  ;;  %v4678_v59 = vrot.slane %v109_v56, %v4667_v55  ;;  %v4681_v60 = vrot.slane %v109_v56, %v4672_v57 }
  0x41   :  { %3346 = vmatprep.subr.bf16.mxu1 %v6195_v1 }
  0x43   :  { %267 = vmatpush1.bf16.msra.mxu0 %v4531_v20 }
  0x44   :  { %268 = vmatprep.subr.bf16.mxu0 %v4537_v21  ;;  %3347 = vmatpush3.bf16.msra.mxu1 %v4565_v25 }
  0x45   :  { %3348 = vmatprep.subr.bf16.mxu1 %v6195_v1 }
  0x47   :  { %269 = vmatpush1.bf16.msra.mxu0 %v4550_v23 }
  0x48   :  { %3349 = vmatpush3.bf16.msra.mxu1 %v4574_v27  ;;  %534 = vmatprep.subr.bf16.mxu0 %v4584_v28 }
  0x49   :  { %3354 = vmatprep.subr.bf16.mxu1 %v6195_v1 }
  0x4a   :  { %287 = vmatmul.mubr.bf16.vlgmr.msra.gmra.mrb[0].mxu0 %v6191_v26 }
  0x4b   :  { %566 = vmatprep.mubr.bf16.mxu0 %v6193_v2  ;;  %3351 = vmatmul.mubr.bf16.vlgmr.msra.gmra.mrb[0].mxu1 %v6191_v26 }
  0x4c   :  { %3370 = vmatprep.mubr.msk.bf16.mxu1 %vm4344_vm0, %v6195_v1  ;;  %535 = vmatpush1.bf16.msra.mxu0 %v4586_v29 }
  0x4d   :  { %3355 = vmatpush3.bf16.msra.mxu1 %v4588_v30  ;;  %536 = vmatprep.subr.bf16.mxu0 %v4593_v31 }
  0x4e   :  { %3356 = vmatprep.subr.bf16.mxu1 %v6195_v1 }
  0x50   :  { %537 = vmatpush1.bf16.msra.mxu0 %v4596_v32 }
  0x51   :  { %3357 = vmatpush3.bf16.msra.mxu1 %v4598_v33  ;;  %538 = vmatprep.subr.bf16.mxu0 %v4603_v34 }
  0x52   :  { %3358 = vmatprep.subr.bf16.mxu1 %v6195_v1 }
  0x54   :  { %539 = vmatpush1.bf16.msra.mxu0 %v4606_v35 }
  0x55   :  { %3359 = vmatpush3.bf16.msra.mxu1 %v4608_v36  ;;  %540 = vmatprep.subr.bf16.mxu0 %v4613_v37 }
  0x56   :  { %3360 = vmatprep.subr.bf16.mxu1 %v6195_v1 }
  0x58   :  { %541 = vmatpush1.bf16.msra.mxu0 %v4616_v38 }
  0x59   :  { %3361 = vmatpush3.bf16.msra.mxu1 %v4618_v39  ;;  %542 = vmatprep.subr.bf16.mxu0 %v4623_v40 }
  0x5a   :  { %3362 = vmatprep.subr.bf16.mxu1 %v6195_v1 }
  0x5c   :  { %543 = vmatpush1.bf16.msra.mxu0 %v4626_v41 }
  0x5d   :  { %3363 = vmatpush3.bf16.msra.mxu1 %v4628_v42  ;;  %544 = vmatprep.subr.bf16.mxu0 %v4631_v43 }
  0x5e   :  { %3364 = vmatprep.subr.bf16.mxu1 %v6195_v1 }
  0x60   :  { %545 = vmatpush1.bf16.msra.mxu0 %v4635_v44  ;;  %v4685_v44 = vsub.s32 2, %v112_v54 }
  0x61   :  { %3365 = vmatpush3.bf16.msra.mxu1 %v4637_v45  ;;  %546 = vmatprep.subr.bf16.mxu0 %v4641_v46 }
  0x62   :  { %3366 = vmatprep.subr.bf16.mxu1 %v6195_v1  ;;  %v4688_v58 = vrot.slane %v109_v56, %v4685_v44 }
  0x64   :  { %547 = vmatpush1.bf16.msra.mxu0 %v4645_v47 }
  0x65   :  { %3367 = vmatpush3.bf16.msra.mxu1 %v4647_v48  ;;  %548 = vmatprep.subr.bf16.mxu0 %v4651_v49 }
  0x66   :  { %3368 = vmatprep.subr.bf16.mxu1 %v6195_v1 }
  0x68   :  { %549 = vmatpush1.bf16.msra.mxu0 %v4655_v50 }
  0x69   :  { %3369 = vmatpush3.bf16.msra.mxu1 %v4657_v51  ;;  %793 = vmatprep.subr.bf16.mxu0 %v4661_v52 }
  0x6a   :  { %3374 = vmatprep.subr.bf16.mxu1 %v6195_v1 }
 0x11d   :  { %v288_v62 = vpop.f32.mrb[0].mxu0 }
 0x11e   :  { %v289_v63 = vadd.f32 %v288_v62, %v4678_v59  ;;  %v290_v0 = vpop.f32.mrb[1].mxu0  ;;  %v329_v49 = vpop.f32.mrb[0].mxu1  ;;  %v4698_v62 = vld [vmem:[#allocation7 + $0x8] ss:$12 sps:$4 sm:$0xff]  }
 0x11f   :  { %v291_v26 = vadd.f32 %v290_v0, %v4681_v60  ;;  %v292_v2 = vpop.f32.mrb[2].mxu0  ;;  %v3352_v48 = vpop.f32.mrb[1].mxu1  ;;  %v4710_v0 = vld [vmem:[#allocation7 + $0x18] ss:$12 sps:$4 sm:$0xff]  }
 0x120   :  { %v335_v1 = vadd.f32 %v289_v63, %v73_v61  ;;  %v293_v52 = vpop.f32.mrb[3].mxu0  ;;  %v332_v47 = vpop.f32.mrb[2].mxu1  ;;  %v4696_v61 = vld [vmem:[#allocation7] ss:$12 sps:$4 sm:$0xff]   ;;  %v4704_v63 = vld [vmem:[#allocation7 + $0x1c] ss:$12 sps:$4 sm:$0xff]  }
 0x121   :  { %v342_v50 = vadd.f32 %v291_v26, %v74_v53  ;;  %v3353_v57 = vpop.f32.mrb[3].mxu1  ;;  %v4712_v53 = vld [vmem:[#allocation7 + $0x20] ss:$12 sps:$4 sm:$0xff]  }
 0x122   :  { %v3020_v51 = vmul.f32 -1.442695, %v335_v1  ;;  %v72_v1 = vld [vmem:[%s6181_s0 + $0x8] sm:$0xf] }
 0x123   :  { %v3021_v55 = vmul.f32 -1.442695, %v342_v50  ;;  %v330_v50 = vadd.f32 %v329_v49, %v4688_v58  ;;  %v75_v48 = vunpack.c.l.bf16 %v72_v1  ;;  %v4716_v1 = vld [vmem:[#allocation7 + $0x34] ss:$12 sps:$4 sm:$0xff]  }
 0x124   :  { %3982 = vpow2.f32 %v3020_v51 }
 0x125   :  { %3984 = vpow2.f32 %v3021_v55 }
 0x12e   :  { %v3983_v46 = vpop.eup %3982 }
 0x12f   :  { %v339_v45 = vadd.f32 1.0, %v3983_v46  ;;  %v3985_v2 = vpop.eup %3984 }
 0x130   :  { %v346_v26 = vadd.f32 1.0, %v3985_v2  ;;  %v6359_v2 = vmov 0.0  }
 0x131   :  { %3986 = vrcp.f32 %v339_v45 }
 0x132   :  { %3988 = vrcp.f32 %v346_v26  ;;  %v6360_v26 = vmov 0  }
 0x13b   :  { %v3987_v47 = vpop.eup %3986 }
 0x13c   :  { %v349_v51 = vmul.f32 %v3987_v47, %v330_v50  ;;  %v3989_v46 = vpop.eup %3988  ;;  %v4723_v50 = vld [vmem:[#allocation7 + $0x30] ss:$12 sps:$4 sm:$0xff]   ;;  %v4729_v47 = vld [vmem:[#allocation7 + $0x4c] ss:$12 sps:$4 sm:$0xff]  }
 0x13d   :  { %v352_v54 = vsub.f32 1.0, %v3989_v46  ;;  %v354_v56 = vmul.f32 0.0, %v3989_v46  ;;  %6361 = vst [vmem:[#allocation37_spill] sm:$0xff] %v4729_v47  ;;  %v4739_v46 = vld [vmem:[#allocation7 + $0x64] ss:$12 sps:$4 sm:$0xff]  }
 0x13e   :  { %v350_v52 = vadd.f32 %v349_v51, %v75_v48  ;;  %v4725_v48 = vld [vmem:[#allocation7 + $0x38] ss:$12 sps:$4 sm:$0xff]   ;;  %v4733_v51 = vld [vmem:[#allocation7 + $0x48] ss:$12 sps:$4 sm:$0xff]   ;;  %6364 = vst [vmem:[#allocation40_spill] sm:$0xff] %v4739_v46 }
 0x13f   :  { %6362 = vst [vmem:[#allocation38_spill] sm:$0xff] %v4733_v51 }
 0x140   :  { %3990 = vtanh.f32 %v350_v52  ;;  %v4735_v52 = vld [vmem:[#allocation7 + $0x50] ss:$12 sps:$4 sm:$0xff]  }
 0x141   :  { %6363 = vst [vmem:[#allocation39_spill] sm:$0xff] %v4735_v52 }
 0x14a   :  { %v3991_v45 = vpop.eup %3990 }
 0x14b   :  { %v353_v55 = vmul.f32 %v3991_v45, %v352_v54  ;;  %v4743_v54 = vld [vmem:[#allocation7 + $0x60] ss:$12 sps:$4 sm:$0xff]   ;;  %v4745_v45 = vld [vmem:[#allocation7 + $0x68] ss:$12 sps:$4 sm:$0xff]  }
 0x14c   :  { %6365 = vst [vmem:[#allocation41_spill] sm:$0xff] %v4743_v54  ;;  %6366 = vst [vmem:[#allocation42_spill] sm:$0xff] %v4745_v45 }
 0x14d   :  { %v4694_v57 = vadd.f32 %v354_v56, %v353_v55  ;;  %v4749_v55 = vld [vmem:[#allocation7 + $0x7c] ss:$12 sps:$4 sm:$0xff]   ;;  %v4753_v56 = vld [vmem:[#allocation7 + $0x78] ss:$12 sps:$4 sm:$0xff]  }
 0x14e   :  { %6367 = vst [vmem:[#allocation43_spill] sm:$0xff] %v4749_v55 }
 0x14f   :  { %v4702_v49 = vpack.c.bf16 %v4694_v57, %v4694_v57 }
 0x151   :  { %567 = vmatmul.mubr.bf16.vlgmr.msra.gmra.mrb[4].mxu0 %v4702_v49  ;;  %3371 = vmatmul.mubr.bf16.vlgmr.msra.gmra.mrb[4].mxu1 %v4702_v49 }
 0x152   :  { %794 = vmatpush1.bf16.msra.mxu0 %v4696_v61  ;;  %3375 = vmatpush3.bf16.msra.mxu1 %v4698_v62 }
 0x153   :  { %795 = vmatprep.subr.bf16.mxu0 %v4704_v63  ;;  %3376 = vmatprep.subr.bf16.mxu1 %v6359_v2 }
 0x154   :  { %825 = vmatprep.mubr.bf16.mxu0 %v6360_v26  ;;  %3390 = vmatprep.mubr.msk.bf16.mxu1 %vm4344_vm0, %v6359_v2 }
 0x156   :  { %796 = vmatpush1.bf16.msra.mxu0 %v4710_v0  ;;  %3377 = vmatpush3.bf16.msra.mxu1 %v4712_v53 }
 0x157   :  { %797 = vmatprep.subr.bf16.mxu0 %v4716_v1  ;;  %3378 = vmatprep.subr.bf16.mxu1 %v6359_v2 }
 0x15a   :  { %798 = vmatpush1.bf16.msra.mxu0 %v4723_v50  ;;  %3379 = vmatpush3.bf16.msra.mxu1 %v4725_v48 }
 0x15b   :  { %799 = vmatprep.subr.bf16.mxu0 %v4729_v47  ;;  %3380 = vmatprep.subr.bf16.mxu1 %v6359_v2  ;;  %v4755_v47 = vld [vmem:[#allocation7 + $0x80] ss:$12 sps:$4 sm:$0xff]  }
 0x15e   :  { %800 = vmatpush1.bf16.msra.mxu0 %v4733_v51  ;;  %3381 = vmatpush3.bf16.msra.mxu1 %v4735_v52  ;;  %v4759_v52 = vld [vmem:[#allocation7 + $0x94] ss:$12 sps:$4 sm:$0xff]   ;;  %v4765_v51 = vld [vmem:[#allocation7 + $0x98] ss:$12 sps:$4 sm:$0xff]  }
 0x15f   :  { %801 = vmatprep.subr.bf16.mxu0 %v4739_v46  ;;  %3382 = vmatprep.subr.bf16.mxu1 %v6359_v2  ;;  %6368 = vst [vmem:[#allocation44_spill] sm:$0xff] %v4759_v52  ;;  %v4763_v46 = vld [vmem:[#allocation7 + $0x90] ss:$12 sps:$4 sm:$0xff]  }
 0x162   :  { %802 = vmatpush1.bf16.msra.mxu0 %v4743_v54  ;;  %3383 = vmatpush3.bf16.msra.mxu1 %v4745_v45  ;;  %v4769_v45 = vld [vmem:[#allocation7 + $0xac] ss:$12 sps:$4 sm:$0xff]   ;;  %v4775_v54 = vld [vmem:[#allocation7 + $0xb0] ss:$12 sps:$4 sm:$0xff]  }
 0x163   :  { %803 = vmatprep.subr.bf16.mxu0 %v4749_v55  ;;  %3384 = vmatprep.subr.bf16.mxu1 %v6359_v2  ;;  %v4773_v55 = vld [vmem:[#allocation7 + $0xa8] ss:$12 sps:$4 sm:$0xff]  }
 0x166   :  { %804 = vmatpush1.bf16.msra.mxu0 %v4753_v56  ;;  %3385 = vmatpush3.bf16.msra.mxu1 %v4755_v47 }
 0x167   :  { %805 = vmatprep.subr.bf16.mxu0 %v4759_v52  ;;  %3386 = vmatprep.subr.bf16.mxu1 %v6359_v2  ;;  %v6369_v52 = vmov 0.0|0.0  }
 0x16a   :  { %806 = vmatpush1.bf16.msra.mxu0 %v4763_v46  ;;  %3387 = vmatpush3.bf16.msra.mxu1 %v4765_v51 }
 0x16b   :  { %807 = vmatprep.subr.bf16.mxu0 %v4769_v45  ;;  %3388 = vmatprep.subr.bf16.mxu1 %v6359_v2 }
 0x16e   :  { %808 = vmatpush1.bf16.msra.mxu0 %v4773_v55  ;;  %3389 = vmatpush3.bf16.msra.mxu1 %v4775_v54 }
 0x16f   :  { %901 = vmatprep.subr.bf16.mxu0 %v4430_v3  ;;  %3394 = vmatprep.subr.bf16.mxu1 %v6359_v2  ;;  %v6370_v3 = vld [vmem:[#allocation26_spill] sm:$0xff] }
 0x171   :  { %826 = vmatmul.mubr.bf16.vlgmr.msra.gmra.mrb[4].mxu0 %v6369_v52  ;;  %3391 = vmatmul.mubr.bf16.vlgmr.msra.gmra.mrb[8].mxu1 %v6369_v52  ;;  %v6376_v52 = vld [vmem:[#allocation32_spill] sm:$0xff] }
 0x172   :  { %902 = vmatpush1.bf16.msra.mxu0 %v4435_v4  ;;  %3395 = vmatpush3.bf16.msra.mxu1 %v4470_v10  ;;  %v6371_v4 = vld [vmem:[#allocation27_spill] sm:$0xff] }
 0x173   :  { %903 = vmatprep.subr.bf16.mxu0 %v4441_v5  ;;  %3396 = vmatprep.subr.bf16.mxu1 %v6359_v2  ;;  %v6372_v5 = vld [vmem:[#allocation28_spill] sm:$0xff] }
 0x174   :  { %933 = vmatprep.mubr.bf16.mxu0 %v6360_v26  ;;  %3410 = vmatprep.mubr.msk.bf16.mxu1 %vm4344_vm0, %v6359_v2 }
 0x176   :  { %904 = vmatpush1.bf16.msra.mxu0 %v4447_v6  ;;  %3397 = vmatpush3.bf16.msra.mxu1 %v4488_v13  ;;  %v6373_v6 = vld [vmem:[#allocation29_spill] sm:$0xff] }
 0x177   :  { %905 = vmatprep.subr.bf16.mxu0 %v4453_v7  ;;  %3398 = vmatprep.subr.bf16.mxu1 %v6359_v2  ;;  %v6374_v7 = vld [vmem:[#allocation30_spill] sm:$0xff] }
 0x17a   :  { %906 = vmatpush1.bf16.msra.mxu0 %v4459_v8  ;;  %3399 = vmatpush3.bf16.msra.mxu1 %v4507_v16 }
 0x17b   :  { %907 = vmatprep.subr.bf16.mxu0 %v4465_v9  ;;  %3400 = vmatprep.subr.bf16.mxu1 %v6359_v2 }
 0x17e   :  { %908 = vmatpush1.bf16.msra.mxu0 %v4476_v11  ;;  %3401 = vmatpush3.bf16.msra.mxu1 %v4524_v19 }
 0x17f   :  { %909 = vmatprep.subr.bf16.mxu0 %v4481_v12  ;;  %3402 = vmatprep.subr.bf16.mxu1 %v6359_v2 }
 0x182   :  { %910 = vmatpush1.bf16.msra.mxu0 %v4494_v14  ;;  %3403 = vmatpush3.bf16.msra.mxu1 %v4542_v22 }
 0x183   :  { %911 = vmatprep.subr.bf16.mxu0 %v4500_v15  ;;  %3404 = vmatprep.subr.bf16.mxu1 %v6359_v2 }
 0x186   :  { %912 = vmatpush1.bf16.msra.mxu0 %v4513_v17  ;;  %3405 = vmatpush3.bf16.msra.mxu1 %v4556_v24 }
 0x187   :  { %913 = vmatprep.subr.bf16.mxu0 %v4518_v18  ;;  %3406 = vmatprep.subr.bf16.mxu1 %v6359_v2 }
 0x18a   :  { %914 = vmatpush1.bf16.msra.mxu0 %v4531_v20  ;;  %3407 = vmatpush3.bf16.msra.mxu1 %v4565_v25 }
 0x18b   :  { %915 = vmatprep.subr.bf16.mxu0 %v4537_v21  ;;  %3408 = vmatprep.subr.bf16.mxu1 %v6359_v2 }
 0x18e   :  { %916 = vmatpush1.bf16.msra.mxu0 %v4550_v23  ;;  %3409 = vmatpush3.bf16.msra.mxu1 %v4574_v27 }
 0x18f   :  { %1004 = vmatprep.subr.bf16.mxu0 %v4584_v28  ;;  %3414 = vmatprep.subr.bf16.mxu1 %v6359_v2 }
 0x191   :  { %934 = vmatmul.mubr.bf16.vlgmr.msra.gmra.mrb[8].mxu0 %v4702_v49  ;;  %3411 = vmatmul.mubr.bf16.vlgmr.msra.gmra.mrb[12].mxu1 %v4702_v49  ;;  %v6375_v49 = vld [vmem:[#allocation31_spill] sm:$0xff] }
 0x192   :  { %1005 = vmatpush1.bf16.msra.mxu0 %v4586_v29  ;;  %3415 = vmatpush3.bf16.msra.mxu1 %v4588_v30 }
 0x193   :  { %1006 = vmatprep.subr.bf16.mxu0 %v4593_v31  ;;  %3416 = vmatprep.subr.bf16.mxu1 %v6359_v2 }
 0x194   :  { %1036 = vmatprep.mubr.bf16.mxu0 %v6360_v26  ;;  %3430 = vmatprep.mubr.msk.bf16.mxu1 %vm4344_vm0, %v6359_v2 }
 0x196   :  { %1007 = vmatpush1.bf16.msra.mxu0 %v4596_v32  ;;  %3417 = vmatpush3.bf16.msra.mxu1 %v4598_v33 }
 0x197   :  { %1008 = vmatprep.subr.bf16.mxu0 %v4603_v34  ;;  %3418 = vmatprep.subr.bf16.mxu1 %v6359_v2 }
 0x19a   :  { %1009 = vmatpush1.bf16.msra.mxu0 %v4606_v35  ;;  %3419 = vmatpush3.bf16.msra.mxu1 %v4608_v36 }
 0x19b   :  { %1010 = vmatprep.subr.bf16.mxu0 %v4613_v37  ;;  %3420 = vmatprep.subr.bf16.mxu1 %v6359_v2 }
 0x19e   :  { %1011 = vmatpush1.bf16.msra.mxu0 %v4616_v38  ;;  %3421 = vmatpush3.bf16.msra.mxu1 %v4618_v39 }
 0x19f   :  { %1012 = vmatprep.subr.bf16.mxu0 %v4623_v40  ;;  %3422 = vmatprep.subr.bf16.mxu1 %v6359_v2  ;;  %v6380_v40 = vld [vmem:[#allocation36_spill] sm:$0xff] }
 0x1a2   :  { %1013 = vmatpush1.bf16.msra.mxu0 %v4626_v41  ;;  %3423 = vmatpush3.bf16.msra.mxu1 %v4628_v42  ;;  %v6378_v42 = vld [vmem:[#allocation34_spill] sm:$0xff] }
 0x1a3   :  { %1014 = vmatprep.subr.bf16.mxu0 %v4631_v43  ;;  %3424 = vmatprep.subr.bf16.mxu1 %v6359_v2  ;;  %v6377_v43 = vld [vmem:[#allocation33_spill] sm:$0xff] }
 0x1a6   :  { %1015 = vmatpush1.bf16.msra.mxu0 %v6370_v3  ;;  %3425 = vmatpush3.bf16.msra.mxu1 %v6371_v4 }
 0x1a7   :  { %1016 = vmatprep.subr.bf16.mxu0 %v6372_v5  ;;  %3426 = vmatprep.subr.bf16.mxu1 %v6359_v2 }
 0x1aa   :  { %1017 = vmatpush1.bf16.msra.mxu0 %v6373_v6  ;;  %3427 = vmatpush3.bf16.msra.mxu1 %v6374_v7  ;;  %v648_v7 = vld [vmem:[%s6187_s6] sm:$0x7] }
 0x1ab   :  { %1018 = vmatprep.subr.bf16.mxu0 %v6375_v49  ;;  %3428 = vmatprep.subr.bf16.mxu1 %v6359_v2  ;;  %v389_v49 = vld [vmem:[%s6186_s5] sm:$0x7]  ;;  %v657_v39 = vrot.slane %v648_v7, %v6380_v40 }
 0x1ac   :  { %v6379_v6 = vld [vmem:[#allocation35_spill] sm:$0xff] }
 0x1ae   :  { %1019 = vmatpush1.bf16.msra.mxu0 %v6376_v52  ;;  %3429 = vmatpush3.bf16.msra.mxu1 %v6377_v43  ;;  %v394_v52 = vrot.slane %v389_v49, %v6379_v6  ;;  %v653_v43 = vrot.slane %v648_v7, %v6379_v6 }
 0x1af   :  { %1086 = vmatprep.subr.bf16.mxu0 %v6378_v42  ;;  %3434 = vmatprep.subr.bf16.mxu1 %v6359_v2  ;;  %v398_v42 = vrot.slane %v389_v49, %v6380_v40 }
 0x1b0   :  { %v4867_v38 = vadd.f32 %v653_v43, %v394_v52  ;;  %v4877_v52 = vrot.slane %v389_v49, %v4685_v44 }
 0x1b2   :  { %6381 = vst [vmem:[#allocation35_spill] sm:$0xff] %v4867_v38  ;;  %6384 = vst [vmem:[#allocation46_spill] sm:$0xff] %v4877_v52 }
 0x224   :  { %v609_v4 = vpop.f32.mrb[4].mxu1 }
 0x225   :  { %v3372_v5 = vpop.f32.mrb[5].mxu1 }
 0x226   :  { %v612_v3 = vpop.f32.mrb[6].mxu1 }
 0x227   :  { %v3373_v41 = vpop.f32.mrb[7].mxu1 }
 0x228   :  { %v4869_v41 = vadd.f32 %v657_v39, %v398_v42  ;;  %v4874_v39 = vrot.slane %v648_v7, %v4685_v44 }
 0x22a   :  { %6382 = vst [vmem:[#allocation36_spill] sm:$0xff] %v4869_v41  ;;  %6383 = vst [vmem:[#allocation45_spill] sm:$0xff] %v4874_v39 }
 0x244   :  { %v827_v3 = vpop.f32.mrb[4].mxu0  ;;  %v868_v5 = vpop.f32.mrb[8].mxu1 }
 0x245   :  { %v3815_v37 = vadd.f32 %v4867_v38, %v827_v3  ;;  %v829_v36 = vpop.f32.mrb[5].mxu0  ;;  %v3392_v35 = vpop.f32.mrb[9].mxu1 }
 0x246   :  { %v831_v34 = vpop.f32.mrb[6].mxu0  ;;  %v871_v33 = vpop.f32.mrb[10].mxu1  ;;  %v3817_v6 = vadd.f32 %v4869_v41, %v829_v36 }
 0x247   :  { %v3070_v32 = vmul.f32 -1.442695, %v3815_v37  ;;  %v832_v31 = vpop.f32.mrb[7].mxu0  ;;  %v3393_v30 = vpop.f32.mrb[11].mxu1  ;;  %v869_v33 = vadd.f32 %v868_v5, %v4874_v39 }
 0x248   :  { %v3071_v29 = vmul.f32 -1.442695, %v3817_v6  ;;  %v3072_v30 = vld [vmem:[%s6181_s0 + $0xc] sm:$0xff] }
 0x249   :  { %3992 = vpow2.f32 %v3070_v32  ;;  %v898_v36 = vunpack.c.l.bf16 %v3072_v30  ;;  %v899_v6 = vunpack.c.h.bf16 %v3072_v30 }
 0x24a   :  { %3994 = vpow2.f32 %v3071_v29  ;;  %v610_v29 = vadd.f32 %v609_v4, %v4877_v52 }
 0x253   :  { %v3993_v40 = vpop.eup %3992 }
 0x254   :  { %v878_v43 = vadd.f32 1.0, %v3993_v40  ;;  %v3995_v42 = vpop.eup %3994 }
 0x255   :  { %v885_v34 = vadd.f32 1.0, %v3995_v42 }
 0x256   :  { %3996 = vrcp.f32 %v878_v43 }
 0x257   :  { %3998 = vrcp.f32 %v885_v34 }
 0x260   :  { %v3997_v31 = vpop.eup %3996 }
 0x261   :  { %v888_v32 = vmul.f32 %v3997_v31, %v869_v33  ;;  %v3999_v33 = vpop.eup %3998 }
 0x262   :  { %v893_v52 = vmul.f32 0.0, %v3999_v33 }
 0x263   :  { %v889_v35 = vadd.f32 %v888_v32, %v610_v29  ;;  %v891_v29 = vsub.f32 1.0, %v3999_v33 }
 0x264   :  { %v935_v37 = vpop.f32.mrb[8].mxu0  ;;  %v976_v7 = vpop.f32.mrb[12].mxu1 }
 0x265   :  { %4000 = vtanh.f32 %v889_v35  ;;  %v936_v44 = vadd.f32 %v935_v37, %v4678_v59  ;;  %v937_v49 = vpop.f32.mrb[9].mxu0  ;;  %v3412_v3 = vpop.f32.mrb[13].mxu1 }
 0x266   :  { %v938_v5 = vadd.f32 %v937_v49, %v4681_v60  ;;  %v939_v40 = vpop.f32.mrb[10].mxu0  ;;  %v979_v43 = vpop.f32.mrb[14].mxu1 }
 0x267   :  { %v982_v42 = vadd.f32 %v936_v44, %v898_v36  ;;  %v940_v39 = vpop.f32.mrb[11].mxu0  ;;  %v3413_v41 = vpop.f32.mrb[15].mxu1  ;;  %v977_v44 = vadd.f32 %v976_v7, %v4688_v58  ;;  %v6386_v7 = vld [vmem:[#allocation38_spill] sm:$0xff] }
 0x268   :  { %v989_v34 = vadd.f32 %v938_v5, %v899_v6  ;;  %v4891_v41 = vld [vmem:[%s6181_s0 + $0x14] ss:$12 sps:$4 sm:$0xff]  }
 0x269   :  { %v3074_v4 = vmul.f32 -1.442695, %v982_v42  ;;  %v900_v36 = vunpack.c.l.bf16 %v4891_v41 }
 0x26a   :  { %v3075_v31 = vmul.f32 -1.442695, %v989_v34 }
 0x26b   :  { %4002 = vpow2.f32 %v3074_v4 }
 0x26c   :  { %4004 = vpow2.f32 %v3075_v31 }
 0x26f   :  { %v4001_v32 = vpop.eup %4000 }
 0x270   :  { %v892_v35 = vmul.f32 %v4001_v32, %v891_v29  ;;  %v6387_v29 = vld [vmem:[#allocation39_spill] sm:$0xff]  ;;  %v6388_v32 = vld [vmem:[#allocation40_spill] sm:$0xff] }
 0x272   :  { %v4886_v37 = vadd.f32 %v893_v52, %v892_v35  ;;  %v6389_v35 = vld [vmem:[#allocation41_spill] sm:$0xff] }
 0x275   :  { %v4003_v30 = vpop.eup %4002 }
 0x276   :  { %v986_v3 = vadd.f32 1.0, %v4003_v30  ;;  %v4005_v49 = vpop.eup %4004  ;;  %v6390_v30 = vld [vmem:[#allocation42_spill] sm:$0xff] }
 0x277   :  { %v993_v39 = vadd.f32 1.0, %v4005_v49  ;;  %v6392_v49 = vld [vmem:[#allocation44_spill] sm:$0xff] }
 0x278   :  { %4006 = vrcp.f32 %v986_v3  ;;  %v6391_v3 = vld [vmem:[#allocation43_spill] sm:$0xff] }
 0x279   :  { %4008 = vrcp.f32 %v993_v39  ;;  %v1085_v39 = vpack.c.bf16 %v4886_v37, %v4886_v37 }
 0x282   :  { %v4007_v6 = vpop.eup %4006 }
 0x283   :  { %v996_v5 = vmul.f32 %v4007_v6, %v977_v44  ;;  %v4009_v52 = vpop.eup %4008  ;;  %v4949_v44 = vld [vmem:[%s6182_s1] ss:$12 sps:$4 sm:$0xff]   ;;  %v4956_v6 = vld [vmem:[%s6182_s1 + $0x1c] ss:$12 sps:$4 sm:$0xff]  }
 0x284   :  { %v999_v43 = vsub.f32 1.0, %v4009_v52  ;;  %v1001_v34 = vmul.f32 %v4009_v52, %v4694_v57  ;;  %v6385_v57 = vld [vmem:[#allocation37_spill] sm:$0xff]  ;;  %v6413_v52 = vld [vmem:[#allocation31_spill] sm:$0xff] }
 0x285   :  { %v997_v40 = vadd.f32 %v996_v5, %v900_v36  ;;  %v4942_v36 = vld [vmem:[%s6182_s1 + $0x4] ss:$12 sps:$4 sm:$0xff]  }
 0x286   :  { %v4966_v5 = vld [vmem:[%s6182_s1 + $0x18] ss:$12 sps:$4 sm:$0xff]  }
 0x287   :  { %4010 = vtanh.f32 %v997_v40  ;;  %v6412_v40 = vld [vmem:[#allocation30_spill] sm:$0xff] }
 0x291   :  { %v4011_v42 = vpop.eup %4010 }
 0x292   :  { %v1000_v4 = vmul.f32 %v4011_v42, %v999_v43  ;;  %v6414_v43 = vld [vmem:[#allocation32_spill] sm:$0xff]  ;;  %v6415_v42 = vld [vmem:[#allocation33_spill] sm:$0xff] }
 0x294   :  { %v4896_v33 = vadd.f32 %v1001_v34, %v1000_v4  ;;  %v6416_v4 = vld [vmem:[#allocation34_spill] sm:$0xff] }
 0x296   :  { %v4900_v31 = vpack.c.bf16 %v4896_v33, %v4896_v33 }
 0x298   :  { %1037 = vmatmul.mubr.bf16.vlgmr.msra.gmra.mrb[12].mxu0 %v4900_v31  ;;  %3431 = vmatmul.mubr.bf16.vlgmr.msra.gmra.mrb[16].mxu1 %v4900_v31 }
 0x299   :  { %1087 = vmatpush1.bf16.msra.mxu0 %v4696_v61  ;;  %3435 = vmatpush3.bf16.msra.mxu1 %v4698_v62 }
 0x29a   :  { %1088 = vmatprep.subr.bf16.mxu0 %v4704_v63  ;;  %3436 = vmatprep.subr.bf16.mxu1 %v6359_v2 }
 0x29b   :  { %1118 = vmatprep.mubr.bf16.mxu0 %v6360_v26  ;;  %3450 = vmatprep.mubr.msk.bf16.mxu1 %vm4344_vm0, %v6359_v2 }
 0x29d   :  { %1089 = vmatpush1.bf16.msra.mxu0 %v4710_v0  ;;  %3437 = vmatpush3.bf16.msra.mxu1 %v4712_v53 }
 0x29e   :  { %1090 = vmatprep.subr.bf16.mxu0 %v4716_v1  ;;  %3438 = vmatprep.subr.bf16.mxu1 %v6359_v2 }
 0x2a1   :  { %1091 = vmatpush1.bf16.msra.mxu0 %v4723_v50  ;;  %3439 = vmatpush3.bf16.msra.mxu1 %v4725_v48 }
 0x2a2   :  { %1092 = vmatprep.subr.bf16.mxu0 %v6385_v57  ;;  %3440 = vmatprep.subr.bf16.mxu1 %v6359_v2 }
 0x2a5   :  { %1093 = vmatpush1.bf16.msra.mxu0 %v6386_v7  ;;  %3441 = vmatpush3.bf16.msra.mxu1 %v6387_v29 }
 0x2a6   :  { %1094 = vmatprep.subr.bf16.mxu0 %v6388_v32  ;;  %3442 = vmatprep.subr.bf16.mxu1 %v6359_v2 }
 0x2a9   :  { %1095 = vmatpush1.bf16.msra.mxu0 %v6389_v35  ;;  %3443 = vmatpush3.bf16.msra.mxu1 %v6390_v30 }
 0x2aa   :  { %1096 = vmatprep.subr.bf16.mxu0 %v6391_v3  ;;  %3444 = vmatprep.subr.bf16.mxu1 %v6359_v2 }
 0x2ad   :  { %1097 = vmatpush1.bf16.msra.mxu0 %v4753_v56  ;;  %3445 = vmatpush3.bf16.msra.mxu1 %v4755_v47 }
 0x2ae   :  { %1098 = vmatprep.subr.bf16.mxu0 %v6392_v49  ;;  %3446 = vmatprep.subr.bf16.mxu1 %v6359_v2 }
 0x2b1   :  { %1099 = vmatpush1.bf16.msra.mxu0 %v4763_v46  ;;  %3447 = vmatpush3.bf16.msra.mxu1 %v4765_v51 }
 0x2b2   :  { %1100 = vmatprep.subr.bf16.mxu0 %v4769_v45  ;;  %3448 = vmatprep.subr.bf16.mxu1 %v6359_v2 }
 0x2b5   :  { %1101 = vmatpush1.bf16.msra.mxu0 %v4773_v55  ;;  %3449 = vmatpush3.bf16.msra.mxu1 %v4775_v54 }
 0x2b6   :  { %1194 = vmatprep.subr.bf16.mxu0 %v4942_v36  ;;  %3454 = vmatprep.subr.bf16.mxu1 %v6359_v2 }
 0x2b8   :  { %1119 = vmatmul.mubr.bf16.vlgmr.msra.gmra.mrb[12].mxu0 %v1085_v39  ;;  %3451 = vmatmul.mubr.bf16.vlgmr.msra.gmra.mrb[20].mxu1 %v1085_v39 }
 0x2b9   :  { %1195 = vmatpush1.bf16.msra.mxu0 %v4949_v44  ;;  %3455 = vmatpush3.bf16.msra.mxu1 %v4470_v10  ;;  %v4973_v10 = vld [vmem:[%s6182_s1 + $0x34] ss:$12 sps:$4 sm:$0xff]  }
 0x2ba   :  { %1196 = vmatprep.subr.bf16.mxu0 %v4956_v6  ;;  %3456 = vmatprep.subr.bf16.mxu1 %v6359_v2 }
 0x2bb   :  { %1226 = vmatprep.mubr.bf16.mxu0 %v6360_v26  ;;  %3470 = vmatprep.mubr.msk.bf16.mxu1 %vm4344_vm0, %v6359_v2 }
 0x2bd   :  { %1197 = vmatpush1.bf16.msra.mxu0 %v4966_v5  ;;  %3457 = vmatpush3.bf16.msra.mxu1 %v4488_v13  ;;  %v6397_v13 = vld [vmem:[#allocation15_spill] sm:$0xff] }
 0x2be   :  { %1198 = vmatprep.subr.bf16.mxu0 %v4973_v10  ;;  %3458 = vmatprep.subr.bf16.mxu1 %v6359_v2 }
 0x2c1   :  { %1199 = vmatpush1.bf16.msra.mxu0 %v4459_v8  ;;  %3459 = vmatpush3.bf16.msra.mxu1 %v4507_v16  ;;  %v6393_v8 = vld [vmem:[#allocation11_spill] sm:$0xff]  ;;  %v6400_v16 = vld [vmem:[#allocation18_spill] sm:$0xff] }
 0x2c2   :  { %1200 = vmatprep.subr.bf16.mxu0 %v4465_v9  ;;  %3460 = vmatprep.subr.bf16.mxu1 %v6359_v2  ;;  %v6394_v9 = vld [vmem:[#allocation12_spill] sm:$0xff] }
 0x2c5   :  { %1201 = vmatpush1.bf16.msra.mxu0 %v4476_v11  ;;  %3461 = vmatpush3.bf16.msra.mxu1 %v4524_v19  ;;  %v6395_v11 = vld [vmem:[#allocation13_spill] sm:$0xff] }
 0x2c6   :  { %1202 = vmatprep.subr.bf16.mxu0 %v4481_v12  ;;  %3462 = vmatprep.subr.bf16.mxu1 %v6359_v2  ;;  %v6396_v12 = vld [vmem:[#allocation14_spill] sm:$0xff]  ;;  %v6403_v19 = vld [vmem:[#allocation21_spill] sm:$0xff] }
 0x2c9   :  { %1203 = vmatpush1.bf16.msra.mxu0 %v4494_v14  ;;  %3463 = vmatpush3.bf16.msra.mxu1 %v4542_v22  ;;  %v6398_v14 = vld [vmem:[#allocation16_spill] sm:$0xff] }
 0x2ca   :  { %1204 = vmatprep.subr.bf16.mxu0 %v4500_v15  ;;  %3464 = vmatprep.subr.bf16.mxu1 %v6359_v2  ;;  %v6399_v15 = vld [vmem:[#allocation17_spill] sm:$0xff]  ;;  %v6406_v22 = vld [vmem:[#allocation24_spill] sm:$0xff] }
 0x2cd   :  { %1205 = vmatpush1.bf16.msra.mxu0 %v4513_v17  ;;  %3465 = vmatpush3.bf16.msra.mxu1 %v4556_v24  ;;  %v6401_v17 = vld [vmem:[#allocation19_spill] sm:$0xff]  ;;  %v6408_v24 = vld [vmem:[#allocation26_spill] sm:$0xff] }
 0x2ce   :  { %1206 = vmatprep.subr.bf16.mxu0 %v4518_v18  ;;  %3466 = vmatprep.subr.bf16.mxu1 %v6359_v2  ;;  %v6402_v18 = vld [vmem:[#allocation20_spill] sm:$0xff] }
 0x2d1   :  { %1207 = vmatpush1.bf16.msra.mxu0 %v4531_v20  ;;  %3467 = vmatpush3.bf16.msra.mxu1 %v4565_v25  ;;  %v6404_v20 = vld [vmem:[#allocation22_spill] sm:$0xff]  ;;  %v6409_v25 = vld [vmem:[#allocation27_spill] sm:$0xff] }
 0x2d2   :  { %1208 = vmatprep.subr.bf16.mxu0 %v4537_v21  ;;  %3468 = vmatprep.subr.bf16.mxu1 %v6359_v2  ;;  %v6405_v21 = vld [vmem:[#allocation23_spill] sm:$0xff] }
 0x2d5   :  { %1209 = vmatpush1.bf16.msra.mxu0 %v4550_v23  ;;  %3469 = vmatpush3.bf16.msra.mxu1 %v4574_v27  ;;  %v6407_v23 = vld [vmem:[#allocation25_spill] sm:$0xff]  ;;  %v6410_v27 = vld [vmem:[#allocation28_spill] sm:$0xff] }
 0x2d6   :  { %1297 = vmatprep.subr.bf16.mxu0 %v4584_v28  ;;  %3474 = vmatprep.subr.bf16.mxu1 %v6359_v2  ;;  %v6411_v28 = vld [vmem:[#allocation29_spill] sm:$0xff] }
 0x2d8   :  { %1227 = vmatmul.mubr.bf16.vlgmr.msra.gmra.mrb[16].mxu0 %v4900_v31  ;;  %3471 = vmatmul.mubr.bf16.vlgmr.msra.gmra.mrb[24].mxu1 %v4900_v31 }
 0x2d9   :  { %1298 = vmatpush1.bf16.msra.mxu0 %v6393_v8  ;;  %3475 = vmatpush3.bf16.msra.mxu1 %v6394_v9 }
 0x2da   :  { %1299 = vmatprep.subr.bf16.mxu0 %v6395_v11  ;;  %3476 = vmatprep.subr.bf16.mxu1 %v6359_v2 }
 0x2db   :  { %1329 = vmatprep.mubr.bf16.mxu0 %v6360_v26  ;;  %3490 = vmatprep.mubr.msk.bf16.mxu1 %vm4344_vm0, %v6359_v2 }
 0x2dd   :  { %1300 = vmatpush1.bf16.msra.mxu0 %v6396_v12  ;;  %3477 = vmatpush3.bf16.msra.mxu1 %v6397_v13 }
 0x2de   :  { %1301 = vmatprep.subr.bf16.mxu0 %v6398_v14  ;;  %3478 = vmatprep.subr.bf16.mxu1 %v6359_v2 }
 0x2e1   :  { %1302 = vmatpush1.bf16.msra.mxu0 %v6399_v15  ;;  %3479 = vmatpush3.bf16.msra.mxu1 %v6400_v16 }
 0x2e2   :  { %1303 = vmatprep.subr.bf16.mxu0 %v6401_v17  ;;  %3480 = vmatprep.subr.bf16.mxu1 %v6359_v2 }
 0x2e5   :  { %1304 = vmatpush1.bf16.msra.mxu0 %v6402_v18  ;;  %3481 = vmatpush3.bf16.msra.mxu1 %v6403_v19 }
 0x2e6   :  { %1305 = vmatprep.subr.bf16.mxu0 %v6404_v20  ;;  %3482 = vmatprep.subr.bf16.mxu1 %v6359_v2  ;;  %v6417_v20 = vld [vmem:[#allocation36_spill] sm:$0xff] }
 0x2e9   :  { %1306 = vmatpush1.bf16.msra.mxu0 %v6405_v21  ;;  %3483 = vmatpush3.bf16.msra.mxu1 %v6406_v22 }
 0x2ea   :  { %1307 = vmatprep.subr.bf16.mxu0 %v6407_v23  ;;  %3484 = vmatprep.subr.bf16.mxu1 %v6359_v2 }
 0x2ed   :  { %1308 = vmatpush1.bf16.msra.mxu0 %v6408_v24  ;;  %3485 = vmatpush3.bf16.msra.mxu1 %v6409_v25 }
 0x2ee   :  { %1309 = vmatprep.subr.bf16.mxu0 %v6410_v27  ;;  %3486 = vmatprep.subr.bf16.mxu1 %v6359_v2 }
 0x2f1   :  { %1310 = vmatpush1.bf16.msra.mxu0 %v6411_v28  ;;  %3487 = vmatpush3.bf16.msra.mxu1 %v6412_v40  ;;  %v6418_v28 = vld [vmem:[#allocation45_spill] sm:$0xff] }
 0x2f2   :  { %1311 = vmatprep.subr.bf16.mxu0 %v6413_v52  ;;  %3488 = vmatprep.subr.bf16.mxu1 %v6359_v2 }
 0x2f5   :  { %1312 = vmatpush1.bf16.msra.mxu0 %v6414_v43  ;;  %3489 = vmatpush3.bf16.msra.mxu1 %v6415_v42  ;;  %v3078_v43 = vld [vmem:[%s6181_s0 + $0x18] sm:$0xff] }
 0x2f6   :  { %1379 = vmatprep.subr.bf16.mxu0 %v6416_v4  ;;  %3494 = vmatprep.subr.bf16.mxu1 %v6359_v2  ;;  %v6419_v42 = vld [vmem:[#allocation46_spill] sm:$0xff] }
 0x36b   :  { %v1079_v34 = vpop.f32.mrb[16].mxu1 }
 0x36c   :  { %v3432_v31 = vpop.f32.mrb[17].mxu1  ;;  %v1080_v4 = vadd.f32 %v1079_v34, %v6419_v42 }
 0x36d   :  { %v1082_v39 = vpop.f32.mrb[18].mxu1 }
 0x36e   :  { %v3433_v8 = vpop.f32.mrb[19].mxu1 }
 0x36f   :  { %v1191_v8 = vunpack.c.l.bf16 %v3078_v43 }
 0x38b   :  { %v1120_v9 = vpop.f32.mrb[12].mxu0  ;;  %v1161_v11 = vpop.f32.mrb[20].mxu1 }
 0x38c   :  { %v3819_v12 = vadd.f32 %v4867_v38, %v1120_v9  ;;  %v1122_v13 = vpop.f32.mrb[13].mxu0  ;;  %v3452_v14 = vpop.f32.mrb[21].mxu1  ;;  %v1162_v40 = vadd.f32 %v1161_v11, %v6418_v28 }
 0x38d   :  { %v1124_v15 = vpop.f32.mrb[14].mxu0  ;;  %v1164_v16 = vpop.f32.mrb[22].mxu1  ;;  %v3821_v21 = vadd.f32 %v6417_v20, %v1122_v13 }
 0x38e   :  { %v3076_v17 = vmul.f32 -1.442695, %v3819_v12  ;;  %v1125_v18 = vpop.f32.mrb[15].mxu0  ;;  %v3453_v19 = vpop.f32.mrb[23].mxu1  ;;  %v1192_v16 = vunpack.c.h.bf16 %v3078_v43 }
 0x38f   :  { %v3077_v22 = vmul.f32 -1.442695, %v3821_v21 }
 0x390   :  { %4012 = vpow2.f32 %v3076_v17 }
 0x391   :  { %4014 = vpow2.f32 %v3077_v22 }
 0x39a   :  { %v4013_v23 = vpop.eup %4012 }
 0x39b   :  { %v1171_v24 = vadd.f32 1.0, %v4013_v23  ;;  %v4015_v25 = vpop.eup %4014 }
 0x39c   :  { %v1178_v27 = vadd.f32 1.0, %v4015_v25 }
 0x39d   :  { %4016 = vrcp.f32 %v1171_v24 }
 0x39e   :  { %4018 = vrcp.f32 %v1178_v27 }
 0x3a7   :  { %v4017_v52 = vpop.eup %4016 }
 0x3a8   :  { %v1181_v31 = vmul.f32 %v4017_v52, %v1162_v40  ;;  %v4019_v24 = vpop.eup %4018 }
 0x3a9   :  { %v1184_v27 = vsub.f32 1.0, %v4019_v24 }
 0x3aa   :  { %v1182_v39 = vadd.f32 %v1181_v31, %v1080_v4  ;;  %v1186_v4 = vmul.f32 %v4019_v24, %v4886_v37  ;;  %v5255_v24 = vld [vmem:[#allocation5 + $0x30] ss:$12 sps:$4 sm:$0xff]  }
 0x3ab   :  { %v1228_v9 = vpop.f32.mrb[16].mxu0  ;;  %v1269_v12 = vpop.f32.mrb[24].mxu1  ;;  %6430 = vst [vmem:[#allocation13_spill] sm:$0xff] %v5255_v24 }
 0x3ac   :  { %4020 = vtanh.f32 %v1182_v39  ;;  %v1229_v13 = vadd.f32 %v1228_v9, %v4678_v59  ;;  %v1230_v14 = vpop.f32.mrb[17].mxu0  ;;  %v3472_v15 = vpop.f32.mrb[25].mxu1 }
 0x3ad   :  { %v1231_v11 = vadd.f32 %v1230_v14, %v4681_v60  ;;  %v1232_v17 = vpop.f32.mrb[18].mxu0  ;;  %v1272_v18 = vpop.f32.mrb[26].mxu1  ;;  %v1270_v14 = vadd.f32 %v1269_v12, %v4688_v58  ;;  %v5248_v12 = vld [vmem:[#allocation5 + $0x20] ss:$12 sps:$4 sm:$0xff]  }
 0x3ae   :  { %v1275_v19 = vadd.f32 %v1229_v13, %v1191_v8  ;;  %v1233_v21 = vpop.f32.mrb[19].mxu0  ;;  %v3473_v22 = vpop.f32.mrb[27].mxu1  ;;  %v1193_v13 = vunpack.c.h.bf16 %v4891_v41  ;;  %v5198_v41 = vld [vmem:[%s6182_s1 + $0x90] ss:$12 sps:$4 sm:$0xff]   ;;  %6428 = vst [vmem:[#allocation11_spill] sm:$0xff] %v5248_v12 }
 0x3af   :  { %v1282_v23 = vadd.f32 %v1231_v11, %v1192_v16 }
 0x3b0   :  { %v3080_v34 = vmul.f32 -1.442695, %v1275_v19 }
 0x3b1   :  { %v3081_v25 = vmul.f32 -1.442695, %v1282_v23  ;;  %v5251_v23 = vld [vmem:[#allocation5 + $0x34] ss:$12 sps:$4 sm:$0xff]  }
 0x3b2   :  { %4022 = vpow2.f32 %v3080_v34  ;;  %6429 = vst [vmem:[#allocation12_spill] sm:$0xff] %v5251_v23 }
 0x3b3   :  { %4024 = vpow2.f32 %v3081_v25  ;;  %v5258_v25 = vld [vmem:[#allocation5 + $0x38] ss:$12 sps:$4 sm:$0xff]  }
 0x3b4   :  { %6431 = vst [vmem:[#allocation14_spill] sm:$0xff] %v5258_v25 }
 0x3b6   :  { %v4021_v40 = vpop.eup %4020 }
 0x3b7   :  { %v1185_v52 = vmul.f32 %v4021_v40, %v1184_v27  ;;  %v5261_v27 = vld [vmem:[#allocation5 + $0x4c] ss:$12 sps:$4 sm:$0xff]   ;;  %v5265_v40 = vld [vmem:[#allocation5 + $0x48] ss:$12 sps:$4 sm:$0xff]  }
 0x3b8   :  { %6432 = vst [vmem:[#allocation15_spill] sm:$0xff] %v5261_v27  ;;  %6433 = vst [vmem:[#allocation16_spill] sm:$0xff] %v5265_v40 }
 0x3b9   :  { %v5048_v31 = vadd.f32 %v1186_v4, %v1185_v52  ;;  %v5268_v52 = vld [vmem:[#allocation5 + $0x50] ss:$12 sps:$4 sm:$0xff]  }
 0x3ba   :  { %6434 = vst [vmem:[#allocation17_spill] sm:$0xff] %v5268_v52  ;;  %v5271_v4 = vld [vmem:[#allocation5 + $0x64] ss:$12 sps:$4 sm:$0xff]  }
 0x3bb   :  { %6435 = vst [vmem:[#allocation18_spill] sm:$0xff] %v5271_v4 }
 0x3bc   :  { %v4023_v43 = vpop.eup %4022 }
 0x3bd   :  { %v1279_v39 = vadd.f32 1.0, %v4023_v43  ;;  %v4025_v9 = vpop.eup %4024  ;;  %v5275_v43 = vld [vmem:[#allocation5 + $0x60] ss:$12 sps:$4 sm:$0xff]  }
 0x3be   :  { %v1286_v8 = vadd.f32 1.0, %v4025_v9  ;;  %6436 = vst [vmem:[#allocation19_spill] sm:$0xff] %v5275_v43  ;;  %v5281_v9 = vld [vmem:[#allocation5 + $0x7c] ss:$12 sps:$4 sm:$0xff]  }
 0x3bf   :  { %4026 = vrcp.f32 %v1279_v39  ;;  %v5278_v39 = vld [vmem:[#allocation5 + $0x68] ss:$12 sps:$4 sm:$0xff]   ;;  %6438 = vst [vmem:[#allocation21_spill] sm:$0xff] %v5281_v9 }
 0x3c0   :  { %4028 = vrcp.f32 %v1286_v8  ;;  %6437 = vst [vmem:[#allocation20_spill] sm:$0xff] %v5278_v39  ;;  %v5285_v8 = vld [vmem:[#allocation5 + $0x78] ss:$12 sps:$4 sm:$0xff]  }
 0x3c1   :  { %6439 = vst [vmem:[#allocation22_spill] sm:$0xff] %v5285_v8 }
 0x3c9   :  { %v4027_v15 = vpop.eup %4026 }
 0x3ca   :  { %v1289_v16 = vmul.f32 %v4027_v15, %v1270_v14  ;;  %v4029_v17 = vpop.eup %4028  ;;  %v5291_v14 = vld [vmem:[#allocation5 + $0x94] ss:$12 sps:$4 sm:$0xff]   ;;  %v5295_v15 = vld [vmem:[#allocation5 + $0x90] ss:$12 sps:$4 sm:$0xff]  }
 0x3cb   :  { %v1292_v18 = vsub.f32 1.0, %v4029_v17  ;;  %v1294_v21 = vmul.f32 %v4029_v17, %v4896_v33  ;;  %v5204_v33 = vld [vmem:[%s6182_s1 + $0x98] ss:$12 sps:$4 sm:$0xff]   ;;  %6441 = vst [vmem:[#allocation24_spill] sm:$0xff] %v5291_v14  ;;  %6442 = vst [vmem:[#allocation25_spill] sm:$0xff] %v5295_v15 }
 0x3cc   :  { %v1290_v11 = vadd.f32 %v1289_v16, %v1193_v13  ;;  %v5288_v13 = vld [vmem:[#allocation5 + $0x80] ss:$12 sps:$4 sm:$0xff]   ;;  %v5298_v16 = vld [vmem:[#allocation5 + $0x98] ss:$12 sps:$4 sm:$0xff]   ;;  %v5305_v17 = vld [vmem:[#allocation5 + $0xa8] ss:$12 sps:$4 sm:$0xff]  }
 0x3cd   :  { %6440 = vst [vmem:[#allocation23_spill] sm:$0xff] %v5288_v13  ;;  %6443 = vst [vmem:[#allocation26_spill] sm:$0xff] %v5298_v16 }
 0x3ce   :  { %4030 = vtanh.f32 %v1290_v11  ;;  %v5301_v11 = vld [vmem:[#allocation5 + $0xac] ss:$12 sps:$4 sm:$0xff]   ;;  %6445 = vst [vmem:[#allocation28_spill] sm:$0xff] %v5305_v17 }
 0x3cf   :  { %6444 = vst [vmem:[#allocation27_spill] sm:$0xff] %v5301_v11 }
 0x3d8   :  { %v4031_v37 = vpop.eup %4030 }
 0x3d9   :  { %v1293_v19 = vmul.f32 %v4031_v37, %v1292_v18  ;;  %v5308_v18 = vld [vmem:[#allocation5 + $0xb0] ss:$12 sps:$4 sm:$0xff]  }
 0x3da   :  { %6446 = vst [vmem:[#allocation29_spill] sm:$0xff] %v5308_v18  ;;  %v5311_v37 = vld [vmem:[#allocation7 + $0x4] ss:$12 sps:$4 sm:$0xff]  }
 0x3db   :  { %v5053_v22 = vadd.f32 %v1294_v21, %v1293_v19  ;;  %6447 = vst [vmem:[#allocation30_spill] sm:$0xff] %v5311_v37 }
 0x3dd   :  { %v5057_v34 = vpack.c.bf16 %v5053_v22, %v5053_v22 }
 0x3df   :  { %1330 = vmatmul.mubr.bf16.vlgmr.msra.gmra.mrb[20].mxu0 %v5057_v34  ;;  %3491 = vmatmul.mubr.bf16.vlgmr.msra.gmra.mrb[28].mxu1 %v5057_v34 }
 0x3e0   :  { %1380 = vmatpush1.bf16.msra.mxu0 %v4696_v61  ;;  %3495 = vmatpush3.bf16.msra.mxu1 %v4698_v62  ;;  %v1378_v61 = vpack.c.bf16 %v5048_v31, %v5048_v31  ;;  %v5102_v62 = vld [vmem:[%s6182_s1 + $0x8] ss:$12 sps:$4 sm:$0xff]  }
 0x3e1   :  { %1381 = vmatprep.subr.bf16.mxu0 %v4704_v63  ;;  %3496 = vmatprep.subr.bf16.mxu1 %v6359_v2  ;;  %v5114_v63 = vld [vmem:[%s6182_s1 + $0x20] ss:$12 sps:$4 sm:$0xff]  }
 0x3e2   :  { %1411 = vmatprep.mubr.bf16.mxu0 %v6360_v26  ;;  %3510 = vmatprep.mubr.msk.bf16.mxu1 %vm4344_vm0, %v6359_v2 }
 0x3e4   :  { %1382 = vmatpush1.bf16.msra.mxu0 %v4710_v0  ;;  %3497 = vmatpush3.bf16.msra.mxu1 %v4712_v53  ;;  %v5122_v0 = vld [vmem:[%s6182_s1 + $0x30] ss:$12 sps:$4 sm:$0xff]   ;;  %v5128_v53 = vld [vmem:[%s6182_s1 + $0x38] ss:$12 sps:$4 sm:$0xff]  }
 0x3e5   :  { %1383 = vmatprep.subr.bf16.mxu0 %v4716_v1  ;;  %3498 = vmatprep.subr.bf16.mxu1 %v6359_v2  ;;  %v5134_v1 = vld [vmem:[%s6182_s1 + $0x4c] ss:$12 sps:$4 sm:$0xff]  }
 0x3e8   :  { %1384 = vmatpush1.bf16.msra.mxu0 %v4723_v50  ;;  %3499 = vmatpush3.bf16.msra.mxu1 %v4725_v48  ;;  %v5141_v50 = vld [vmem:[%s6182_s1 + $0x48] ss:$12 sps:$4 sm:$0xff]   ;;  %v5147_v48 = vld [vmem:[%s6182_s1 + $0x50] ss:$12 sps:$4 sm:$0xff]  }
 0x3e9   :  { %1385 = vmatprep.subr.bf16.mxu0 %v6385_v57  ;;  %3500 = vmatprep.subr.bf16.mxu1 %v6359_v2  ;;  %v5210_v57 = vld [vmem:[%s6182_s1 + $0xac] ss:$12 sps:$4 sm:$0xff]  }
 0x3ea   :  { %6420 = vst [vmem:[#allocation37_spill] sm:$0xff] %v5210_v57 }
 0x3ec   :  { %1386 = vmatpush1.bf16.msra.mxu0 %v6386_v7  ;;  %3501 = vmatpush3.bf16.msra.mxu1 %v6387_v29  ;;  %v5217_v7 = vld [vmem:[%s6182_s1 + $0xa8] ss:$12 sps:$4 sm:$0xff]   ;;  %v5223_v29 = vld [vmem:[%s6182_s1 + $0xb0] ss:$12 sps:$4 sm:$0xff]  }
 0x3ed   :  { %1387 = vmatprep.subr.bf16.mxu0 %v6388_v32  ;;  %3502 = vmatprep.subr.bf16.mxu1 %v6359_v2  ;;  %6421 = vst [vmem:[#allocation38_spill] sm:$0xff] %v5217_v7  ;;  %6422 = vst [vmem:[#allocation39_spill] sm:$0xff] %v5223_v29  ;;  %v5226_v32 = vld [vmem:[#allocation5 + $0x4] ss:$12 sps:$4 sm:$0xff]  }
 0x3ee   :  { %6423 = vst [vmem:[#allocation40_spill] sm:$0xff] %v5226_v32 }
 0x3f0   :  { %1388 = vmatpush1.bf16.msra.mxu0 %v6389_v35  ;;  %3503 = vmatpush3.bf16.msra.mxu1 %v6390_v30  ;;  %v5232_v35 = vld [vmem:[#allocation5] ss:$12 sps:$4 sm:$0xff]   ;;  %v5235_v30 = vld [vmem:[#allocation5 + $0x8] ss:$12 sps:$4 sm:$0xff]  }
 0x3f1   :  { %1389 = vmatprep.subr.bf16.mxu0 %v6391_v3  ;;  %3504 = vmatprep.subr.bf16.mxu1 %v6359_v2  ;;  %6424 = vst [vmem:[#allocation41_spill] sm:$0xff] %v5232_v35  ;;  %6425 = vst [vmem:[#allocation42_spill] sm:$0xff] %v5235_v30  ;;  %v5238_v3 = vld [vmem:[#allocation5 + $0x1c] ss:$12 sps:$4 sm:$0xff]  }
 0x3f2   :  { %6426 = vst [vmem:[#allocation43_spill] sm:$0xff] %v5238_v3 }
 0x3f4   :  { %1390 = vmatpush1.bf16.msra.mxu0 %v4753_v56  ;;  %3505 = vmatpush3.bf16.msra.mxu1 %v4755_v47  ;;  %v5153_v47 = vld [vmem:[%s6182_s1 + $0x64] ss:$12 sps:$4 sm:$0xff]   ;;  %v5191_v56 = vld [vmem:[%s6182_s1 + $0x94] ss:$12 sps:$4 sm:$0xff]  }
 0x3f5   :  { %1391 = vmatprep.subr.bf16.mxu0 %v6392_v49  ;;  %3506 = vmatprep.subr.bf16.mxu1 %v6359_v2  ;;  %v5245_v49 = vld [vmem:[#allocation5 + $0x18] ss:$12 sps:$4 sm:$0xff]  }
 0x3f6   :  { %6427 = vst [vmem:[#allocation44_spill] sm:$0xff] %v5245_v49 }
 0x3f8   :  { %1392 = vmatpush1.bf16.msra.mxu0 %v4763_v46  ;;  %3507 = vmatpush3.bf16.msra.mxu1 %v4765_v51  ;;  %v5160_v51 = vld [vmem:[%s6182_s1 + $0x60] ss:$12 sps:$4 sm:$0xff]   ;;  %v5166_v46 = vld [vmem:[%s6182_s1 + $0x68] ss:$12 sps:$4 sm:$0xff]  }
 0x3f9   :  { %1393 = vmatprep.subr.bf16.mxu0 %v4769_v45  ;;  %3508 = vmatprep.subr.bf16.mxu1 %v6359_v2  ;;  %v5179_v45 = vld [vmem:[%s6182_s1 + $0x78] ss:$12 sps:$4 sm:$0xff]  }
 0x3fc   :  { %1394 = vmatpush1.bf16.msra.mxu0 %v4773_v55  ;;  %3509 = vmatpush3.bf16.msra.mxu1 %v4775_v54  ;;  %v5172_v54 = vld [vmem:[%s6182_s1 + $0x7c] ss:$12 sps:$4 sm:$0xff]   ;;  %v5185_v55 = vld [vmem:[%s6182_s1 + $0x80] ss:$12 sps:$4 sm:$0xff]  }
 0x3fd   :  { %1487 = vmatprep.subr.bf16.mxu0 %v4942_v36  ;;  %3514 = vmatprep.subr.bf16.mxu1 %v6359_v2 }
 0x3ff   :  { %1412 = vmatmul.mubr.bf16.vlgmr.msra.gmra.mrb[20].mxu0 %v1378_v61  ;;  %3511 = vmatmul.mubr.bf16.vlgmr.msra.gmra.mrb[32].mxu1 %v1378_v61 }
 0x400   :  { %1488 = vmatpush1.bf16.msra.mxu0 %v4949_v44  ;;  %3515 = vmatpush3.bf16.msra.mxu1 %v5102_v62 }
 0x401   :  { %1489 = vmatprep.subr.bf16.mxu0 %v4956_v6  ;;  %3516 = vmatprep.subr.bf16.mxu1 %v6359_v2 }
 0x402   :  { %1519 = vmatprep.mubr.bf16.mxu0 %v6360_v26  ;;  %3530 = vmatprep.mubr.msk.bf16.mxu1 %vm4344_vm0, %v6359_v2 }
 0x404   :  { %1490 = vmatpush1.bf16.msra.mxu0 %v4966_v5  ;;  %3517 = vmatpush3.bf16.msra.mxu1 %v5114_v63 }
 0x405   :  { %1491 = vmatprep.subr.bf16.mxu0 %v4973_v10  ;;  %3518 = vmatprep.subr.bf16.mxu1 %v6359_v2 }
 0x408   :  { %1492 = vmatpush1.bf16.msra.mxu0 %v5122_v0  ;;  %3519 = vmatpush3.bf16.msra.mxu1 %v5128_v53 }
 0x409   :  { %1493 = vmatprep.subr.bf16.mxu0 %v5134_v1  ;;  %3520 = vmatprep.subr.bf16.mxu1 %v6359_v2 }
 0x40c   :  { %1494 = vmatpush1.bf16.msra.mxu0 %v5141_v50  ;;  %3521 = vmatpush3.bf16.msra.mxu1 %v5147_v48 }
 0x40d   :  { %1495 = vmatprep.subr.bf16.mxu0 %v5153_v47  ;;  %3522 = vmatprep.subr.bf16.mxu1 %v6359_v2 }
 0x410   :  { %1496 = vmatpush1.bf16.msra.mxu0 %v5160_v51  ;;  %3523 = vmatpush3.bf16.msra.mxu1 %v5166_v46 }
 0x411   :  { %1497 = vmatprep.subr.bf16.mxu0 %v5172_v54  ;;  %3524 = vmatprep.subr.bf16.mxu1 %v6359_v2 }
 0x414   :  { %1498 = vmatpush1.bf16.msra.mxu0 %v5179_v45  ;;  %3525 = vmatpush3.bf16.msra.mxu1 %v5185_v55 }
 0x415   :  { %1499 = vmatprep.subr.bf16.mxu0 %v5191_v56  ;;  %3526 = vmatprep.subr.bf16.mxu1 %v6359_v2 }
 0x418   :  { %1500 = vmatpush1.bf16.msra.mxu0 %v5198_v41  ;;  %3527 = vmatpush3.bf16.msra.mxu1 %v5204_v33 }
 0x419   :  { %1501 = vmatprep.subr.bf16.mxu0 %v5210_v57  ;;  %3528 = vmatprep.subr.bf16.mxu1 %v6359_v2 }
 0x41c   :  { %1502 = vmatpush1.bf16.msra.mxu0 %v5217_v7  ;;  %3529 = vmatpush3.bf16.msra.mxu1 %v5223_v29 }
 0x41d   :  { %1590 = vmatprep.subr.bf16.mxu0 %v5226_v32  ;;  %3534 = vmatprep.subr.bf16.mxu1 %v6359_v2 }
 0x41f   :  { %1520 = vmatmul.mubr.bf16.vlgmr.msra.gmra.mrb[24].mxu0 %v5057_v34  ;;  %3531 = vmatmul.mubr.bf16.vlgmr.msra.gmra.mrb[36].mxu1 %v5057_v34 }
 0x420   :  { %1591 = vmatpush1.bf16.msra.mxu0 %v5232_v35  ;;  %3535 = vmatpush3.bf16.msra.mxu1 %v5235_v30 }
 0x421   :  { %1592 = vmatprep.subr.bf16.mxu0 %v5238_v3  ;;  %3536 = vmatprep.subr.bf16.mxu1 %v6359_v2 }
 0x422   :  { %1622 = vmatprep.mubr.bf16.mxu0 %v6360_v26  ;;  %3550 = vmatprep.mubr.msk.bf16.mxu1 %vm4344_vm0, %v6359_v2 }
 0x424   :  { %1593 = vmatpush1.bf16.msra.mxu0 %v5245_v49  ;;  %3537 = vmatpush3.bf16.msra.mxu1 %v5248_v12 }
 0x425   :  { %1594 = vmatprep.subr.bf16.mxu0 %v5251_v23  ;;  %3538 = vmatprep.subr.bf16.mxu1 %v6359_v2 }
 0x428   :  { %1595 = vmatpush1.bf16.msra.mxu0 %v5255_v24  ;;  %3539 = vmatpush3.bf16.msra.mxu1 %v5258_v25 }
 0x429   :  { %1596 = vmatprep.subr.bf16.mxu0 %v5261_v27  ;;  %3540 = vmatprep.subr.bf16.mxu1 %v6359_v2 }
 0x42c   :  { %1597 = vmatpush1.bf16.msra.mxu0 %v5265_v40  ;;  %3541 = vmatpush3.bf16.msra.mxu1 %v5268_v52 }
 0x42d   :  { %1598 = vmatprep.subr.bf16.mxu0 %v5271_v4  ;;  %3542 = vmatprep.subr.bf16.mxu1 %v6359_v2 }
 0x430   :  { %1599 = vmatpush1.bf16.msra.mxu0 %v5275_v43  ;;  %3543 = vmatpush3.bf16.msra.mxu1 %v5278_v39 }
 0x431   :  { %1600 = vmatprep.subr.bf16.mxu0 %v5281_v9  ;;  %3544 = vmatprep.subr.bf16.mxu1 %v6359_v2 }
 0x434   :  { %1601 = vmatpush1.bf16.msra.mxu0 %v5285_v8  ;;  %3545 = vmatpush3.bf16.msra.mxu1 %v5288_v13 }
 0x435   :  { %1602 = vmatprep.subr.bf16.mxu0 %v5291_v14  ;;  %3546 = vmatprep.subr.bf16.mxu1 %v6359_v2 }
 0x438   :  { %1603 = vmatpush1.bf16.msra.mxu0 %v5295_v15  ;;  %3547 = vmatpush3.bf16.msra.mxu1 %v5298_v16 }
 0x439   :  { %1604 = vmatprep.subr.bf16.mxu0 %v5301_v11  ;;  %3548 = vmatprep.subr.bf16.mxu1 %v6359_v2 }
 0x43c   :  { %1605 = vmatpush1.bf16.msra.mxu0 %v5305_v17  ;;  %3549 = vmatpush3.bf16.msra.mxu1 %v5308_v18 }
 0x43d   :  { %1672 = vmatprep.subr.bf16.mxu0 %v5311_v37  ;;  %3554 = vmatprep.subr.bf16.mxu1 %v6359_v2 }
 0x4b2   :  { %v1372_v19 = vpop.f32.mrb[28].mxu1 }
 0x4b3   :  { %v3492_v21 = vpop.f32.mrb[29].mxu1 }
 0x4b4   :  { %v1375_v34 = vpop.f32.mrb[30].mxu1 }
 0x4b5   :  { %v3493_v61 = vpop.f32.mrb[31].mxu1 }
 0x4d2   :  { %v1413_v11 = vpop.f32.mrb[20].mxu0  ;;  %v1454_v16 = vpop.f32.mrb[32].mxu1 }
 0x4d3   :  { %v3823_v15 = vadd.f32 %v4867_v38, %v1413_v11  ;;  %v1415_v14 = vpop.f32.mrb[21].mxu0  ;;  %v3512_v17 = vpop.f32.mrb[33].mxu1  ;;  %v1455_v52 = vadd.f32 %v1454_v16, %v6418_v28 }
 0x4d4   :  { %v1417_v13 = vpop.f32.mrb[22].mxu0  ;;  %v1457_v8 = vpop.f32.mrb[34].mxu1  ;;  %v3825_v43 = vadd.f32 %v6417_v20, %v1415_v14 }
 0x4d5   :  { %v3082_v9 = vmul.f32 -1.442695, %v3823_v15  ;;  %v1418_v18 = vpop.f32.mrb[23].mxu0  ;;  %v3513_v39 = vpop.f32.mrb[35].mxu1  ;;  %v3084_v8 = vld [vmem:[%s6181_s0 + $0x24] sm:$0xff]  ;;  %v1373_v13 = vadd.f32 %v1372_v19, %v6419_v42 }
 0x4d6   :  { %v3083_v37 = vmul.f32 -1.442695, %v3825_v43 }
 0x4d7   :  { %4032 = vpow2.f32 %v3082_v9  ;;  %v1484_v9 = vunpack.c.l.bf16 %v3084_v8 }
 0x4d8   :  { %4034 = vpow2.f32 %v3083_v37  ;;  %v1485_v37 = vunpack.c.h.bf16 %v3084_v8 }
 0x4e1   :  { %v4033_v4 = vpop.eup %4032 }
 0x4e2   :  { %v1464_v21 = vadd.f32 1.0, %v4033_v4  ;;  %v4035_v34 = vpop.eup %4034 }
 0x4e3   :  { %v1471_v61 = vadd.f32 1.0, %v4035_v34 }
 0x4e4   :  { %4036 = vrcp.f32 %v1464_v21 }
 0x4e5   :  { %4038 = vrcp.f32 %v1471_v61 }
 0x4ee   :  { %v4037_v11 = vpop.eup %4036 }
 0x4ef   :  { %v1474_v39 = vmul.f32 %v4037_v11, %v1455_v52  ;;  %v4039_v61 = vpop.eup %4038 }
 0x4f1   :  { %v1475_v14 = vadd.f32 %v1474_v39, %v1373_v13  ;;  %v1477_v13 = vsub.f32 1.0, %v4039_v61 }
 0x4f2   :  { %v1521_v43 = vpop.f32.mrb[24].mxu0  ;;  %v1562_v15 = vpop.f32.mrb[36].mxu1 }
 0x4f3   :  { %4040 = vtanh.f32 %v1475_v14  ;;  %v1522_v4 = vadd.f32 %v1521_v43, %v4678_v59  ;;  %v1523_v17 = vpop.f32.mrb[25].mxu0  ;;  %v3532_v18 = vpop.f32.mrb[37].mxu1  ;;  %v1479_v43 = vmul.f32 %v4039_v61, %v5048_v31 }
 0x4f4   :  { %v1524_v16 = vadd.f32 %v1523_v17, %v4681_v60  ;;  %v1525_v21 = vpop.f32.mrb[26].mxu0  ;;  %v1565_v34 = vpop.f32.mrb[38].mxu1 }
 0x4f5   :  { %v1568_v28 = vadd.f32 %v1522_v4, %v1484_v9  ;;  %v1526_v20 = vpop.f32.mrb[27].mxu0  ;;  %v3533_v38 = vpop.f32.mrb[39].mxu1  ;;  %v1563_v9 = vadd.f32 %v1562_v15, %v4688_v58  ;;  %v5343_v15 = vld [vmem:[#allocation7] ss:$12 sps:$4 sm:$0xff]  }
 0x4f6   :  { %v1575_v52 = vadd.f32 %v1524_v16, %v1485_v37  ;;  %v5330_v38 = vld [vmem:[%s6181_s0 + $0x2c] ss:$12 sps:$4 sm:$0xff]  }
 0x4f7   :  { %v3086_v19 = vmul.f32 -1.442695, %v1568_v28  ;;  %v1486_v28 = vunpack.c.l.bf16 %v5330_v38 }
 0x4f8   :  { %v3087_v11 = vmul.f32 -1.442695, %v1575_v52 }
 0x4f9   :  { %4042 = vpow2.f32 %v3086_v19 }
 0x4fa   :  { %4044 = vpow2.f32 %v3087_v11 }
 0x4fd   :  { %v4041_v39 = vpop.eup %4040 }
 0x4fe   :  { %v1478_v14 = vmul.f32 %v4041_v39, %v1477_v13  ;;  %v5346_v39 = vld [vmem:[#allocation7 + $0x8] ss:$12 sps:$4 sm:$0xff]  }
 0x500   :  { %v5325_v18 = vadd.f32 %v1479_v43, %v1478_v14  ;;  %v5349_v14 = vld [vmem:[#allocation7 + $0x1c] ss:$12 sps:$4 sm:$0xff]   ;;  %v5359_v43 = vld [vmem:[#allocation7 + $0x20] ss:$12 sps:$4 sm:$0xff]  }
 0x503   :  { %v4043_v8 = vpop.eup %4042 }
 0x504   :  { %v1572_v17 = vadd.f32 1.0, %v4043_v8  ;;  %v4045_v21 = vpop.eup %4044  ;;  %v5362_v8 = vld [vmem:[#allocation7 + $0x34] ss:$12 sps:$4 sm:$0xff]  }
 0x505   :  { %v1579_v20 = vadd.f32 1.0, %v4045_v21  ;;  %v5369_v21 = vld [vmem:[#allocation7 + $0x38] ss:$12 sps:$4 sm:$0xff]  }
 0x506   :  { %4046 = vrcp.f32 %v1572_v17  ;;  %v5366_v17 = vld [vmem:[#allocation7 + $0x30] ss:$12 sps:$4 sm:$0xff]  }
 0x507   :  { %4048 = vrcp.f32 %v1579_v20  ;;  %v5372_v20 = vld [vmem:[#allocation7 + $0x4c] ss:$12 sps:$4 sm:$0xff]  }
 0x510   :  { %v4047_v4 = vpop.eup %4046 }
 0x511   :  { %v1582_v37 = vmul.f32 %v4047_v4, %v1563_v9  ;;  %v4049_v16 = vpop.eup %4048  ;;  %v5379_v9 = vld [vmem:[#allocation7 + $0x50] ss:$12 sps:$4 sm:$0xff]  }
 0x512   :  { %v1585_v34 = vsub.f32 1.0, %v4049_v16  ;;  %v1587_v61 = vmul.f32 %v4049_v16, %v5053_v22  ;;  %v5356_v22 = vld [vmem:[#allocation7 + $0x18] ss:$12 sps:$4 sm:$0xff]   ;;  %v5392_v16 = vld [vmem:[#allocation7 + $0x7c] ss:$12 sps:$4 sm:$0xff]  }
 0x513   :  { %v1583_v31 = vadd.f32 %v1582_v37, %v1486_v28  ;;  %v5376_v28 = vld [vmem:[#allocation7 + $0x48] ss:$12 sps:$4 sm:$0xff]   ;;  %v5382_v4 = vld [vmem:[#allocation7 + $0x64] ss:$12 sps:$4 sm:$0xff]   ;;  %v5386_v37 = vld [vmem:[#allocation7 + $0x60] ss:$12 sps:$4 sm:$0xff]  }
 0x514   :  { %6449 = vst [vmem:[#allocation32_spill] sm:$0xff] %v5392_v16 }
 0x515   :  { %4050 = vtanh.f32 %v1583_v31  ;;  %v5389_v31 = vld [vmem:[#allocation7 + $0x68] ss:$12 sps:$4 sm:$0xff]  }
 0x516   :  { %6448 = vst [vmem:[#allocation31_spill] sm:$0xff] %v5389_v31 }
 0x51f   :  { %v4051_v19 = vpop.eup %4050 }
 0x520   :  { %v1586_v52 = vmul.f32 %v4051_v19, %v1585_v34  ;;  %v5396_v34 = vld [vmem:[#allocation7 + $0x78] ss:$12 sps:$4 sm:$0xff]   ;;  %v5399_v19 = vld [vmem:[#allocation7 + $0x80] ss:$12 sps:$4 sm:$0xff]  }
 0x521   :  { %6450 = vst [vmem:[#allocation33_spill] sm:$0xff] %v5399_v19 }
 0x522   :  { %v5335_v11 = vadd.f32 %v1587_v61, %v1586_v52  ;;  %v5402_v52 = vld [vmem:[#allocation7 + $0x94] ss:$12 sps:$4 sm:$0xff]   ;;  %v5406_v61 = vld [vmem:[#allocation7 + $0x90] ss:$12 sps:$4 sm:$0xff]  }
 0x523   :  { %6451 = vst [vmem:[#allocation34_spill] sm:$0xff] %v5402_v52  ;;  %6452 = vst [vmem:[#allocation46_spill] sm:$0xff] %v5406_v61 }
 0x524   :  { %v5339_v13 = vpack.c.bf16 %v5335_v11, %v5335_v11 }
 0x526   :  { %1623 = vmatmul.mubr.bf16.vlgmr.msra.gmra.mrb[28].mxu0 %v5339_v13  ;;  %3551 = vmatmul.mubr.bf16.vlgmr.msra.gmra.mrb[40].mxu1 %v5339_v13 }
 0x527   :  { %1673 = vmatpush1.bf16.msra.mxu0 %v5343_v15  ;;  %3555 = vmatpush3.bf16.msra.mxu1 %v5346_v39 }
 0x528   :  { %1674 = vmatprep.subr.bf16.mxu0 %v5349_v14  ;;  %3556 = vmatprep.subr.bf16.mxu1 %v6359_v2 }
 0x529   :  { %1704 = vmatprep.mubr.bf16.mxu0 %v6360_v26  ;;  %3570 = vmatprep.mubr.msk.bf16.mxu1 %vm4344_vm0, %v6359_v2 }
 0x52b   :  { %1675 = vmatpush1.bf16.msra.mxu0 %v5356_v22  ;;  %3557 = vmatpush3.bf16.msra.mxu1 %v5359_v43 }
 0x52c   :  { %1676 = vmatprep.subr.bf16.mxu0 %v5362_v8  ;;  %3558 = vmatprep.subr.bf16.mxu1 %v6359_v2 }
 0x52f   :  { %1677 = vmatpush1.bf16.msra.mxu0 %v5366_v17  ;;  %3559 = vmatpush3.bf16.msra.mxu1 %v5369_v21 }
 0x530   :  { %1678 = vmatprep.subr.bf16.mxu0 %v5372_v20  ;;  %3560 = vmatprep.subr.bf16.mxu1 %v6359_v2 }
 0x533   :  { %1679 = vmatpush1.bf16.msra.mxu0 %v5376_v28  ;;  %3561 = vmatpush3.bf16.msra.mxu1 %v5379_v9 }
 0x534   :  { %1680 = vmatprep.subr.bf16.mxu0 %v5382_v4  ;;  %3562 = vmatprep.subr.bf16.mxu1 %v6359_v2 }
 0x537   :  { %1681 = vmatpush1.bf16.msra.mxu0 %v5386_v37  ;;  %3563 = vmatpush3.bf16.msra.mxu1 %v5389_v31  ;;  %v5412_v31 = vld [vmem:[#allocation7 + $0xac] ss:$12 sps:$4 sm:$0xff]  }
 0x538   :  { %1682 = vmatprep.subr.bf16.mxu0 %v5392_v16  ;;  %3564 = vmatprep.subr.bf16.mxu1 %v6359_v2  ;;  %v5409_v16 = vld [vmem:[#allocation7 + $0x98] ss:$12 sps:$4 sm:$0xff]  }
 0x53b   :  { %1683 = vmatpush1.bf16.msra.mxu0 %v5396_v34  ;;  %3565 = vmatpush3.bf16.msra.mxu1 %v5399_v19  ;;  %v5416_v19 = vld [vmem:[#allocation7 + $0xa8] ss:$12 sps:$4 sm:$0xff]  }
 0x53c   :  { %1684 = vmatprep.subr.bf16.mxu0 %v5402_v52  ;;  %3566 = vmatprep.subr.bf16.mxu1 %v6359_v2  ;;  %v5419_v52 = vld [vmem:[#allocation7 + $0xb0] ss:$12 sps:$4 sm:$0xff]  }
 0x53f   :  { %1685 = vmatpush1.bf16.msra.mxu0 %v5406_v61  ;;  %3567 = vmatpush3.bf16.msra.mxu1 %v5409_v16  ;;  %v1671_v61 = vpack.c.bf16 %v5325_v18, %v5325_v18 }
 0x540   :  { %1686 = vmatprep.subr.bf16.mxu0 %v5412_v31  ;;  %3568 = vmatprep.subr.bf16.mxu1 %v6359_v2 }
 0x543   :  { %1687 = vmatpush1.bf16.msra.mxu0 %v5416_v19  ;;  %3569 = vmatpush3.bf16.msra.mxu1 %v5419_v52 }
 0x544   :  { %1780 = vmatprep.subr.bf16.mxu0 %v4942_v36  ;;  %3574 = vmatprep.subr.bf16.mxu1 %v6359_v2  ;;  %v6453_v36 = vld [vmem:[#allocation17_spill] sm:$0xff] }
 0x546   :  { %1705 = vmatmul.mubr.bf16.vlgmr.msra.gmra.mrb[28].mxu0 %v1671_v61  ;;  %3571 = vmatmul.mubr.bf16.vlgmr.msra.gmra.mrb[44].mxu1 %v1671_v61  ;;  %v6459_v61 = vld [vmem:[#allocation23_spill] sm:$0xff] }
 0x547   :  { %1781 = vmatpush1.bf16.msra.mxu0 %v4949_v44  ;;  %3575 = vmatpush3.bf16.msra.mxu1 %v5102_v62  ;;  %v6454_v44 = vld [vmem:[#allocation18_spill] sm:$0xff] }
 0x548   :  { %1782 = vmatprep.subr.bf16.mxu0 %v4956_v6  ;;  %3576 = vmatprep.subr.bf16.mxu1 %v6359_v2  ;;  %v6455_v6 = vld [vmem:[#allocation19_spill] sm:$0xff] }
 0x549   :  { %1812 = vmatprep.mubr.bf16.mxu0 %v6360_v26  ;;  %3590 = vmatprep.mubr.msk.bf16.mxu1 %vm4344_vm0, %v6359_v2 }
 0x54b   :  { %1783 = vmatpush1.bf16.msra.mxu0 %v4966_v5  ;;  %3577 = vmatpush3.bf16.msra.mxu1 %v5114_v63  ;;  %v6456_v5 = vld [vmem:[#allocation20_spill] sm:$0xff] }
 0x54c   :  { %1784 = vmatprep.subr.bf16.mxu0 %v4973_v10  ;;  %3578 = vmatprep.subr.bf16.mxu1 %v6359_v2  ;;  %v6457_v10 = vld [vmem:[#allocation21_spill] sm:$0xff] }
 0x54f   :  { %1785 = vmatpush1.bf16.msra.mxu0 %v5122_v0  ;;  %3579 = vmatpush3.bf16.msra.mxu1 %v5128_v53 }
 0x550   :  { %1786 = vmatprep.subr.bf16.mxu0 %v5134_v1  ;;  %3580 = vmatprep.subr.bf16.mxu1 %v6359_v2 }
 0x553   :  { %1787 = vmatpush1.bf16.msra.mxu0 %v5141_v50  ;;  %3581 = vmatpush3.bf16.msra.mxu1 %v5147_v48 }
 0x554   :  { %1788 = vmatprep.subr.bf16.mxu0 %v5153_v47  ;;  %3582 = vmatprep.subr.bf16.mxu1 %v6359_v2 }
 0x557   :  { %1789 = vmatpush1.bf16.msra.mxu0 %v5160_v51  ;;  %3583 = vmatpush3.bf16.msra.mxu1 %v5166_v46 }
 0x558   :  { %1790 = vmatprep.subr.bf16.mxu0 %v5172_v54  ;;  %3584 = vmatprep.subr.bf16.mxu1 %v6359_v2 }
 0x55b   :  { %1791 = vmatpush1.bf16.msra.mxu0 %v5179_v45  ;;  %3585 = vmatpush3.bf16.msra.mxu1 %v5185_v55 }
 0x55c   :  { %1792 = vmatprep.subr.bf16.mxu0 %v5191_v56  ;;  %3586 = vmatprep.subr.bf16.mxu1 %v6359_v2 }
 0x55f   :  { %1793 = vmatpush1.bf16.msra.mxu0 %v5198_v41  ;;  %3587 = vmatpush3.bf16.msra.mxu1 %v5204_v33 }
 0x560   :  { %1794 = vmatprep.subr.bf16.mxu0 %v5210_v57  ;;  %3588 = vmatprep.subr.bf16.mxu1 %v6359_v2 }
 0x563   :  { %1795 = vmatpush1.bf16.msra.mxu0 %v5217_v7  ;;  %3589 = vmatpush3.bf16.msra.mxu1 %v5223_v29  ;;  %v6469_v7 = vld [vmem:[#allocation45_spill] sm:$0xff] }
 0x564   :  { %1883 = vmatprep.subr.bf16.mxu0 %v5226_v32  ;;  %3594 = vmatprep.subr.bf16.mxu1 %v6359_v2 }
 0x566   :  { %1813 = vmatmul.mubr.bf16.vlgmr.msra.gmra.mrb[32].mxu0 %v5339_v13  ;;  %3591 = vmatmul.mubr.bf16.vlgmr.msra.gmra.mrb[48].mxu1 %v5339_v13  ;;  %v6458_v13 = vld [vmem:[#allocation22_spill] sm:$0xff] }
 0x567   :  { %1884 = vmatpush1.bf16.msra.mxu0 %v5232_v35  ;;  %3595 = vmatpush3.bf16.msra.mxu1 %v5235_v30 }
 0x568   :  { %1885 = vmatprep.subr.bf16.mxu0 %v5238_v3  ;;  %3596 = vmatprep.subr.bf16.mxu1 %v6359_v2 }
 0x569   :  { %1915 = vmatprep.mubr.bf16.mxu0 %v6360_v26  ;;  %3610 = vmatprep.mubr.msk.bf16.mxu1 %vm4344_vm0, %v6359_v2 }
 0x56b   :  { %1886 = vmatpush1.bf16.msra.mxu0 %v5245_v49  ;;  %3597 = vmatpush3.bf16.msra.mxu1 %v5248_v12 }
 0x56c   :  { %1887 = vmatprep.subr.bf16.mxu0 %v5251_v23  ;;  %3598 = vmatprep.subr.bf16.mxu1 %v6359_v2  ;;  %v6467_v23 = vld [vmem:[#allocation35_spill] sm:$0xff] }
 0x56f   :  { %1888 = vmatpush1.bf16.msra.mxu0 %v5255_v24  ;;  %3599 = vmatpush3.bf16.msra.mxu1 %v5258_v25 }
 0x570   :  { %1889 = vmatprep.subr.bf16.mxu0 %v5261_v27  ;;  %3600 = vmatprep.subr.bf16.mxu1 %v6359_v2  ;;  %v6460_v27 = vld [vmem:[#allocation24_spill] sm:$0xff] }
 0x573   :  { %1890 = vmatpush1.bf16.msra.mxu0 %v5265_v40  ;;  %3601 = vmatpush3.bf16.msra.mxu1 %v6453_v36  ;;  %v6461_v36 = vld [vmem:[#allocation25_spill] sm:$0xff]  ;;  %v6463_v40 = vld [vmem:[#allocation27_spill] sm:$0xff] }
 0x574   :  { %1891 = vmatprep.subr.bf16.mxu0 %v6454_v44  ;;  %3602 = vmatprep.subr.bf16.mxu1 %v6359_v2  ;;  %v6462_v44 = vld [vmem:[#allocation26_spill] sm:$0xff] }
 0x577   :  { %1892 = vmatpush1.bf16.msra.mxu0 %v6455_v6  ;;  %3603 = vmatpush3.bf16.msra.mxu1 %v6456_v5  ;;  %v6464_v5 = vld [vmem:[#allocation28_spill] sm:$0xff]  ;;  %v6466_v6 = vld [vmem:[#allocation30_spill] sm:$0xff] }
 0x578   :  { %1893 = vmatprep.subr.bf16.mxu0 %v6457_v10  ;;  %3604 = vmatprep.subr.bf16.mxu1 %v6359_v2  ;;  %v6465_v10 = vld [vmem:[#allocation29_spill] sm:$0xff] }
 0x57b   :  { %1894 = vmatpush1.bf16.msra.mxu0 %v6458_v13  ;;  %3605 = vmatpush3.bf16.msra.mxu1 %v6459_v61 }
 0x57c   :  { %1895 = vmatprep.subr.bf16.mxu0 %v6460_v27  ;;  %3606 = vmatprep.subr.bf16.mxu1 %v6359_v2 }
 0x57f   :  { %1896 = vmatpush1.bf16.msra.mxu0 %v6461_v36  ;;  %3607 = vmatpush3.bf16.msra.mxu1 %v6462_v44 }
 0x580   :  { %1897 = vmatprep.subr.bf16.mxu0 %v6463_v40  ;;  %3608 = vmatprep.subr.bf16.mxu1 %v6359_v2 }
 0x583   :  { %1898 = vmatpush1.bf16.msra.mxu0 %v6464_v5  ;;  %3609 = vmatpush3.bf16.msra.mxu1 %v6465_v10  ;;  %v6468_v10 = vld [vmem:[#allocation36_spill] sm:$0xff] }
 0x584   :  { %1965 = vmatprep.subr.bf16.mxu0 %v6466_v6  ;;  %3614 = vmatprep.subr.bf16.mxu1 %v6359_v2 }
 0x5f9   :  { %v1665_v61 = vpop.f32.mrb[40].mxu1 }
 0x5fa   :  { %v3552_v27 = vpop.f32.mrb[41].mxu1 }
 0x5fb   :  { %v1668_v13 = vpop.f32.mrb[42].mxu1 }
 0x5fc   :  { %v3553_v25 = vpop.f32.mrb[43].mxu1 }
 0x619   :  { %v1706_v24 = vpop.f32.mrb[28].mxu0  ;;  %v1747_v36 = vpop.f32.mrb[44].mxu1 }
 0x61a   :  { %v3827_v44 = vadd.f32 %v6467_v23, %v1706_v24  ;;  %v1708_v12 = vpop.f32.mrb[29].mxu0  ;;  %v3572_v40 = vpop.f32.mrb[45].mxu1  ;;  %v1748_v57 = vadd.f32 %v1747_v36, %v6469_v7 }
 0x61b   :  { %v1710_v49 = vpop.f32.mrb[30].mxu0  ;;  %v1750_v3 = vpop.f32.mrb[46].mxu1  ;;  %v3829_v32 = vadd.f32 %v6468_v10, %v1708_v12 }
 0x61c   :  { %v3088_v30 = vmul.f32 -1.442695, %v3827_v44  ;;  %v1711_v5 = vpop.f32.mrb[31].mxu0  ;;  %v3573_v35 = vpop.f32.mrb[47].mxu1  ;;  %v3090_v3 = vld [vmem:[%s6181_s0 + $0x30] sm:$0xff]  ;;  %v1666_v49 = vadd.f32 %v1665_v61, %v6419_v42 }
 0x61d   :  { %v3089_v6 = vmul.f32 -1.442695, %v3829_v32  ;;  %v1778_v5 = vunpack.c.h.bf16 %v3090_v3 }
 0x61e   :  { %4052 = vpow2.f32 %v3088_v30  ;;  %v1777_v30 = vunpack.c.l.bf16 %v3090_v3 }
 0x61f   :  { %4054 = vpow2.f32 %v3089_v6 }
 0x628   :  { %v4053_v29 = vpop.eup %4052 }
 0x629   :  { %v1757_v27 = vadd.f32 1.0, %v4053_v29  ;;  %v4055_v25 = vpop.eup %4054 }
 0x62a   :  { %v1764_v13 = vadd.f32 1.0, %v4055_v25 }
 0x62b   :  { %4056 = vrcp.f32 %v1757_v27 }
 0x62c   :  { %4058 = vrcp.f32 %v1764_v13 }
 0x635   :  { %v4057_v24 = vpop.eup %4056 }
 0x636   :  { %v1767_v35 = vmul.f32 %v4057_v24, %v1748_v57  ;;  %v4059_v13 = vpop.eup %4058 }
 0x638   :  { %v1768_v12 = vadd.f32 %v1767_v35, %v1666_v49  ;;  %v1770_v49 = vsub.f32 1.0, %v4059_v13 }
 0x639   :  { %v1814_v32 = vpop.f32.mrb[32].mxu0  ;;  %v1855_v40 = vpop.f32.mrb[48].mxu1 }
 0x63a   :  { %4060 = vtanh.f32 %v1768_v12  ;;  %v1815_v29 = vadd.f32 %v1814_v32, %v4678_v59  ;;  %v1816_v44 = vpop.f32.mrb[33].mxu0  ;;  %v3592_v6 = vpop.f32.mrb[49].mxu1  ;;  %v1772_v32 = vmul.f32 %v4059_v13, %v5325_v18 }
 0x63b   :  { %v1817_v36 = vadd.f32 %v1816_v44, %v4681_v60  ;;  %v1818_v27 = vpop.f32.mrb[34].mxu0  ;;  %v1858_v25 = vpop.f32.mrb[50].mxu1 }
 0x63c   :  { %v1861_v7 = vadd.f32 %v1815_v29, %v1777_v30  ;;  %v1819_v10 = vpop.f32.mrb[35].mxu0  ;;  %v3593_v23 = vpop.f32.mrb[51].mxu1 }
 0x63d   :  { %v1868_v57 = vadd.f32 %v1817_v36, %v1778_v5  ;;  %v1779_v23 = vunpack.c.h.bf16 %v5330_v38  ;;  %v6470_v38 = vld [vmem:[#allocation31_spill] sm:$0xff] }
 0x63e   :  { %v3092_v61 = vmul.f32 -1.442695, %v1861_v7  ;;  %v1856_v7 = vadd.f32 %v1855_v40, %v4688_v58  ;;  %v6472_v40 = vld [vmem:[#allocation33_spill] sm:$0xff] }
 0x63f   :  { %v3093_v24 = vmul.f32 -1.442695, %v1868_v57 }
 0x640   :  { %4062 = vpow2.f32 %v3092_v61 }
 0x641   :  { %4064 = vpow2.f32 %v3093_v24 }
 0x644   :  { %v4061_v35 = vpop.eup %4060 }
 0x645   :  { %v1771_v12 = vmul.f32 %v4061_v35, %v1770_v49  ;;  %v6473_v49 = vld [vmem:[#allocation34_spill] sm:$0xff] }
 0x646   :  { %v6474_v35 = vld [vmem:[#allocation46_spill] sm:$0xff] }
 0x647   :  { %v5508_v6 = vadd.f32 %v1772_v32, %v1771_v12  ;;  %v5559_v32 = vld [vmem:[%s6182_s1 + $0x4] ss:$12 sps:$4 sm:$0xff]  }
 0x649   :  { %v1964_v12 = vpack.c.bf16 %v5508_v6, %v5508_v6 }
 0x64a   :  { %v4063_v3 = vpop.eup %4062 }
 0x64b   :  { %v1865_v44 = vadd.f32 1.0, %v4063_v3  ;;  %v4065_v27 = vpop.eup %4064  ;;  %v5566_v3 = vld [vmem:[%s6182_s1] ss:$12 sps:$4 sm:$0xff]  }
 0x64c   :  { %v1872_v30 = vadd.f32 1.0, %v4065_v27  ;;  %v5583_v27 = vld [vmem:[%s6182_s1 + $0x18] ss:$12 sps:$4 sm:$0xff]  }
 0x64d   :  { %4066 = vrcp.f32 %v1865_v44  ;;  %v5573_v44 = vld [vmem:[%s6182_s1 + $0x1c] ss:$12 sps:$4 sm:$0xff]  }
 0x64e   :  { %4068 = vrcp.f32 %v1872_v30  ;;  %v6490_v30 = vld [vmem:[#allocation18_spill] sm:$0xff] }
 0x657   :  { %v4067_v10 = vpop.eup %4066 }
 0x658   :  { %v1875_v29 = vmul.f32 %v4067_v10, %v1856_v7  ;;  %v4069_v36 = vpop.eup %4068  ;;  %v6492_v7 = vld [vmem:[#allocation20_spill] sm:$0xff]  ;;  %v6493_v10 = vld [vmem:[#allocation21_spill] sm:$0xff] }
 0x659   :  { %v1878_v25 = vsub.f32 1.0, %v4069_v36  ;;  %v1880_v57 = vmul.f32 %v4069_v36, %v5335_v11  ;;  %v6471_v11 = vld [vmem:[#allocation32_spill] sm:$0xff] }
 0x65a   :  { %v1876_v5 = vadd.f32 %v1875_v29, %v1779_v23  ;;  %v6491_v23 = vld [vmem:[#allocation19_spill] sm:$0xff]  ;;  %v6494_v29 = vld [vmem:[#allocation22_spill] sm:$0xff]  ;;  %v6496_v36 = vld [vmem:[#allocation24_spill] sm:$0xff] }
 0x65c   :  { %4070 = vtanh.f32 %v1876_v5  ;;  %v6495_v5 = vld [vmem:[#allocation23_spill] sm:$0xff] }
 0x666   :  { %v4071_v18 = vpop.eup %4070 }
 0x667   :  { %v1879_v61 = vmul.f32 %v4071_v18, %v1878_v25  ;;  %v6497_v25 = vld [vmem:[#allocation25_spill] sm:$0xff]  ;;  %v6498_v18 = vld [vmem:[#allocation26_spill] sm:$0xff] }
 0x669   :  { %v5513_v13 = vadd.f32 %v1880_v57, %v1879_v61  ;;  %v6499_v61 = vld [vmem:[#allocation27_spill] sm:$0xff]  ;;  %v6500_v57 = vld [vmem:[#allocation28_spill] sm:$0xff] }
 0x66b   :  { %v5517_v24 = vpack.c.bf16 %v5513_v13, %v5513_v13 }
 0x66d   :  { %1916 = vmatmul.mubr.bf16.vlgmr.msra.gmra.mrb[36].mxu0 %v5517_v24  ;;  %3611 = vmatmul.mubr.bf16.vlgmr.msra.gmra.mrb[52].mxu1 %v5517_v24 }
 0x66e   :  { %1966 = vmatpush1.bf16.msra.mxu0 %v5343_v15  ;;  %3615 = vmatpush3.bf16.msra.mxu1 %v5346_v39 }
 0x66f   :  { %1967 = vmatprep.subr.bf16.mxu0 %v5349_v14  ;;  %3616 = vmatprep.subr.bf16.mxu1 %v6359_v2 }
 0x670   :  { %1997 = vmatprep.mubr.bf16.mxu0 %v6360_v26  ;;  %3630 = vmatprep.mubr.msk.bf16.mxu1 %vm4344_vm0, %v6359_v2 }
 0x672   :  { %1968 = vmatpush1.bf16.msra.mxu0 %v5356_v22  ;;  %3617 = vmatpush3.bf16.msra.mxu1 %v5359_v43 }
 0x673   :  { %1969 = vmatprep.subr.bf16.mxu0 %v5362_v8  ;;  %3618 = vmatprep.subr.bf16.mxu1 %v6359_v2 }
 0x676   :  { %1970 = vmatpush1.bf16.msra.mxu0 %v5366_v17  ;;  %3619 = vmatpush3.bf16.msra.mxu1 %v5369_v21 }
 0x677   :  { %1971 = vmatprep.subr.bf16.mxu0 %v5372_v20  ;;  %3620 = vmatprep.subr.bf16.mxu1 %v6359_v2 }
 0x67a   :  { %1972 = vmatpush1.bf16.msra.mxu0 %v5376_v28  ;;  %3621 = vmatpush3.bf16.msra.mxu1 %v5379_v9 }
 0x67b   :  { %1973 = vmatprep.subr.bf16.mxu0 %v5382_v4  ;;  %3622 = vmatprep.subr.bf16.mxu1 %v6359_v2 }
 0x67e   :  { %1974 = vmatpush1.bf16.msra.mxu0 %v5386_v37  ;;  %3623 = vmatpush3.bf16.msra.mxu1 %v6470_v38 }
 0x67f   :  { %1975 = vmatprep.subr.bf16.mxu0 %v6471_v11  ;;  %3624 = vmatprep.subr.bf16.mxu1 %v6359_v2 }
 0x682   :  { %1976 = vmatpush1.bf16.msra.mxu0 %v5396_v34  ;;  %3625 = vmatpush3.bf16.msra.mxu1 %v6472_v40 }
 0x683   :  { %1977 = vmatprep.subr.bf16.mxu0 %v6473_v49  ;;  %3626 = vmatprep.subr.bf16.mxu1 %v6359_v2 }
 0x686   :  { %1978 = vmatpush1.bf16.msra.mxu0 %v6474_v35  ;;  %3627 = vmatpush3.bf16.msra.mxu1 %v5409_v16 }
 0x687   :  { %1979 = vmatprep.subr.bf16.mxu0 %v5412_v31  ;;  %3628 = vmatprep.subr.bf16.mxu1 %v6359_v2 }
 0x68a   :  { %1980 = vmatpush1.bf16.msra.mxu0 %v5416_v19  ;;  %3629 = vmatpush3.bf16.msra.mxu1 %v5419_v52 }
 0x68b   :  { %2073 = vmatprep.subr.bf16.mxu0 %v5559_v32  ;;  %3634 = vmatprep.subr.bf16.mxu1 %v6359_v2 }
 0x68d   :  { %1998 = vmatmul.mubr.bf16.vlgmr.msra.gmra.mrb[36].mxu0 %v1964_v12  ;;  %3631 = vmatmul.mubr.bf16.vlgmr.msra.gmra.mrb[56].mxu1 %v1964_v12  ;;  %v6502_v12 = vld [vmem:[#allocation30_spill] sm:$0xff] }
 0x68e   :  { %2074 = vmatpush1.bf16.msra.mxu0 %v5566_v3  ;;  %3635 = vmatpush3.bf16.msra.mxu1 %v5102_v62  ;;  %v5590_v62 = vld [vmem:[%s6182_s1 + $0x34] ss:$12 sps:$4 sm:$0xff]  }
 0x68f   :  { %2075 = vmatprep.subr.bf16.mxu0 %v5573_v44  ;;  %3636 = vmatprep.subr.bf16.mxu1 %v6359_v2 }
 0x690   :  { %2105 = vmatprep.mubr.bf16.mxu0 %v6360_v26  ;;  %3650 = vmatprep.mubr.msk.bf16.mxu1 %vm4344_vm0, %v6359_v2 }
 0x692   :  { %2076 = vmatpush1.bf16.msra.mxu0 %v5583_v27  ;;  %3637 = vmatpush3.bf16.msra.mxu1 %v5114_v63  ;;  %v6475_v63 = vld [vmem:[#allocation37_spill] sm:$0xff] }
 0x693   :  { %2077 = vmatprep.subr.bf16.mxu0 %v5590_v62  ;;  %3638 = vmatprep.subr.bf16.mxu1 %v6359_v2 }
 0x696   :  { %2078 = vmatpush1.bf16.msra.mxu0 %v5122_v0  ;;  %3639 = vmatpush3.bf16.msra.mxu1 %v5128_v53  ;;  %v6476_v0 = vld [vmem:[#allocation38_spill] sm:$0xff]  ;;  %v6477_v53 = vld [vmem:[#allocation39_spill] sm:$0xff] }
 0x697   :  { %2079 = vmatprep.subr.bf16.mxu0 %v5134_v1  ;;  %3640 = vmatprep.subr.bf16.mxu1 %v6359_v2  ;;  %v6478_v1 = vld [vmem:[#allocation40_spill] sm:$0xff] }
 0x69a   :  { %2080 = vmatpush1.bf16.msra.mxu0 %v5141_v50  ;;  %3641 = vmatpush3.bf16.msra.mxu1 %v5147_v48  ;;  %v6479_v50 = vld [vmem:[#allocation41_spill] sm:$0xff]  ;;  %v6480_v48 = vld [vmem:[#allocation42_spill] sm:$0xff] }
 0x69b   :  { %2081 = vmatprep.subr.bf16.mxu0 %v5153_v47  ;;  %3642 = vmatprep.subr.bf16.mxu1 %v6359_v2  ;;  %v6481_v47 = vld [vmem:[#allocation43_spill] sm:$0xff] }
 0x69e   :  { %2082 = vmatpush1.bf16.msra.mxu0 %v5160_v51  ;;  %3643 = vmatpush3.bf16.msra.mxu1 %v5166_v46  ;;  %v6482_v51 = vld [vmem:[#allocation44_spill] sm:$0xff]  ;;  %v6483_v46 = vld [vmem:[#allocation11_spill] sm:$0xff] }
 0x69f   :  { %2083 = vmatprep.subr.bf16.mxu0 %v5172_v54  ;;  %3644 = vmatprep.subr.bf16.mxu1 %v6359_v2  ;;  %v6484_v54 = vld [vmem:[#allocation12_spill] sm:$0xff] }
 0x6a2   :  { %2084 = vmatpush1.bf16.msra.mxu0 %v5179_v45  ;;  %3645 = vmatpush3.bf16.msra.mxu1 %v5185_v55  ;;  %v6485_v45 = vld [vmem:[#allocation13_spill] sm:$0xff]  ;;  %v6486_v55 = vld [vmem:[#allocation14_spill] sm:$0xff] }
 0x6a3   :  { %2085 = vmatprep.subr.bf16.mxu0 %v5191_v56  ;;  %3646 = vmatprep.subr.bf16.mxu1 %v6359_v2  ;;  %v6487_v56 = vld [vmem:[#allocation15_spill] sm:$0xff] }
 0x6a6   :  { %2086 = vmatpush1.bf16.msra.mxu0 %v5198_v41  ;;  %3647 = vmatpush3.bf16.msra.mxu1 %v5204_v33  ;;  %v6488_v41 = vld [vmem:[#allocation16_spill] sm:$0xff]  ;;  %v6489_v33 = vld [vmem:[#allocation17_spill] sm:$0xff] }
 0x6a7   :  { %2087 = vmatprep.subr.bf16.mxu0 %v6475_v63  ;;  %3648 = vmatprep.subr.bf16.mxu1 %v6359_v2 }
 0x6aa   :  { %2088 = vmatpush1.bf16.msra.mxu0 %v6476_v0  ;;  %3649 = vmatpush3.bf16.msra.mxu1 %v6477_v53 }
 0x6ab   :  { %2176 = vmatprep.subr.bf16.mxu0 %v6478_v1  ;;  %3654 = vmatprep.subr.bf16.mxu1 %v6359_v2 }
 0x6ad   :  { %2106 = vmatmul.mubr.bf16.vlgmr.msra.gmra.mrb[40].mxu0 %v5517_v24  ;;  %3651 = vmatmul.mubr.bf16.vlgmr.msra.gmra.mrb[60].mxu1 %v5517_v24  ;;  %v6501_v24 = vld [vmem:[#allocation29_spill] sm:$0xff] }
 0x6ae   :  { %2177 = vmatpush1.bf16.msra.mxu0 %v6479_v50  ;;  %3655 = vmatpush3.bf16.msra.mxu1 %v6480_v48 }
 0x6af   :  { %2178 = vmatprep.subr.bf16.mxu0 %v6481_v47  ;;  %3656 = vmatprep.subr.bf16.mxu1 %v6359_v2  ;;  %v6503_v47 = vld [vmem:[#allocation35_spill] sm:$0xff] }
 0x6b0   :  { %2208 = vmatprep.mubr.bf16.mxu0 %v6360_v26  ;;  %3670 = vmatprep.mubr.msk.bf16.mxu1 %vm4344_vm0, %v6359_v2 }
 0x6b2   :  { %2179 = vmatpush1.bf16.msra.mxu0 %v6482_v51  ;;  %3657 = vmatpush3.bf16.msra.mxu1 %v6483_v46 }
 0x6b3   :  { %2180 = vmatprep.subr.bf16.mxu0 %v6484_v54  ;;  %3658 = vmatprep.subr.bf16.mxu1 %v6359_v2 }
 0x6b6   :  { %2181 = vmatpush1.bf16.msra.mxu0 %v6485_v45  ;;  %3659 = vmatpush3.bf16.msra.mxu1 %v6486_v55 }
 0x6b7   :  { %2182 = vmatprep.subr.bf16.mxu0 %v6487_v56  ;;  %3660 = vmatprep.subr.bf16.mxu1 %v6359_v2 }
 0x6ba   :  { %2183 = vmatpush1.bf16.msra.mxu0 %v6488_v41  ;;  %3661 = vmatpush3.bf16.msra.mxu1 %v6489_v33 }
 0x6bb   :  { %2184 = vmatprep.subr.bf16.mxu0 %v6490_v30  ;;  %3662 = vmatprep.subr.bf16.mxu1 %v6359_v2  ;;  %v6504_v30 = vld [vmem:[#allocation36_spill] sm:$0xff] }
 0x6be   :  { %2185 = vmatpush1.bf16.msra.mxu0 %v6491_v23  ;;  %3663 = vmatpush3.bf16.msra.mxu1 %v6492_v7 }
 0x6bf   :  { %2186 = vmatprep.subr.bf16.mxu0 %v6493_v10  ;;  %3664 = vmatprep.subr.bf16.mxu1 %v6359_v2 }
 0x6c2   :  { %2187 = vmatpush1.bf16.msra.mxu0 %v6494_v29  ;;  %3665 = vmatpush3.bf16.msra.mxu1 %v6495_v5 }
 0x6c3   :  { %2188 = vmatprep.subr.bf16.mxu0 %v6496_v36  ;;  %3666 = vmatprep.subr.bf16.mxu1 %v6359_v2 }
 0x6c6   :  { %2189 = vmatpush1.bf16.msra.mxu0 %v6497_v25  ;;  %3667 = vmatpush3.bf16.msra.mxu1 %v6498_v18  ;;  %v6505_v25 = vld [vmem:[#allocation45_spill] sm:$0xff] }
 0x6c7   :  { %2190 = vmatprep.subr.bf16.mxu0 %v6499_v61  ;;  %3668 = vmatprep.subr.bf16.mxu1 %v6359_v2 }
 0x6ca   :  { %2191 = vmatpush1.bf16.msra.mxu0 %v6500_v57  ;;  %3669 = vmatpush3.bf16.msra.mxu1 %v6501_v24  ;;  %v3096_v57 = vld [vmem:[%s6181_s0 + $0x3c] sm:$0xff] }
 0x6cb   :  { %2258 = vmatprep.subr.bf16.mxu0 %v6502_v12  ;;  %3674 = vmatprep.subr.bf16.mxu1 %v6359_v2 }
 0x740   :  { %v1958_v63 = vpop.f32.mrb[52].mxu1 }
 0x741   :  { %v3612_v0 = vpop.f32.mrb[53].mxu1  ;;  %v1959_v24 = vadd.f32 %v1958_v63, %v6419_v42 }
 0x742   :  { %v1961_v53 = vpop.f32.mrb[54].mxu1 }
 0x743   :  { %v3613_v1 = vpop.f32.mrb[55].mxu1  ;;  %v2070_v53 = vunpack.c.l.bf16 %v3096_v57 }
 0x760   :  { %v1999_v50 = vpop.f32.mrb[36].mxu0  ;;  %v2040_v48 = vpop.f32.mrb[56].mxu1 }
 0x761   :  { %v3831_v51 = vadd.f32 %v6503_v47, %v1999_v50  ;;  %v2001_v46 = vpop.f32.mrb[37].mxu0  ;;  %v3632_v54 = vpop.f32.mrb[57].mxu1  ;;  %v2041_v18 = vadd.f32 %v2040_v48, %v6505_v25 }
 0x762   :  { %v2003_v45 = vpop.f32.mrb[38].mxu0  ;;  %v2043_v55 = vpop.f32.mrb[58].mxu1  ;;  %v3833_v23 = vadd.f32 %v6504_v30, %v2001_v46 }
 0x763   :  { %v3094_v56 = vmul.f32 -1.442695, %v3831_v51  ;;  %v2004_v41 = vpop.f32.mrb[39].mxu0  ;;  %v3633_v33 = vpop.f32.mrb[59].mxu1  ;;  %v2071_v45 = vunpack.c.h.bf16 %v3096_v57 }
 0x764   :  { %v3095_v7 = vmul.f32 -1.442695, %v3833_v23 }
 0x765   :  { %4072 = vpow2.f32 %v3094_v56 }
 0x766   :  { %4074 = vpow2.f32 %v3095_v7 }
 0x76f   :  { %v4073_v10 = vpop.eup %4072 }
 0x770   :  { %v2050_v29 = vadd.f32 1.0, %v4073_v10  ;;  %v4075_v5 = vpop.eup %4074 }
 0x771   :  { %v2057_v36 = vadd.f32 1.0, %v4075_v5 }
 0x772   :  { %4076 = vrcp.f32 %v2050_v29 }
 0x773   :  { %4078 = vrcp.f32 %v2057_v36 }
 0x77c   :  { %v4077_v61 = vpop.eup %4076 }
 0x77d   :  { %v2060_v12 = vmul.f32 %v4077_v61, %v2041_v18  ;;  %v4079_v10 = vpop.eup %4078 }
 0x77e   :  { %v2063_v5 = vsub.f32 1.0, %v4079_v10  ;;  %v2065_v61 = vmul.f32 %v4079_v10, %v5508_v6  ;;  %v5873_v10 = vld [vmem:[#allocation5 + $0x34] ss:$12 sps:$4 sm:$0xff]  }
 0x77f   :  { %v2061_v0 = vadd.f32 %v2060_v12, %v1959_v24 }
 0x780   :  { %v2107_v1 = vpop.f32.mrb[40].mxu0  ;;  %v2148_v50 = vpop.f32.mrb[60].mxu1 }
 0x781   :  { %4080 = vtanh.f32 %v2061_v0  ;;  %v2108_v51 = vadd.f32 %v2107_v1, %v4678_v59  ;;  %v2109_v46 = vpop.f32.mrb[41].mxu0  ;;  %v3652_v54 = vpop.f32.mrb[61].mxu1 }
 0x782   :  { %v2110_v48 = vadd.f32 %v2109_v46, %v4681_v60  ;;  %v2111_v55 = vpop.f32.mrb[42].mxu0  ;;  %v2151_v56 = vpop.f32.mrb[62].mxu1  ;;  %v2149_v46 = vadd.f32 %v2148_v50, %v4688_v58  ;;  %v5867_v50 = vld [vmem:[#allocation5 + $0x18] ss:$12 sps:$4 sm:$0xff]  }
 0x783   :  { %v2154_v41 = vadd.f32 %v2108_v51, %v2070_v53  ;;  %v2112_v33 = vpop.f32.mrb[43].mxu0  ;;  %v3653_v23 = vpop.f32.mrb[63].mxu1  ;;  %v5670_v53 = vld [vmem:[%s6181_s0 + $0x44] ss:$12 sps:$4 sm:$0xff]  }
 0x784   :  { %v2161_v7 = vadd.f32 %v2110_v48, %v2071_v45  ;;  %v2072_v51 = vunpack.c.l.bf16 %v5670_v53 }
 0x785   :  { %v3098_v63 = vmul.f32 -1.442695, %v2154_v41 }
 0x786   :  { %v3099_v29 = vmul.f32 -1.442695, %v2161_v7  ;;  %v5870_v7 = vld [vmem:[#allocation5 + $0x20] ss:$12 sps:$4 sm:$0xff]  }
 0x787   :  { %4082 = vpow2.f32 %v3098_v63 }
 0x788   :  { %4084 = vpow2.f32 %v3099_v29  ;;  %v5877_v29 = vld [vmem:[#allocation5 + $0x30] ss:$12 sps:$4 sm:$0xff]  }
 0x78b   :  { %v4081_v36 = vpop.eup %4080 }
 0x78c   :  { %v2064_v18 = vmul.f32 %v4081_v36, %v2063_v5  ;;  %v5880_v5 = vld [vmem:[#allocation5 + $0x38] ss:$12 sps:$4 sm:$0xff]  }
 0x78d   :  { %v5883_v36 = vld [vmem:[#allocation5 + $0x4c] ss:$12 sps:$4 sm:$0xff]  }
 0x78e   :  { %v5665_v24 = vadd.f32 %v2065_v61, %v2064_v18  ;;  %v5887_v18 = vld [vmem:[#allocation5 + $0x48] ss:$12 sps:$4 sm:$0xff]   ;;  %v5890_v61 = vld [vmem:[#allocation5 + $0x50] ss:$12 sps:$4 sm:$0xff]  }
 0x78f   :  { %6506 = vst [vmem:[#allocation31_spill] sm:$0xff] %v5887_v18  ;;  %6507 = vst [vmem:[#allocation32_spill] sm:$0xff] %v5890_v61 }
 0x791   :  { %v4083_v57 = vpop.eup %4082 }
 0x792   :  { %v2158_v12 = vadd.f32 1.0, %v4083_v57  ;;  %v4085_v0 = vpop.eup %4084  ;;  %v5893_v57 = vld [vmem:[#allocation5 + $0x64] ss:$12 sps:$4 sm:$0xff]  }
 0x793   :  { %v2165_v1 = vadd.f32 1.0, %v4085_v0  ;;  %6508 = vst [vmem:[#allocation33_spill] sm:$0xff] %v5893_v57  ;;  %v5900_v0 = vld [vmem:[#allocation5 + $0x68] ss:$12 sps:$4 sm:$0xff]  }
 0x794   :  { %4086 = vrcp.f32 %v2158_v12  ;;  %v5897_v12 = vld [vmem:[#allocation5 + $0x60] ss:$12 sps:$4 sm:$0xff]   ;;  %6510 = vst [vmem:[#allocation46_spill] sm:$0xff] %v5900_v0 }
 0x795   :  { %4088 = vrcp.f32 %v2165_v1  ;;  %6509 = vst [vmem:[#allocation34_spill] sm:$0xff] %v5897_v12  ;;  %v5903_v1 = vld [vmem:[#allocation5 + $0x7c] ss:$12 sps:$4 sm:$0xff]  }
 0x796   :  { %6511 = vst [vmem:[#allocation37_spill] sm:$0xff] %v5903_v1 }
 0x79e   :  { %v4087_v54 = vpop.eup %4086 }
 0x79f   :  { %v2168_v45 = vmul.f32 %v4087_v54, %v2149_v46  ;;  %v4089_v48 = vpop.eup %4088  ;;  %v5910_v46 = vld [vmem:[#allocation5 + $0x80] ss:$12 sps:$4 sm:$0xff]  }
 0x7a0   :  { %v2171_v55 = vsub.f32 1.0, %v4089_v48  ;;  %v2173_v33 = vmul.f32 %v4089_v48, %v5513_v13  ;;  %v5839_v13 = vld [vmem:[%s6182_s1 + $0xa8] ss:$12 sps:$4 sm:$0xff]   ;;  %6513 = vst [vmem:[#allocation39_spill] sm:$0xff] %v5910_v46  ;;  %v5923_v48 = vld [vmem:[#allocation5 + $0xac] ss:$12 sps:$4 sm:$0xff]  }
 0x7a1   :  { %v2169_v6 = vadd.f32 %v2168_v45, %v2072_v51  ;;  %v5907_v51 = vld [vmem:[#allocation5 + $0x78] ss:$12 sps:$4 sm:$0xff]   ;;  %v5913_v54 = vld [vmem:[#allocation5 + $0x94] ss:$12 sps:$4 sm:$0xff]   ;;  %v5917_v45 = vld [vmem:[#allocation5 + $0x90] ss:$12 sps:$4 sm:$0xff]  }
 0x7a2   :  { %6512 = vst [vmem:[#allocation38_spill] sm:$0xff] %v5907_v51  ;;  %6514 = vst [vmem:[#allocation40_spill] sm:$0xff] %v5913_v54 }
 0x7a3   :  { %4090 = vtanh.f32 %v2169_v6  ;;  %6515 = vst [vmem:[#allocation41_spill] sm:$0xff] %v5917_v45  ;;  %v5920_v6 = vld [vmem:[#allocation5 + $0x98] ss:$12 sps:$4 sm:$0xff]   ;;  %6517 = vst [vmem:[#allocation43_spill] sm:$0xff] %v5923_v48 }
 0x7a4   :  { %6516 = vst [vmem:[#allocation42_spill] sm:$0xff] %v5920_v6 }
 0x7ad   :  { %v4091_v56 = vpop.eup %4090 }
 0x7ae   :  { %v2172_v41 = vmul.f32 %v4091_v56, %v2171_v55  ;;  %v5927_v55 = vld [vmem:[#allocation5 + $0xa8] ss:$12 sps:$4 sm:$0xff]   ;;  %v5930_v56 = vld [vmem:[#allocation5 + $0xb0] ss:$12 sps:$4 sm:$0xff]  }
 0x7af   :  { %6518 = vst [vmem:[#allocation44_spill] sm:$0xff] %v5927_v55  ;;  %6519 = vst [vmem:[#allocation11_spill] sm:$0xff] %v5930_v56 }
 0x7b0   :  { %v5675_v23 = vadd.f32 %v2173_v33, %v2172_v41  ;;  %v5933_v41 = vld [vmem:[#allocation7 + $0x4] ss:$12 sps:$4 sm:$0xff]  }
 0x7b1   :  { %6520 = vst [vmem:[#allocation12_spill] sm:$0xff] %v5933_v41 }
 0x7b2   :  { %v5679_v63 = vpack.c.bf16 %v5675_v23, %v5675_v23 }
 0x7b4   :  { %2209 = vmatmul.mubr.bf16.vlgmr.msra.gmra.mrb[44].mxu0 %v5679_v63  ;;  %3671 = vmatmul.mubr.bf16.vlgmr.msra.gmra.mrb[64].mxu1 %v5679_v63 }
 0x7b5   :  { %2259 = vmatpush1.bf16.msra.mxu0 %v5343_v15  ;;  %3675 = vmatpush3.bf16.msra.mxu1 %v5346_v39  ;;  %v2257_v15 = vpack.c.bf16 %v5665_v24, %v5665_v24  ;;  %v5724_v39 = vld [vmem:[%s6182_s1 + $0x8] ss:$12 sps:$4 sm:$0xff]  }
 0x7b6   :  { %2260 = vmatprep.subr.bf16.mxu0 %v5349_v14  ;;  %3676 = vmatprep.subr.bf16.mxu1 %v6359_v2  ;;  %v5736_v14 = vld [vmem:[%s6182_s1 + $0x20] ss:$12 sps:$4 sm:$0xff]  }
 0x7b7   :  { %2290 = vmatprep.mubr.bf16.mxu0 %v6360_v26  ;;  %3690 = vmatprep.mubr.msk.bf16.mxu1 %vm4344_vm0, %v6359_v2 }
 0x7b9   :  { %2261 = vmatpush1.bf16.msra.mxu0 %v5356_v22  ;;  %3677 = vmatpush3.bf16.msra.mxu1 %v5359_v43  ;;  %v5744_v22 = vld [vmem:[%s6182_s1 + $0x30] ss:$12 sps:$4 sm:$0xff]   ;;  %v5750_v43 = vld [vmem:[%s6182_s1 + $0x38] ss:$12 sps:$4 sm:$0xff]  }
 0x7ba   :  { %2262 = vmatprep.subr.bf16.mxu0 %v5362_v8  ;;  %3678 = vmatprep.subr.bf16.mxu1 %v6359_v2  ;;  %v5756_v8 = vld [vmem:[%s6182_s1 + $0x4c] ss:$12 sps:$4 sm:$0xff]  }
 0x7bd   :  { %2263 = vmatpush1.bf16.msra.mxu0 %v5366_v17  ;;  %3679 = vmatpush3.bf16.msra.mxu1 %v5369_v21  ;;  %v5763_v17 = vld [vmem:[%s6182_s1 + $0x48] ss:$12 sps:$4 sm:$0xff]   ;;  %v5769_v21 = vld [vmem:[%s6182_s1 + $0x50] ss:$12 sps:$4 sm:$0xff]  }
 0x7be   :  { %2264 = vmatprep.subr.bf16.mxu0 %v5372_v20  ;;  %3680 = vmatprep.subr.bf16.mxu1 %v6359_v2  ;;  %v5775_v20 = vld [vmem:[%s6182_s1 + $0x64] ss:$12 sps:$4 sm:$0xff]  }
 0x7c1   :  { %2265 = vmatpush1.bf16.msra.mxu0 %v5376_v28  ;;  %3681 = vmatpush3.bf16.msra.mxu1 %v5379_v9  ;;  %v5782_v28 = vld [vmem:[%s6182_s1 + $0x60] ss:$12 sps:$4 sm:$0xff]   ;;  %v5788_v9 = vld [vmem:[%s6182_s1 + $0x68] ss:$12 sps:$4 sm:$0xff]  }
 0x7c2   :  { %2266 = vmatprep.subr.bf16.mxu0 %v5382_v4  ;;  %3682 = vmatprep.subr.bf16.mxu1 %v6359_v2  ;;  %v5794_v4 = vld [vmem:[%s6182_s1 + $0x7c] ss:$12 sps:$4 sm:$0xff]  }
 0x7c5   :  { %2267 = vmatpush1.bf16.msra.mxu0 %v5386_v37  ;;  %3683 = vmatpush3.bf16.msra.mxu1 %v6470_v38  ;;  %v5801_v37 = vld [vmem:[%s6182_s1 + $0x78] ss:$12 sps:$4 sm:$0xff]   ;;  %v5845_v38 = vld [vmem:[%s6182_s1 + $0xb0] ss:$12 sps:$4 sm:$0xff]  }
 0x7c6   :  { %2268 = vmatprep.subr.bf16.mxu0 %v6471_v11  ;;  %3684 = vmatprep.subr.bf16.mxu1 %v6359_v2  ;;  %v5848_v11 = vld [vmem:[#allocation5 + $0x4] ss:$12 sps:$4 sm:$0xff]  }
 0x7c9   :  { %2269 = vmatpush1.bf16.msra.mxu0 %v5396_v34  ;;  %3685 = vmatpush3.bf16.msra.mxu1 %v6472_v40  ;;  %v5820_v34 = vld [vmem:[%s6182_s1 + $0x90] ss:$12 sps:$4 sm:$0xff]  }
 0x7ca   :  { %2270 = vmatprep.subr.bf16.mxu0 %v6473_v49  ;;  %3686 = vmatprep.subr.bf16.mxu1 %v6359_v2  ;;  %v5854_v40 = vld [vmem:[#allocation5] ss:$12 sps:$4 sm:$0xff]   ;;  %v5857_v49 = vld [vmem:[#allocation5 + $0x8] ss:$12 sps:$4 sm:$0xff]  }
 0x7cd   :  { %2271 = vmatpush1.bf16.msra.mxu0 %v6474_v35  ;;  %3687 = vmatpush3.bf16.msra.mxu1 %v5409_v16  ;;  %v5813_v16 = vld [vmem:[%s6182_s1 + $0x94] ss:$12 sps:$4 sm:$0xff]  }
 0x7ce   :  { %2272 = vmatprep.subr.bf16.mxu0 %v5412_v31  ;;  %3688 = vmatprep.subr.bf16.mxu1 %v6359_v2  ;;  %v5807_v31 = vld [vmem:[%s6182_s1 + $0x80] ss:$12 sps:$4 sm:$0xff]  }
 0x7cf   :  { %v5860_v35 = vld [vmem:[#allocation5 + $0x1c] ss:$12 sps:$4 sm:$0xff]  }
 0x7d1   :  { %2273 = vmatpush1.bf16.msra.mxu0 %v5416_v19  ;;  %3689 = vmatpush3.bf16.msra.mxu1 %v5419_v52  ;;  %v5826_v19 = vld [vmem:[%s6182_s1 + $0x98] ss:$12 sps:$4 sm:$0xff]  }
 0x7d2   :  { %2366 = vmatprep.subr.bf16.mxu0 %v5559_v32  ;;  %3694 = vmatprep.subr.bf16.mxu1 %v6359_v2  ;;  %v5832_v52 = vld [vmem:[%s6182_s1 + $0xac] ss:$12 sps:$4 sm:$0xff]  }
 0x7d4   :  { %2291 = vmatmul.mubr.bf16.vlgmr.msra.gmra.mrb[44].mxu0 %v2257_v15  ;;  %3691 = vmatmul.mubr.bf16.vlgmr.msra.gmra.mrb[68].mxu1 %v2257_v15 }
 0x7d5   :  { %2367 = vmatpush1.bf16.msra.mxu0 %v5566_v3  ;;  %3695 = vmatpush3.bf16.msra.mxu1 %v5724_v39 }
 0x7d6   :  { %2368 = vmatprep.subr.bf16.mxu0 %v5573_v44  ;;  %3696 = vmatprep.subr.bf16.mxu1 %v6359_v2 }
 0x7d7   :  { %2398 = vmatprep.mubr.bf16.mxu0 %v6360_v26  ;;  %3710 = vmatprep.mubr.msk.bf16.mxu1 %vm4344_vm0, %v6359_v2 }
 0x7d9   :  { %2369 = vmatpush1.bf16.msra.mxu0 %v5583_v27  ;;  %3697 = vmatpush3.bf16.msra.mxu1 %v5736_v14 }
 0x7da   :  { %2370 = vmatprep.subr.bf16.mxu0 %v5590_v62  ;;  %3698 = vmatprep.subr.bf16.mxu1 %v6359_v2 }
 0x7dd   :  { %2371 = vmatpush1.bf16.msra.mxu0 %v5744_v22  ;;  %3699 = vmatpush3.bf16.msra.mxu1 %v5750_v43 }
 0x7de   :  { %2372 = vmatprep.subr.bf16.mxu0 %v5756_v8  ;;  %3700 = vmatprep.subr.bf16.mxu1 %v6359_v2 }
 0x7e1   :  { %2373 = vmatpush1.bf16.msra.mxu0 %v5763_v17  ;;  %3701 = vmatpush3.bf16.msra.mxu1 %v5769_v21 }
 0x7e2   :  { %2374 = vmatprep.subr.bf16.mxu0 %v5775_v20  ;;  %3702 = vmatprep.subr.bf16.mxu1 %v6359_v2 }
 0x7e5   :  { %2375 = vmatpush1.bf16.msra.mxu0 %v5782_v28  ;;  %3703 = vmatpush3.bf16.msra.mxu1 %v5788_v9 }
 0x7e6   :  { %2376 = vmatprep.subr.bf16.mxu0 %v5794_v4  ;;  %3704 = vmatprep.subr.bf16.mxu1 %v6359_v2 }
 0x7e9   :  { %2377 = vmatpush1.bf16.msra.mxu0 %v5801_v37  ;;  %3705 = vmatpush3.bf16.msra.mxu1 %v5807_v31 }
 0x7ea   :  { %2378 = vmatprep.subr.bf16.mxu0 %v5813_v16  ;;  %3706 = vmatprep.subr.bf16.mxu1 %v6359_v2 }
 0x7ed   :  { %2379 = vmatpush1.bf16.msra.mxu0 %v5820_v34  ;;  %3707 = vmatpush3.bf16.msra.mxu1 %v5826_v19 }
 0x7ee   :  { %2380 = vmatprep.subr.bf16.mxu0 %v5832_v52  ;;  %3708 = vmatprep.subr.bf16.mxu1 %v6359_v2 }
 0x7f1   :  { %2381 = vmatpush1.bf16.msra.mxu0 %v5839_v13  ;;  %3709 = vmatpush3.bf16.msra.mxu1 %v5845_v38 }
 0x7f2   :  { %2469 = vmatprep.subr.bf16.mxu0 %v5848_v11  ;;  %3714 = vmatprep.subr.bf16.mxu1 %v6359_v2 }
 0x7f4   :  { %2399 = vmatmul.mubr.bf16.vlgmr.msra.gmra.mrb[48].mxu0 %v5679_v63  ;;  %3711 = vmatmul.mubr.bf16.vlgmr.msra.gmra.mrb[72].mxu1 %v5679_v63 }
 0x7f5   :  { %2470 = vmatpush1.bf16.msra.mxu0 %v5854_v40  ;;  %3715 = vmatpush3.bf16.msra.mxu1 %v5857_v49 }
 0x7f6   :  { %2471 = vmatprep.subr.bf16.mxu0 %v5860_v35  ;;  %3716 = vmatprep.subr.bf16.mxu1 %v6359_v2 }
 0x7f7   :  { %2501 = vmatprep.mubr.bf16.mxu0 %v6360_v26  ;;  %3730 = vmatprep.mubr.msk.bf16.mxu1 %vm4344_vm0, %v6359_v2 }
 0x7f9   :  { %2472 = vmatpush1.bf16.msra.mxu0 %v5867_v50  ;;  %3717 = vmatpush3.bf16.msra.mxu1 %v5870_v7 }
 0x7fa   :  { %2473 = vmatprep.subr.bf16.mxu0 %v5873_v10  ;;  %3718 = vmatprep.subr.bf16.mxu1 %v6359_v2 }
 0x7fd   :  { %2474 = vmatpush1.bf16.msra.mxu0 %v5877_v29  ;;  %3719 = vmatpush3.bf16.msra.mxu1 %v5880_v5 }
 0x7fe   :  { %2475 = vmatprep.subr.bf16.mxu0 %v5883_v36  ;;  %3720 = vmatprep.subr.bf16.mxu1 %v6359_v2 }
 0x801   :  { %2476 = vmatpush1.bf16.msra.mxu0 %v5887_v18  ;;  %3721 = vmatpush3.bf16.msra.mxu1 %v5890_v61 }
 0x802   :  { %2477 = vmatprep.subr.bf16.mxu0 %v5893_v57  ;;  %3722 = vmatprep.subr.bf16.mxu1 %v6359_v2 }
 0x805   :  { %2478 = vmatpush1.bf16.msra.mxu0 %v5897_v12  ;;  %3723 = vmatpush3.bf16.msra.mxu1 %v5900_v0 }
 0x806   :  { %2479 = vmatprep.subr.bf16.mxu0 %v5903_v1  ;;  %3724 = vmatprep.subr.bf16.mxu1 %v6359_v2 }
 0x809   :  { %2480 = vmatpush1.bf16.msra.mxu0 %v5907_v51  ;;  %3725 = vmatpush3.bf16.msra.mxu1 %v5910_v46 }
 0x80a   :  { %2481 = vmatprep.subr.bf16.mxu0 %v5913_v54  ;;  %3726 = vmatprep.subr.bf16.mxu1 %v6359_v2 }
 0x80d   :  { %2482 = vmatpush1.bf16.msra.mxu0 %v5917_v45  ;;  %3727 = vmatpush3.bf16.msra.mxu1 %v5920_v6 }
 0x80e   :  { %2483 = vmatprep.subr.bf16.mxu0 %v5923_v48  ;;  %3728 = vmatprep.subr.bf16.mxu1 %v6359_v2 }
 0x811   :  { %2484 = vmatpush1.bf16.msra.mxu0 %v5927_v55  ;;  %3729 = vmatpush3.bf16.msra.mxu1 %v5930_v56 }
 0x812   :  { %2551 = vmatprep.subr.bf16.mxu0 %v5933_v41  ;;  %3734 = vmatprep.subr.bf16.mxu1 %v6359_v2 }
 0x887   :  { %v2251_v33 = vpop.f32.mrb[64].mxu1 }
 0x888   :  { %v3672_v63 = vpop.f32.mrb[65].mxu1 }
 0x889   :  { %v2254_v15 = vpop.f32.mrb[66].mxu1 }
 0x88a   :  { %v3673_v48 = vpop.f32.mrb[67].mxu1 }
 0x8a7   :  { %v2292_v6 = vpop.f32.mrb[44].mxu0  ;;  %v2333_v45 = vpop.f32.mrb[68].mxu1 }
 0x8a8   :  { %v3835_v54 = vadd.f32 %v6503_v47, %v2292_v6  ;;  %v2294_v46 = vpop.f32.mrb[45].mxu0  ;;  %v3692_v55 = vpop.f32.mrb[69].mxu1  ;;  %v2334_v18 = vadd.f32 %v2333_v45, %v6505_v25 }
 0x8a9   :  { %v2296_v51 = vpop.f32.mrb[46].mxu0  ;;  %v2336_v1 = vpop.f32.mrb[70].mxu1  ;;  %v3837_v57 = vadd.f32 %v6504_v30, %v2294_v46 }
 0x8aa   :  { %v3100_v0 = vmul.f32 -1.442695, %v3835_v54  ;;  %v2297_v56 = vpop.f32.mrb[47].mxu0  ;;  %v3693_v12 = vpop.f32.mrb[71].mxu1  ;;  %v3102_v1 = vld [vmem:[%s6181_s0 + $0x48] sm:$0xff]  ;;  %v2252_v51 = vadd.f32 %v2251_v33, %v6419_v42 }
 0x8ab   :  { %v3101_v41 = vmul.f32 -1.442695, %v3837_v57 }
 0x8ac   :  { %4092 = vpow2.f32 %v3100_v0  ;;  %v2363_v0 = vunpack.c.l.bf16 %v3102_v1 }
 0x8ad   :  { %4094 = vpow2.f32 %v3101_v41  ;;  %v2364_v41 = vunpack.c.h.bf16 %v3102_v1 }
 0x8b6   :  { %v4093_v61 = vpop.eup %4092 }
 0x8b7   :  { %v2343_v63 = vadd.f32 1.0, %v4093_v61  ;;  %v4095_v48 = vpop.eup %4094 }
 0x8b8   :  { %v2350_v15 = vadd.f32 1.0, %v4095_v48 }
 0x8b9   :  { %4096 = vrcp.f32 %v2343_v63 }
 0x8ba   :  { %4098 = vrcp.f32 %v2350_v15 }
 0x8c3   :  { %v4097_v6 = vpop.eup %4096 }
 0x8c4   :  { %v2353_v12 = vmul.f32 %v4097_v6, %v2334_v18  ;;  %v4099_v15 = vpop.eup %4098 }
 0x8c6   :  { %v2354_v46 = vadd.f32 %v2353_v12, %v2252_v51  ;;  %v2356_v51 = vsub.f32 1.0, %v4099_v15 }
 0x8c7   :  { %v2400_v57 = vpop.f32.mrb[48].mxu0  ;;  %v2441_v54 = vpop.f32.mrb[72].mxu1 }
 0x8c8   :  { %4100 = vtanh.f32 %v2354_v46  ;;  %v2401_v61 = vadd.f32 %v2400_v57, %v4678_v59  ;;  %v2402_v55 = vpop.f32.mrb[49].mxu0  ;;  %v3712_v56 = vpop.f32.mrb[73].mxu1  ;;  %v2358_v57 = vmul.f32 %v4099_v15, %v5665_v24 }
 0x8c9   :  { %v2403_v45 = vadd.f32 %v2402_v55, %v4681_v60  ;;  %v2404_v63 = vpop.f32.mrb[50].mxu0  ;;  %v2444_v48 = vpop.f32.mrb[74].mxu1 }
 0x8ca   :  { %v2447_v25 = vadd.f32 %v2401_v61, %v2363_v0  ;;  %v2405_v30 = vpop.f32.mrb[51].mxu0  ;;  %v3713_v47 = vpop.f32.mrb[75].mxu1 }
 0x8cb   :  { %v2454_v18 = vadd.f32 %v2403_v45, %v2364_v41  ;;  %v2365_v47 = vunpack.c.h.bf16 %v5670_v53  ;;  %v2442_v30 = vadd.f32 %v2441_v54, %v4688_v58  ;;  %v5960_v53 = vld [vmem:[#allocation7] ss:$12 sps:$4 sm:$0xff]   ;;  %v5963_v54 = vld [vmem:[#allocation7 + $0x8] ss:$12 sps:$4 sm:$0xff]  }
 0x8cc   :  { %v3104_v33 = vmul.f32 -1.442695, %v2447_v25 }
 0x8cd   :  { %v3105_v6 = vmul.f32 -1.442695, %v2454_v18 }
 0x8ce   :  { %4102 = vpow2.f32 %v3104_v33 }
 0x8cf   :  { %4104 = vpow2.f32 %v3105_v6 }
 0x8d2   :  { %v4101_v12 = vpop.eup %4100 }
 0x8d3   :  { %v2357_v46 = vmul.f32 %v4101_v12, %v2356_v51  ;;  %v5966_v51 = vld [vmem:[#allocation7 + $0x1c] ss:$12 sps:$4 sm:$0xff]   ;;  %v5976_v12 = vld [vmem:[#allocation7 + $0x20] ss:$12 sps:$4 sm:$0xff]  }
 0x8d5   :  { %v5947_v56 = vadd.f32 %v2358_v57, %v2357_v46  ;;  %v5979_v46 = vld [vmem:[#allocation7 + $0x34] ss:$12 sps:$4 sm:$0xff]   ;;  %v5983_v57 = vld [vmem:[#allocation7 + $0x30] ss:$12 sps:$4 sm:$0xff]  }
 0x8d8   :  { %v4103_v1 = vpop.eup %4102 }
 0x8d9   :  { %v2451_v55 = vadd.f32 1.0, %v4103_v1  ;;  %v4105_v63 = vpop.eup %4104  ;;  %v5986_v1 = vld [vmem:[#allocation7 + $0x38] ss:$12 sps:$4 sm:$0xff]  }
 0x8da   :  { %v2458_v0 = vadd.f32 1.0, %v4105_v63  ;;  %v5993_v63 = vld [vmem:[#allocation7 + $0x48] ss:$12 sps:$4 sm:$0xff]  }
 0x8db   :  { %4106 = vrcp.f32 %v2451_v55  ;;  %v5989_v55 = vld [vmem:[#allocation7 + $0x4c] ss:$12 sps:$4 sm:$0xff]  }
 0x8dc   :  { %4108 = vrcp.f32 %v2458_v0  ;;  %v5996_v0 = vld [vmem:[#allocation7 + $0x50] ss:$12 sps:$4 sm:$0xff]  }
 0x8e5   :  { %v4107_v25 = vpop.eup %4106 }
 0x8e6   :  { %v2461_v61 = vmul.f32 %v4107_v25, %v2442_v30  ;;  %v4109_v45 = vpop.eup %4108  ;;  %v6003_v30 = vld [vmem:[#allocation7 + $0x60] ss:$12 sps:$4 sm:$0xff]   ;;  %v6006_v25 = vld [vmem:[#allocation7 + $0x68] ss:$12 sps:$4 sm:$0xff]  }
 0x8e7   :  { %v2464_v48 = vsub.f32 1.0, %v4109_v45  ;;  %v2466_v18 = vmul.f32 %v4109_v45, %v5675_v23  ;;  %v5973_v23 = vld [vmem:[#allocation7 + $0x18] ss:$12 sps:$4 sm:$0xff]   ;;  %v6016_v45 = vld [vmem:[#allocation7 + $0x80] ss:$12 sps:$4 sm:$0xff]  }
 0x8e8   :  { %v2462_v41 = vadd.f32 %v2461_v61, %v2365_v47  ;;  %v5999_v47 = vld [vmem:[#allocation7 + $0x64] ss:$12 sps:$4 sm:$0xff]   ;;  %v6009_v61 = vld [vmem:[#allocation7 + $0x7c] ss:$12 sps:$4 sm:$0xff]   ;;  %6521 = vst [vmem:[#allocation13_spill] sm:$0xff] %v6016_v45 }
 0x8ea   :  { %4110 = vtanh.f32 %v2462_v41  ;;  %v6013_v41 = vld [vmem:[#allocation7 + $0x78] ss:$12 sps:$4 sm:$0xff]  }
 0x8f4   :  { %v4111_v24 = vpop.eup %4110 }
 0x8f5   :  { %v2465_v33 = vmul.f32 %v4111_v24, %v2464_v48  ;;  %v6019_v48 = vld [vmem:[#allocation7 + $0x94] ss:$12 sps:$4 sm:$0xff]   ;;  %v6023_v24 = vld [vmem:[#allocation7 + $0x90] ss:$12 sps:$4 sm:$0xff]  }
 0x8f6   :  { %6522 = vst [vmem:[#allocation14_spill] sm:$0xff] %v6019_v48  ;;  %6523 = vst [vmem:[#allocation15_spill] sm:$0xff] %v6023_v24 }
 0x8f7   :  { %v5952_v15 = vadd.f32 %v2466_v18, %v2465_v33  ;;  %v6026_v33 = vld [vmem:[#allocation7 + $0x98] ss:$12 sps:$4 sm:$0xff]  }
 0x8f8   :  { %v6029_v18 = vld [vmem:[#allocation7 + $0xac] ss:$12 sps:$4 sm:$0xff]  }
 0x8f9   :  { %v5956_v6 = vpack.c.bf16 %v5952_v15, %v5952_v15 }
 0x8fb   :  { %2502 = vmatmul.mubr.bf16.vlgmr.msra.gmra.mrb[52].mxu0 %v5956_v6  ;;  %3731 = vmatmul.mubr.bf16.vlgmr.msra.gmra.mrb[76].mxu1 %v5956_v6 }
 0x8fc   :  { %2552 = vmatpush1.bf16.msra.mxu0 %v5960_v53  ;;  %3735 = vmatpush3.bf16.msra.mxu1 %v5963_v54 }
 0x8fd   :  { %2553 = vmatprep.subr.bf16.mxu0 %v5966_v51  ;;  %3736 = vmatprep.subr.bf16.mxu1 %v6359_v2 }
 0x8fe   :  { %2583 = vmatprep.mubr.bf16.mxu0 %v6360_v26  ;;  %3750 = vmatprep.mubr.msk.bf16.mxu1 %vm4344_vm0, %v6359_v2 }
 0x900   :  { %2554 = vmatpush1.bf16.msra.mxu0 %v5973_v23  ;;  %3737 = vmatpush3.bf16.msra.mxu1 %v5976_v12 }
 0x901   :  { %2555 = vmatprep.subr.bf16.mxu0 %v5979_v46  ;;  %3738 = vmatprep.subr.bf16.mxu1 %v6359_v2 }
 0x904   :  { %2556 = vmatpush1.bf16.msra.mxu0 %v5983_v57  ;;  %3739 = vmatpush3.bf16.msra.mxu1 %v5986_v1 }
 0x905   :  { %2557 = vmatprep.subr.bf16.mxu0 %v5989_v55  ;;  %3740 = vmatprep.subr.bf16.mxu1 %v6359_v2 }
 0x908   :  { %2558 = vmatpush1.bf16.msra.mxu0 %v5993_v63  ;;  %3741 = vmatpush3.bf16.msra.mxu1 %v5996_v0 }
 0x909   :  { %2559 = vmatprep.subr.bf16.mxu0 %v5999_v47  ;;  %3742 = vmatprep.subr.bf16.mxu1 %v6359_v2 }
 0x90c   :  { %2560 = vmatpush1.bf16.msra.mxu0 %v6003_v30  ;;  %3743 = vmatpush3.bf16.msra.mxu1 %v6006_v25 }
 0x90d   :  { %2561 = vmatprep.subr.bf16.mxu0 %v6009_v61  ;;  %3744 = vmatprep.subr.bf16.mxu1 %v6359_v2 }
 0x910   :  { %2562 = vmatpush1.bf16.msra.mxu0 %v6013_v41  ;;  %3745 = vmatpush3.bf16.msra.mxu1 %v6016_v45  ;;  %v6033_v45 = vld [vmem:[#allocation7 + $0xa8] ss:$12 sps:$4 sm:$0xff]  }
 0x911   :  { %2563 = vmatprep.subr.bf16.mxu0 %v6019_v48  ;;  %3746 = vmatprep.subr.bf16.mxu1 %v6359_v2  ;;  %v6036_v48 = vld [vmem:[#allocation7 + $0xb0] ss:$12 sps:$4 sm:$0xff]  }
 0x914   :  { %2564 = vmatpush1.bf16.msra.mxu0 %v6023_v24  ;;  %3747 = vmatpush3.bf16.msra.mxu1 %v6026_v33  ;;  %v2550_v24 = vpack.c.bf16 %v5947_v56, %v5947_v56 }
 0x915   :  { %2565 = vmatprep.subr.bf16.mxu0 %v6029_v18  ;;  %3748 = vmatprep.subr.bf16.mxu1 %v6359_v2 }
 0x918   :  { %2566 = vmatpush1.bf16.msra.mxu0 %v6033_v45  ;;  %3749 = vmatpush3.bf16.msra.mxu1 %v6036_v48 }
 0x919   :  { %2659 = vmatprep.subr.bf16.mxu0 %v5559_v32  ;;  %3754 = vmatprep.subr.bf16.mxu1 %v6359_v2  ;;  %v6524_v32 = vld [vmem:[#allocation31_spill] sm:$0xff] }
 0x91b   :  { %2584 = vmatmul.mubr.bf16.vlgmr.msra.gmra.mrb[52].mxu0 %v2550_v24  ;;  %3751 = vmatmul.mubr.bf16.vlgmr.msra.gmra.mrb[80].mxu1 %v2550_v24 }
 0x91c   :  { %2660 = vmatpush1.bf16.msra.mxu0 %v5566_v3  ;;  %3755 = vmatpush3.bf16.msra.mxu1 %v5724_v39  ;;  %v6525_v3 = vld [vmem:[#allocation32_spill] sm:$0xff]  ;;  %v6529_v39 = vld [vmem:[#allocation37_spill] sm:$0xff] }
 0x91d   :  { %2661 = vmatprep.subr.bf16.mxu0 %v5573_v44  ;;  %3756 = vmatprep.subr.bf16.mxu1 %v6359_v2  ;;  %v6526_v44 = vld [vmem:[#allocation33_spill] sm:$0xff] }
 0x91e   :  { %2691 = vmatprep.mubr.bf16.mxu0 %v6360_v26  ;;  %3770 = vmatprep.mubr.msk.bf16.mxu1 %vm4344_vm0, %v6359_v2 }
 0x920   :  { %2662 = vmatpush1.bf16.msra.mxu0 %v5583_v27  ;;  %3757 = vmatpush3.bf16.msra.mxu1 %v5736_v14  ;;  %v6527_v27 = vld [vmem:[#allocation34_spill] sm:$0xff] }
 0x921   :  { %2663 = vmatprep.subr.bf16.mxu0 %v5590_v62  ;;  %3758 = vmatprep.subr.bf16.mxu1 %v6359_v2  ;;  %v6528_v62 = vld [vmem:[#allocation46_spill] sm:$0xff] }
 0x922   :  { %v6530_v14 = vld [vmem:[#allocation38_spill] sm:$0xff] }
 0x924   :  { %2664 = vmatpush1.bf16.msra.mxu0 %v5744_v22  ;;  %3759 = vmatpush3.bf16.msra.mxu1 %v5750_v43  ;;  %v6531_v22 = vld [vmem:[#allocation39_spill] sm:$0xff]  ;;  %v6532_v43 = vld [vmem:[#allocation40_spill] sm:$0xff] }
 0x925   :  { %2665 = vmatprep.subr.bf16.mxu0 %v5756_v8  ;;  %3760 = vmatprep.subr.bf16.mxu1 %v6359_v2  ;;  %v6533_v8 = vld [vmem:[#allocation41_spill] sm:$0xff] }
 0x928   :  { %2666 = vmatpush1.bf16.msra.mxu0 %v5763_v17  ;;  %3761 = vmatpush3.bf16.msra.mxu1 %v5769_v21  ;;  %v6534_v17 = vld [vmem:[#allocation42_spill] sm:$0xff]  ;;  %v6535_v21 = vld [vmem:[#allocation43_spill] sm:$0xff] }
 0x929   :  { %2667 = vmatprep.subr.bf16.mxu0 %v5775_v20  ;;  %3762 = vmatprep.subr.bf16.mxu1 %v6359_v2  ;;  %v6536_v20 = vld [vmem:[#allocation44_spill] sm:$0xff] }
 0x92c   :  { %2668 = vmatpush1.bf16.msra.mxu0 %v5782_v28  ;;  %3763 = vmatpush3.bf16.msra.mxu1 %v5788_v9  ;;  %v6537_v28 = vld [vmem:[#allocation11_spill] sm:$0xff]  ;;  %v6538_v9 = vld [vmem:[#allocation12_spill] sm:$0xff] }
 0x92d   :  { %2669 = vmatprep.subr.bf16.mxu0 %v5794_v4  ;;  %3764 = vmatprep.subr.bf16.mxu1 %v6359_v2 }
 0x930   :  { %2670 = vmatpush1.bf16.msra.mxu0 %v5801_v37  ;;  %3765 = vmatpush3.bf16.msra.mxu1 %v5807_v31 }
 0x931   :  { %2671 = vmatprep.subr.bf16.mxu0 %v5813_v16  ;;  %3766 = vmatprep.subr.bf16.mxu1 %v6359_v2 }
 0x934   :  { %2672 = vmatpush1.bf16.msra.mxu0 %v5820_v34  ;;  %3767 = vmatpush3.bf16.msra.mxu1 %v5826_v19 }
 0x935   :  { %2673 = vmatprep.subr.bf16.mxu0 %v5832_v52  ;;  %3768 = vmatprep.subr.bf16.mxu1 %v6359_v2  ;;  %v6539_v52 = vld [vmem:[#allocation35_spill] sm:$0xff] }
 0x938   :  { %2674 = vmatpush1.bf16.msra.mxu0 %v5839_v13  ;;  %3769 = vmatpush3.bf16.msra.mxu1 %v5845_v38 }
 0x939   :  { %2762 = vmatprep.subr.bf16.mxu0 %v5848_v11  ;;  %3774 = vmatprep.subr.bf16.mxu1 %v6359_v2 }
 0x93b   :  { %2692 = vmatmul.mubr.bf16.vlgmr.msra.gmra.mrb[56].mxu0 %v5956_v6  ;;  %3771 = vmatmul.mubr.bf16.vlgmr.msra.gmra.mrb[84].mxu1 %v5956_v6 }
 0x93c   :  { %2763 = vmatpush1.bf16.msra.mxu0 %v5854_v40  ;;  %3775 = vmatpush3.bf16.msra.mxu1 %v5857_v49 }
 0x93d   :  { %2764 = vmatprep.subr.bf16.mxu0 %v5860_v35  ;;  %3776 = vmatprep.subr.bf16.mxu1 %v6359_v2 }
 0x93e   :  { %2794 = vmatprep.mubr.bf16.mxu0 %v6360_v26  ;;  %3790 = vmatprep.mubr.msk.bf16.mxu1 %vm4344_vm0, %v6359_v2 }
 0x940   :  { %2765 = vmatpush1.bf16.msra.mxu0 %v5867_v50  ;;  %3777 = vmatpush3.bf16.msra.mxu1 %v5870_v7 }
 0x941   :  { %2766 = vmatprep.subr.bf16.mxu0 %v5873_v10  ;;  %3778 = vmatprep.subr.bf16.mxu1 %v6359_v2  ;;  %v6540_v10 = vld [vmem:[#allocation36_spill] sm:$0xff] }
 0x944   :  { %2767 = vmatpush1.bf16.msra.mxu0 %v5877_v29  ;;  %3779 = vmatpush3.bf16.msra.mxu1 %v5880_v5 }
 0x945   :  { %2768 = vmatprep.subr.bf16.mxu0 %v5883_v36  ;;  %3780 = vmatprep.subr.bf16.mxu1 %v6359_v2 }
 0x948   :  { %2769 = vmatpush1.bf16.msra.mxu0 %v6524_v32  ;;  %3781 = vmatpush3.bf16.msra.mxu1 %v6525_v3  ;;  %v6541_v3 = vld [vmem:[#allocation45_spill] sm:$0xff] }
 0x949   :  { %2770 = vmatprep.subr.bf16.mxu0 %v6526_v44  ;;  %3782 = vmatprep.subr.bf16.mxu1 %v6359_v2 }
 0x94c   :  { %2771 = vmatpush1.bf16.msra.mxu0 %v6527_v27  ;;  %3783 = vmatpush3.bf16.msra.mxu1 %v6528_v62  ;;  %v3108_v62 = vld [vmem:[%s6181_s0 + $0x54] sm:$0xff] }
 0x94d   :  { %2772 = vmatprep.subr.bf16.mxu0 %v6529_v39  ;;  %3784 = vmatprep.subr.bf16.mxu1 %v6359_v2 }
 0x950   :  { %2773 = vmatpush1.bf16.msra.mxu0 %v6530_v14  ;;  %3785 = vmatpush3.bf16.msra.mxu1 %v6531_v22 }
 0x951   :  { %2774 = vmatprep.subr.bf16.mxu0 %v6532_v43  ;;  %3786 = vmatprep.subr.bf16.mxu1 %v6359_v2  ;;  %v2656_v43 = vunpack.c.l.bf16 %v3108_v62 }
 0x954   :  { %2775 = vmatpush1.bf16.msra.mxu0 %v6533_v8  ;;  %3787 = vmatpush3.bf16.msra.mxu1 %v6534_v17 }
 0x955   :  { %2776 = vmatprep.subr.bf16.mxu0 %v6535_v21  ;;  %3788 = vmatprep.subr.bf16.mxu1 %v6359_v2 }
 0x958   :  { %2777 = vmatpush1.bf16.msra.mxu0 %v6536_v20  ;;  %3789 = vmatpush3.bf16.msra.mxu1 %v6537_v28 }
 0x959   :  { %2844 = vmatprep.subr.bf16.mxu0 %v6538_v9  ;;  %3794 = vmatprep.subr.bf16.mxu1 %v6359_v2  ;;  %v2657_v9 = vunpack.c.h.bf16 %v3108_v62 }
 0x9ce   :  { %v2544_v4 = vpop.f32.mrb[76].mxu1 }
 0x9cf   :  { %v3732_v37 = vpop.f32.mrb[77].mxu1  ;;  %v2545_v39 = vadd.f32 %v2544_v4, %v6419_v42 }
 0x9d0   :  { %v2547_v31 = vpop.f32.mrb[78].mxu1 }
 0x9d1   :  { %v3733_v16 = vpop.f32.mrb[79].mxu1 }
 0x9ee   :  { %v2585_v34 = vpop.f32.mrb[52].mxu0  ;;  %v2626_v19 = vpop.f32.mrb[80].mxu1 }
 0x9ef   :  { %v3839_v13 = vadd.f32 %v6539_v52, %v2585_v34  ;;  %v2587_v38 = vpop.f32.mrb[53].mxu0  ;;  %v3752_v11 = vpop.f32.mrb[81].mxu1  ;;  %v2627_v44 = vadd.f32 %v2626_v19, %v6541_v3 }
 0x9f0   :  { %v2589_v40 = vpop.f32.mrb[54].mxu0  ;;  %v2629_v49 = vpop.f32.mrb[82].mxu1  ;;  %v3841_v29 = vadd.f32 %v6540_v10, %v2587_v38 }
 0x9f1   :  { %v3106_v35 = vmul.f32 -1.442695, %v3839_v13  ;;  %v2590_v50 = vpop.f32.mrb[55].mxu0  ;;  %v3753_v7 = vpop.f32.mrb[83].mxu1 }
 0x9f2   :  { %v3107_v5 = vmul.f32 -1.442695, %v3841_v29 }
 0x9f3   :  { %4112 = vpow2.f32 %v3106_v35 }
 0x9f4   :  { %4114 = vpow2.f32 %v3107_v5 }
 0x9fd   :  { %v4113_v36 = vpop.eup %4112 }
 0x9fe   :  { %v2636_v6 = vadd.f32 1.0, %v4113_v36  ;;  %v4115_v24 = vpop.eup %4114  ;;  %v3109_v36 = vld [vmem:[%s6181_s0 + $0x5c] sm:$0xf] }
 0x9ff   :  { %v2643_v32 = vadd.f32 1.0, %v4115_v24  ;;  %v2658_v24 = vunpack.c.l.bf16 %v3109_v36 }
 0xa00   :  { %4116 = vrcp.f32 %v2636_v6 }
 0xa01   :  { %4118 = vrcp.f32 %v2643_v32 }
 0xa0a   :  { %v4117_v27 = vpop.eup %4116 }
 0xa0b   :  { %v2646_v14 = vmul.f32 %v4117_v27, %v2627_v44  ;;  %v4119_v11 = vpop.eup %4118 }
 0xa0c   :  { %v2649_v49 = vsub.f32 1.0, %v4119_v11 }
 0xa0d   :  { %v2647_v22 = vadd.f32 %v2646_v14, %v2545_v39 }
 0xa0e   :  { %v2693_v8 = vpop.f32.mrb[56].mxu0  ;;  %v2734_v17 = vpop.f32.mrb[84].mxu1 }
 0xa0f   :  { %4120 = vtanh.f32 %v2647_v22  ;;  %v2694_v21 = vadd.f32 %v2693_v8, %v4678_v59  ;;  %v2695_v20 = vpop.f32.mrb[57].mxu0  ;;  %v3772_v28 = vpop.f32.mrb[85].mxu1  ;;  %v2651_v59 = vmul.f32 %v4119_v11, %v5947_v56  ;;  %v2735_v32 = vadd.f32 %v2734_v17, %v4688_v58  ;;  %v3114_v8 = vld [vmem:[%s6188_s7] ss:$0 sm:$0xff]  ;;  %v6542_v58 = vld [vmem:[#allocation13_spill] sm:$0xff] }
 0xa10   :  { %v2696_v37 = vadd.f32 %v2695_v20, %v4681_v60  ;;  %v2697_v31 = vpop.f32.mrb[58].mxu0  ;;  %v2737_v16 = vpop.f32.mrb[86].mxu1 }
 0xa11   :  { %v2740_v34 = vadd.f32 %v2694_v21, %v2656_v43  ;;  %v2698_v19 = vpop.f32.mrb[59].mxu0  ;;  %v3773_v13 = vpop.f32.mrb[87].mxu1 }
 0xa12   :  { %v2747_v38 = vadd.f32 %v2696_v37, %v2657_v9 }
 0xa13   :  { %v3110_v4 = vmul.f32 -1.442695, %v2740_v34 }
 0xa14   :  { %v3111_v40 = vmul.f32 -1.442695, %v2747_v38 }
 0xa15   :  { %4122 = vpow2.f32 %v3110_v4  ;;  %v3115_v4 = vld [vmem:[%s6188_s7 + $0x1] ss:$0 sm:$0xff] }
 0xa16   :  { %4124 = vpow2.f32 %v3111_v40  ;;  %v3116_v40 = vld [vmem:[#allocation4] ss:$0 sm:$0xff] }
 0xa19   :  { %v4121_v35 = vpop.eup %4120 }
 0xa1a   :  { %v2650_v50 = vmul.f32 %v4121_v35, %v2649_v49 }
 0xa1c   :  { %v6125_v7 = vadd.f32 %v2651_v59, %v2650_v50 }
 0xa1f   :  { %v4123_v29 = vpop.eup %4122 }
 0xa20   :  { %v2744_v60 = vadd.f32 1.0, %v4123_v29  ;;  %v4125_v5 = vpop.eup %4124 }
 0xa21   :  { %v2751_v6 = vadd.f32 1.0, %v4125_v5 }
 0xa22   :  { %4126 = vrcp.f32 %v2744_v60 }
 0xa23   :  { %4128 = vrcp.f32 %v2751_v6 }
 0xa2c   :  { %v4127_v44 = vpop.eup %4126 }
 0xa2d   :  { %v2754_v27 = vmul.f32 %v4127_v44, %v2735_v32  ;;  %v4129_v56 = vpop.eup %4128 }
 0xa2e   :  { %v2757_v39 = vsub.f32 1.0, %v4129_v56  ;;  %v2759_v43 = vmul.f32 %v4129_v56, %v5952_v15  ;;  %v6544_v15 = vld [vmem:[#allocation15_spill] sm:$0xff] }
 0xa2f   :  { %v2755_v62 = vadd.f32 %v2754_v27, %v2658_v24 }
 0xa31   :  { %4130 = vtanh.f32 %v2755_v62 }
 0xa3b   :  { %v4131_v14 = vpop.eup %4130 }
 0xa3c   :  { %v2758_v22 = vmul.f32 %v4131_v14, %v2757_v39 }
 0xa3e   :  { %v2760_v21 = vadd.f32 %v2759_v43, %v2758_v22 }
 0xa40   :  { %v2960_v20 = vmul.f32 %v3114_v8, %v2760_v21  ;;  %v2761_v28 = vpack.c.bf16 %v2760_v21, %v2760_v21 }
 0xa42   :  { %2961 = vadd.xlane.f32.xlu0 %v2960_v20  ;;  %2795 = vmatmul.mubr.bf16.vlgmr.msra.gmra.mrb[60].mxu0 %v2761_v28 }
 0xa43   :  { %3791 = vmatmul.mubr.bf16.vlgmr.msra.gmra.mrb[88].mxu1 %v2761_v28  ;;  %2845 = vmatpush1.bf16.msra.mxu0 %v5960_v53  ;;  %v2843_v53 = vpack.c.bf16 %v6125_v7, %v6125_v7 }
 0xa44   :  { %3795 = vmatpush3.bf16.msra.mxu1 %v5963_v54  ;;  %2846 = vmatprep.subr.bf16.mxu0 %v5966_v51 }
 0xa45   :  { %3796 = vmatprep.subr.bf16.mxu1 %v6359_v2  ;;  %2876 = vmatprep.mubr.bf16.mxu0 %v6360_v26  ;;  %v6543_v26 = vld [vmem:[#allocation14_spill] sm:$0xff] }
 0xa46   :  { %3810 = vmatprep.mubr.msk.bf16.mxu1 %vm4344_vm0, %v6359_v2 }
 0xa47   :  { %2847 = vmatpush1.bf16.msra.mxu0 %v5973_v23 }
 0xa48   :  { %3797 = vmatpush3.bf16.msra.mxu1 %v5976_v12  ;;  %2848 = vmatprep.subr.bf16.mxu0 %v5979_v46 }
 0xa49   :  { %3798 = vmatprep.subr.bf16.mxu1 %v6359_v2 }
 0xa4b   :  { %2849 = vmatpush1.bf16.msra.mxu0 %v5983_v57 }
 0xa4c   :  { %3799 = vmatpush3.bf16.msra.mxu1 %v5986_v1  ;;  %2850 = vmatprep.subr.bf16.mxu0 %v5989_v55 }
 0xa4d   :  { %3800 = vmatprep.subr.bf16.mxu1 %v6359_v2 }
 0xa4f   :  { %2851 = vmatpush1.bf16.msra.mxu0 %v5993_v63 }
 0xa50   :  { %3801 = vmatpush3.bf16.msra.mxu1 %v5996_v0  ;;  %2852 = vmatprep.subr.bf16.mxu0 %v5999_v47 }
 0xa51   :  { %3802 = vmatprep.subr.bf16.mxu1 %v6359_v2 }
 0xa53   :  { %2853 = vmatpush1.bf16.msra.mxu0 %v6003_v30 }
 0xa54   :  { %3803 = vmatpush3.bf16.msra.mxu1 %v6006_v25  ;;  %2854 = vmatprep.subr.bf16.mxu0 %v6009_v61 }
 0xa55   :  { %3804 = vmatprep.subr.bf16.mxu1 %v6359_v2 }
 0xa57   :  { %2855 = vmatpush1.bf16.msra.mxu0 %v6013_v41 }
 0xa58   :  { %3805 = vmatpush3.bf16.msra.mxu1 %v6542_v58  ;;  %2856 = vmatprep.subr.bf16.mxu0 %v6543_v26 }
 0xa59   :  { %3806 = vmatprep.subr.bf16.mxu1 %v6359_v2 }
 0xa5b   :  { %2857 = vmatpush1.bf16.msra.mxu0 %v6544_v15 }
 0xa5c   :  { %3807 = vmatpush3.bf16.msra.mxu1 %v6026_v33  ;;  %2858 = vmatprep.subr.bf16.mxu0 %v6029_v18 }
 0xa5d   :  { %3808 = vmatprep.subr.bf16.mxu1 %v6359_v2 }
 0xa5f   :  { %2859 = vmatpush1.bf16.msra.mxu0 %v6033_v45 }
 0xa60   :  { %3809 = vmatpush3.bf16.msra.mxu1 %v6036_v48 }
 0xa62   :  { %2877 = vmatmul.mubr.bf16.vlgmr.msra.gmra.mrb[60].mxu0 %v2843_v53 }
 0xa63   :  { %3811 = vmatmul.mubr.bf16.vlgmr.msra.gmra.mrb[92].mxu1 %v2843_v53 }
 0xb16   :  { %v2837_v54 = vpop.f32.mrb[88].mxu1 }
 0xb17   :  { %v3792_v51 = vpop.f32.mrb[89].mxu1  ;;  %v2838_v9 = vadd.f32 %v2837_v54, %v6419_v42 }
 0xb18   :  { %v2840_v23 = vpop.f32.mrb[90].mxu1 }
 0xb19   :  { %v3793_v12 = vpop.f32.mrb[91].mxu1 }
 0xb35   :  { %v2878_v46 = vpop.f32.mrb[60].mxu0 }
 0xb36   :  { %v3843_v57 = vadd.f32 %v6539_v52, %v2878_v46  ;;  %v2919_v1 = vpop.f32.mrb[92].mxu1  ;;  %v2880_v55 = vpop.f32.mrb[61].mxu0 }
 0xb37   :  { %v3812_v63 = vpop.f32.mrb[93].mxu1  ;;  %v2882_v2 = vpop.f32.mrb[62].mxu0  ;;  %v3845_v25 = vadd.f32 %v6540_v10, %v2880_v55  ;;  %v2920_v52 = vadd.f32 %v2919_v1, %v6541_v3 }
 0xb38   :  { %v3112_v0 = vmul.f32 -1.442695, %v3843_v57  ;;  %v2922_v47 = vpop.f32.mrb[94].mxu1  ;;  %v2883_v30 = vpop.f32.mrb[63].mxu0 }
 0xb39   :  { %v3813_v61 = vpop.f32.mrb[95].mxu1  ;;  %v3113_v41 = vmul.f32 -1.442695, %v3845_v25  ;;  %v2962_v3 = vpop.xlane.xlu0 %2961 }
 0xb3a   :  { %4132 = vpow2.f32 %v3112_v0 }
 0xb3b   :  { %4134 = vpow2.f32 %v3113_v41 }
 0xb44   :  { %v4133_v45 = vpop.eup %4132 }
 0xb45   :  { %v2929_v48 = vadd.f32 1.0, %v4133_v45  ;;  %v4135_v33 = vpop.eup %4134 }
 0xb46   :  { %v2936_v18 = vadd.f32 1.0, %v4135_v33 }
 0xb47   :  { %4136 = vrcp.f32 %v2929_v48 }
 0xb48   :  { %4138 = vrcp.f32 %v2936_v18 }
 0xb51   :  { %v4137_v17 = vpop.eup %4136 }
 0xb52   :  { %v2939_v37 = vmul.f32 %v4137_v17, %v2920_v52  ;;  %v4139_v16 = vpop.eup %4138 }
 0xb53   :  { %v2942_v10 = vsub.f32 1.0, %v4139_v16  ;;  %v2944_v13 = vmul.f32 %v4139_v16, %v6125_v7 }
 0xb54   :  { %v2940_v31 = vadd.f32 %v2939_v37, %v2838_v9 }
 0xb56   :  { %4140 = vtanh.f32 %v2940_v31 }
 0xb60   :  { %v4141_v34 = vpop.eup %4140 }
 0xb61   :  { %v2943_v19 = vmul.f32 %v4141_v34, %v2942_v10 }
 0xb63   :  { %v2945_v38 = vadd.f32 %v2944_v13, %v2943_v19 }
 0xb65   :  { %v2970_v11 = vmul.f32 %v3115_v4, %v2945_v38 }
 0xb67   :  { %2971 = vadd.xlane.f32.xlu0 %v2970_v11 }
 0xbf4   :  { %v2972_v42 = vpop.xlane.xlu0 %2971 }
 0xbf5   :  { %v2973_v49 = vadd.f32 %v2972_v42, %v2962_v3 }
 0xbf7   :  { %v2981_v35 = vadd.f32 %v3116_v40, %v2973_v49 }
 0xbf9   :  { %v3117_v50 = vmul.f32 -1.442695, %v2981_v35 }
 0xbfb   :  { %4142 = vpow2.f32 %v3117_v50 }
 0xc05   :  { %v4143_v59 = vpop.eup %4142 }
 0xc06   :  { %v2985_v29 = vadd.f32 1.0, %v4143_v59 }
 0xc08   :  { %4144 = vrcp.f32 %v2985_v29 }
 0xc12   :  { %v4145_v60 = vpop.eup %4144 }
 0xc13   :  { %2989 = vst.msk [vmem:[%s6190_s9] sm:$0xff] %vm2988_vm1, %v4145_v60 }
 0xc14   :  { %2994 = vsyncpa [#allocation6], 1 }
 0xc15   :  { %2995 = vsyncpa [#allocation8], 1 }

</bundles_post_ra>
